<compile_context>
chip_gen: v5e
topology: v5e:2x2
jax: 0.10.0
libtpu: 0.0.40
codegen_flags: <defaults>
</compile_context>

<pallas_src>
import functools
import math

import jax
import jax.numpy as jnp
from jax.experimental import pallas as pl
from jax.experimental.pallas import tpu as pltpu


# -----------------------------------------------------------------------------
# Model configuration (small, consistent with ResNet(block, layers, block_inplanes))
# -----------------------------------------------------------------------------
BLOCK_INPLANES = [8, 16, 32, 64]
LAYERS = [1, 1, 1, 1]
N_INPUT_CHANNELS = 1
CONV1_T_SIZE = 1
CONV1_T_STRIDE = 1
N_CLASSES = 16

ACT_DTYPE = jnp.bfloat16   # intermediate activation storage dtype (HBM traffic /2)
_MAX_M_TILE = 512          # big M tile feeds the MXU longer per RHS load; fits VMEM
_PARALLEL_1D = pltpu.CompilerParams(dimension_semantics=("parallel",))


def _round_up(x, m):
    return (x + m - 1) // m * m


# -----------------------------------------------------------------------------
# Pallas kernels
# -----------------------------------------------------------------------------
def _mm_epilogue_kernel(a_ref, b_ref, s_ref, c_ref, o_ref, *, do_relu):
    # out = relu?( (A @ B) * scale + bias )      A,B bf16; accumulate f32 on MXU.
    acc = jnp.dot(a_ref[...], b_ref[...], preferred_element_type=jnp.float32)
    y = acc * s_ref[...] + c_ref[...]
    if do_relu:
        y = jnp.maximum(y, 0.0)
    o_ref[...] = y.astype(o_ref.dtype)


def _mm_epilogue_res_kernel(a_ref, b_ref, s_ref, c_ref, r_ref, o_ref, *, do_relu):
    # out = relu?( (A @ B) * scale + bias + residual )   residual upcast to f32.
    acc = jnp.dot(a_ref[...], b_ref[...], preferred_element_type=jnp.float32)
    y = acc * s_ref[...] + c_ref[...] + r_ref[...].astype(jnp.float32)
    if do_relu:
        y = jnp.maximum(y, 0.0)
    o_ref[...] = y.astype(o_ref.dtype)


def _inorm_relu_kernel(x_ref, o_ref, *, eps):
    # x_ref: (1, S, C) one batch item; per-(n, c) normalization over S, then ReLU.
    x = x_ref[...].astype(jnp.float32)
    mean = jnp.mean(x, axis=1, keepdims=True)
    var = jnp.mean(jnp.square(x - mean), axis=1, keepdims=True)
    y = (x - mean) * jax.lax.rsqrt(var + eps)
    o_ref[...] = jnp.maximum(y, 0.0).astype(o_ref.dtype)


def _window_max_kernel(p_ref, o_ref):
    # p_ref: (k^3, tr, L) -> elementwise max over the leading window axis.
    y = p_ref[0]
    for k in range(1, p_ref.shape[0]):
        y = jnp.maximum(y, p_ref[k])
    o_ref[...] = y


def _avgpool_kernel(x_ref, o_ref):
    # x_ref: (1, S, C) -> (1, 1, C) mean over spatial positions (f32 accumulate).
    o_ref[...] = jnp.mean(x_ref[...].astype(jnp.float32), axis=1, keepdims=True)


# -----------------------------------------------------------------------------
# Pallas wrappers
# -----------------------------------------------------------------------------
def fused_matmul(a, b, scale, bias, residual=None, do_relu=False,
                 out_dtype=jnp.float32):
    """relu?((a @ b) * scale + bias [+ residual]); bf16 operands, f32 accumulate.

    Full-K / full-N blocks (no reduction grid axis, no K/N padding); only M is
    tiled.  scale/bias are per-output-column (length N) f32 vectors.
    """
    M, K = a.shape
    K2, N = b.shape
    assert K == K2
    a = a.astype(jnp.bfloat16)
    b = b.astype(jnp.bfloat16)
    s2 = scale.reshape(1, N).astype(jnp.float32)
    c2 = bias.reshape(1, N).astype(jnp.float32)

    if M <= _MAX_M_TILE:
        tm, Mp = M, M
    else:
        tm = _MAX_M_TILE
        Mp = _round_up(M, tm)
    if Mp != M:                               # rare: pad only the ragged M edge
        a = jnp.pad(a, ((0, Mp - M), (0, 0)))
        if residual is not None:
            residual = jnp.pad(residual, ((0, Mp - M), (0, 0)))

    in_specs = [pl.BlockSpec((tm, K), lambda i: (i, 0)),
                pl.BlockSpec((K, N), lambda i: (0, 0)),
                pl.BlockSpec((1, N), lambda i: (0, 0)),
                pl.BlockSpec((1, N), lambda i: (0, 0))]
    args = [a, b, s2, c2]
    if residual is not None:
        in_specs.append(pl.BlockSpec((tm, N), lambda i: (i, 0)))
        args.append(residual)                  # read in its stored dtype (bf16)
        kernel = functools.partial(_mm_epilogue_res_kernel, do_relu=do_relu)
    else:
        kernel = functools.partial(_mm_epilogue_kernel, do_relu=do_relu)

    out = pl.pallas_call(
        kernel,
        out_shape=jax.ShapeDtypeStruct((Mp, N), out_dtype),
        grid=(Mp // tm,),
        in_specs=in_specs,
        out_specs=pl.BlockSpec((tm, N), lambda i: (i, 0)),
        compiler_params=_PARALLEL_1D,
    )(*args)
    return out[:M] if Mp != M else out


def _im2col_3d(x, ksize, stride, pad):
    kt, kh, kw = ksize
    st, sh, sw = stride
    pt, ph, pw = pad
    xp = jnp.pad(x, ((0, 0), (pt, pt), (ph, ph), (pw, pw), (0, 0)))
    N, Dp, Hp, Wp, C = xp.shape
    Do = (Dp - kt) // st + 1
    Ho = (Hp - kh) // sh + 1
    Wo = (Wp - kw) // sw + 1
    cols = []
    for dt in range(kt):
        for dh in range(kh):
            for dw in range(kw):
                patch = xp[:, dt:dt + st * Do:st,
                           dh:dh + sh * Ho:sh,
                           dw:dw + sw * Wo:sw, :]
                cols.append(patch)
    col = jnp.stack(cols, axis=4)                       # (N,Do,Ho,Wo,k^3,C)
    col = col.reshape(N * Do * Ho * Wo, kt * kh * kw * C)
    return col, (N, Do, Ho, Wo)


def conv3d_fused(x, w, stride, pad, scale, bias, residual=None, do_relu=False,
                 out_dtype=ACT_DTYPE):
    """Conv3d (bias=False) + fused per-channel affine (+ residual) (+ ReLU)."""
    cout, cin, kt, kh, kw = w.shape
    # build im2col directly in bf16 -> halves the HBM traffic of the `col` matrix
    col, (n, do_, ho, wo) = _im2col_3d(x.astype(jnp.bfloat16), (kt, kh, kw), stride, pad)
    wmat = jnp.transpose(w, (2, 3, 4, 1, 0)).reshape(kt * kh * kw * cin, cout)
    r2 = residual.reshape(-1, residual.shape[-1]) if residual is not None else None
    y = fused_matmul(col, wmat, scale, bias, residual=r2, do_relu=do_relu,
                     out_dtype=out_dtype)
    return y.reshape(n, do_, ho, wo, cout)


def instance_norm_relu(x, eps=1e-5):
    # InstanceNorm3d(affine=False, track_running_stats=False) + ReLU, fused.
    N, D, H, W, C = x.shape
    S = D * H * W
    x3 = x.reshape(N, S, C)                              # free reshape, C stays last
    # TODO(synk): for very large volumes tile S as well (one batch item per block here).
    out = pl.pallas_call(
        functools.partial(_inorm_relu_kernel, eps=eps),
        out_shape=jax.ShapeDtypeStruct((N, S, C), x.dtype),
        grid=(N,),
        in_specs=[pl.BlockSpec((1, S, C), lambda n: (n, 0, 0))],
        out_specs=pl.BlockSpec((1, S, C), lambda n: (n, 0, 0)),
        compiler_params=_PARALLEL_1D,
    )(x3)
    return out.reshape(N, D, H, W, C)


def maxpool3d_ndhwc(x, ksize=3, stride=2, pad=1):
    N, D, H, W, C = x.shape
    neg = float(jnp.finfo(x.dtype).min)
    xp = jnp.pad(x, ((0, 0), (pad, pad), (pad, pad), (pad, pad), (0, 0)),
                 constant_values=neg)
    Dp, Hp, Wp = D + 2 * pad, H + 2 * pad, W + 2 * pad
    Do = (Dp - ksize) // stride + 1
    Ho = (Hp - ksize) // stride + 1
    Wo = (Wp - ksize) // stride + 1
    M = N * Do * Ho * Wo
    total = M * C
    # lane-dense view: the window max is purely elementwise over (M, C)
    if total % 128 == 0:
        R, L = total // 128, 128
    else:
        R, L = M, C
    # TODO(synk): the 27 shifted windows are still materialized by XLA; reading the
    # padded activation directly in-kernel would save the extra HBM pass.
    patches = []
    for dt in range(ksize):
        for dh in range(ksize):
            for dw in range(ksize):
                p = xp[:, dt:dt + stride * Do:stride,
                       dh:dh + stride * Ho:stride,
                       dw:dw + stride * Wo:stride, :]
                patches.append(p.reshape(R, L))
    stacked = jnp.stack(patches, axis=0)                 # (k^3, R, L)
    KK = ksize ** 3

    if R > 256:
        tr = 128
        Rp = _round_up(R, tr)
        if Rp != R:
            stacked = jnp.pad(stacked, ((0, 0), (0, Rp - R), (0, 0)),
                              constant_values=neg)
    else:
        tr, Rp = R, R

    y = pl.pallas_call(
        _window_max_kernel,
        out_shape=jax.ShapeDtypeStruct((Rp, L), x.dtype),
        grid=(Rp // tr,),
        in_specs=[pl.BlockSpec((KK, tr, L), lambda i: (0, i, 0))],
        out_specs=pl.BlockSpec((tr, L), lambda i: (i, 0)),
        compiler_params=_PARALLEL_1D,
    )(stacked)
    if Rp != R:
        y = y[:R]
    return y.reshape(N, Do, Ho, Wo, C)


def adaptive_avgpool_to_1(x):
    # AdaptiveAvgPool3d((1,1,1)) + flatten -> (N, C), f32 output for the head.
    N, D, H, W, C = x.shape
    S = D * H * W
    x3 = x.reshape(N, S, C)
    out = pl.pallas_call(
        _avgpool_kernel,
        out_shape=jax.ShapeDtypeStruct((N, 1, C), jnp.float32),
        grid=(N,),
        in_specs=[pl.BlockSpec((1, S, C), lambda n: (n, 0, 0))],
        out_specs=pl.BlockSpec((1, 1, C), lambda n: (n, 0, 0)),
        compiler_params=_PARALLEL_1D,
    )(x3)
    return out.reshape(N, C)


# -----------------------------------------------------------------------------
# Parameter construction (deterministic, matches the module's init scheme)
# -----------------------------------------------------------------------------
def _kaiming_conv(key, cout, cin, kt, kh, kw):
    fan_out = cout * kt * kh * kw
    std = math.sqrt(2.0 / fan_out)
    return std * jax.random.normal(key, (cout, cin, kt, kh, kw), jnp.float32)


def _linear_params(key, fan_in, fan_out):
    kw_, kb_ = jax.random.split(key)
    bound = 1.0 / math.sqrt(fan_in)
    w = jax.random.uniform(kw_, (fan_out, fan_in), jnp.float32, -bound, bound)
    b = jax.random.uniform(kb_, (fan_out,), jnp.float32, -bound, bound)
    return w, b


def _bn_eval_affine(c, eps=1e-5):
    scale = jnp.full((c,), 1.0 / math.sqrt(1.0 + eps), jnp.float32)
    bias = jnp.zeros((c,), jnp.float32)
    return scale, bias


def make_params(key):
    keys = jax.random.split(key, 64)
    ki = iter(keys)
    p = {}
    in_planes = BLOCK_INPLANES[0]
    p['conv1_w'] = _kaiming_conv(next(ki), in_planes, N_INPUT_CHANNELS,
                                 CONV1_T_SIZE, 7, 7)
    layers = []
    for li, (planes, nblocks) in enumerate(zip(BLOCK_INPLANES, LAYERS)):
        layer_stride = 1 if li == 0 else 2
        blocks = []
        for bi in range(nblocks):
            s = layer_stride if bi == 0 else 1
            blk = {'stride': s}
            blk['conv1_w'] = _kaiming_conv(next(ki), planes, in_planes, 3, 3, 3)
            blk['bn1'] = _bn_eval_affine(planes)
            blk['conv2_w'] = _kaiming_conv(next(ki), planes, planes, 3, 3, 3)
            blk['bn2'] = _bn_eval_affine(planes)
            if s != 1 or in_planes != planes:            # BasicBlock.expansion == 1
                blk['ds_w'] = _kaiming_conv(next(ki), planes, in_planes, 1, 1, 1)
                blk['ds_bn'] = _bn_eval_affine(planes)
            in_planes = planes
            blocks.append(blk)
        layers.append(blocks)
    p['layers'] = layers
    p['fc_w'], p['fc_b'] = _linear_params(next(ki), BLOCK_INPLANES[3], N_CLASSES)
    p['fc1_w'], p['fc1_b'] = _linear_params(next(ki), N_CLASSES, 2)
    return p


# -----------------------------------------------------------------------------
# Forward pass
# -----------------------------------------------------------------------------
def basic_block_forward(x, blk):
    s = blk['stride']
    out = conv3d_fused(x, blk['conv1_w'], (s, s, s), (1, 1, 1),
                       *blk['bn1'], do_relu=True)
    if 'ds_w' in blk:
        res = conv3d_fused(x, blk['ds_w'], (s, s, s), (0, 0, 0),
                           *blk['ds_bn'], do_relu=False)
    else:
        res = x
    out = conv3d_fused(out, blk['conv2_w'], (1, 1, 1), (1, 1, 1),
                       *blk['bn2'], residual=res, do_relu=True)
    return out


def resnet_forward(params, x_ncdhw):
    x = jnp.transpose(x_ncdhw, (0, 2, 3, 4, 1)).astype(jnp.float32)   # -> NDHWC
    # stem: conv1 -> InstanceNorm3d + ReLU (fused) -> MaxPool3d(3, 2, 1)
    c0 = params['conv1_w'].shape[0]
    ones0 = jnp.ones((c0,), jnp.float32)
    zeros0 = jnp.zeros((c0,), jnp.float32)
    x = conv3d_fused(x, params['conv1_w'],
                     (CONV1_T_STRIDE, 2, 2), (CONV1_T_SIZE // 2, 3, 3),
                     ones0, zeros0, do_relu=False)
    x = instance_norm_relu(x)
    x = maxpool3d_ndhwc(x, 3, 2, 1)
    # residual stages
    for blocks in params['layers']:
        for blk in blocks:
            x = basic_block_forward(x, blk)
    # head: avgpool -> fc (bias fused) -> fc1 (bias fused), all f32
    feat = adaptive_avgpool_to_1(x)                                   # (N, C)
    x = fused_matmul(feat, params['fc_w'].T,
                     jnp.ones((N_CLASSES,), jnp.float32), params['fc_b'],
                     out_dtype=jnp.float32)
    x = fused_matmul(x, params['fc1_w'].T,
                     jnp.ones((2,), jnp.float32), params['fc1_b'],
                     out_dtype=jnp.float32)
    return x


if __name__ == "__main__":
    key = jax.random.PRNGKey(0)
    kp, kx = jax.random.split(key)
    params = make_params(kp)
    # PyTorch-style NCDHW input: (batch=2, channels=1, D=8, H=16, W=16)
    x = jax.random.normal(kx, (2, N_INPUT_CHANNELS, 8, 16, 16), jnp.float32)
    fwd = jax.jit(functools.partial(resnet_forward, params))
    out = jax.block_until_ready(fwd(x))
    assert out.shape == (2, 2), out.shape
    assert bool(jnp.all(jnp.isfinite(out)))
    print("KERNEL_OK")
</pallas_src>

<mosaic_0001>
module attributes {stable_mosaic.version = 11 : i64} {
  func.func @_mm_epilogue_kernel(%arg0: i32, %arg1: memref<512x49xbf16, #tpu.memory_space<vmem>>, %arg2: memref<49x8xbf16, #tpu.memory_space<vmem>>, %arg3: memref<1x8xf32, #tpu.memory_space<vmem>>, %arg4: memref<1x8xf32, #tpu.memory_space<vmem>>, %arg5: memref<512x8xbf16, #tpu.memory_space<vmem>>) attributes {dimension_semantics = [#tpu.dimension_semantics<parallel>], iteration_bounds = array<i64: 2>, scalar_prefetch = 0 : i64, scratch_operands = 0 : i64, tpu.core_type = #tpu.core_type<tc>, window_params = [{transform_indices = @transform_0, window_bounds = array<i64: 512, 49>}, {pipeline_mode = #tpu.pipeline_mode<synchronous>, transform_indices = @transform_1, window_bounds = array<i64: 49, 8>}, {pipeline_mode = #tpu.pipeline_mode<synchronous>, transform_indices = @transform_2, window_bounds = array<i64: 1, 8>}, {pipeline_mode = #tpu.pipeline_mode<synchronous>, transform_indices = @transform_3, window_bounds = array<i64: 1, 8>}, {transform_indices = @transform_4, window_bounds = array<i64: 512, 8>}]} {
    %c0 = arith.constant 0 : index
    %c0_0 = arith.constant 0 : index
    %0 = vector.load %arg1[%c0, %c0_0] : memref<512x49xbf16, #tpu.memory_space<vmem>>, vector<512x49xbf16>
    %c0_1 = arith.constant 0 : index
    %c0_2 = arith.constant 0 : index
    %1 = vector.load %arg2[%c0_1, %c0_2] : memref<49x8xbf16, #tpu.memory_space<vmem>>, vector<49x8xbf16>
    %cst = arith.constant dense<0.000000e+00> : vector<512x8xf32>
    %2 = tpu.matmul %0, %1, %cst {dimension_numbers = #tpu.dot_dimension_numbers<[1], [0], [0], [1], [0, 0, 1, 1], [], []>} : vector<512x49xbf16>, vector<49x8xbf16>, vector<512x8xf32> -> vector<512x8xf32>
    %c0_3 = arith.constant 0 : index
    %c0_4 = arith.constant 0 : index
    %3 = vector.load %arg3[%c0_3, %c0_4] : memref<1x8xf32, #tpu.memory_space<vmem>>, vector<1x8xf32>
    %4 = vector.broadcast %3 : vector<1x8xf32> to vector<512x8xf32>
    %5 = arith.mulf %2, %4 : vector<512x8xf32>
    %c0_5 = arith.constant 0 : index
    %c0_6 = arith.constant 0 : index
    %6 = vector.load %arg4[%c0_5, %c0_6] : memref<1x8xf32, #tpu.memory_space<vmem>>, vector<1x8xf32>
    %7 = vector.broadcast %6 : vector<1x8xf32> to vector<512x8xf32>
    %8 = arith.addf %5, %7 : vector<512x8xf32>
    %9 = arith.truncf %8 : vector<512x8xf32> to vector<512x8xbf16>
    %c0_7 = arith.constant 0 : index
    %c0_8 = arith.constant 0 : index
    %10 = vector.load %arg5[%c0_7, %c0_8] : memref<512x8xbf16, #tpu.memory_space<vmem>>, vector<512x8xbf16>
    tpu.vector_store %arg5[%c0_7, %c0_8], %9 {strides = array<i32>} : memref<512x8xbf16, #tpu.memory_space<vmem>>, vector<512x8xbf16>,
    return
  }
  func.func @transform_0(%arg0: i32) -> (i32, i32) {
    %c0_i32 = arith.constant 0 : i32
    %c0_i32_0 = arith.constant 0 : i32
    return %arg0, %c0_i32 : i32, i32
  }
  func.func @transform_1(%arg0: i32) -> (i32, i32) {
    %c0_i32 = arith.constant 0 : i32
    %c0_i32_0 = arith.constant 0 : i32
    %c0_i32_1 = arith.constant 0 : i32
    return %c0_i32, %c0_i32_0 : i32, i32
  }
  func.func @transform_2(%arg0: i32) -> (i32, i32) {
    %c0_i32 = arith.constant 0 : i32
    %c0_i32_0 = arith.constant 0 : i32
    %c0_i32_1 = arith.constant 0 : i32
    return %c0_i32, %c0_i32_0 : i32, i32
  }
  func.func @transform_3(%arg0: i32) -> (i32, i32) {
    %c0_i32 = arith.constant 0 : i32
    %c0_i32_0 = arith.constant 0 : i32
    %c0_i32_1 = arith.constant 0 : i32
    return %c0_i32, %c0_i32_0 : i32, i32
  }
  func.func @transform_4(%arg0: i32) -> (i32, i32) {
    %c0_i32 = arith.constant 0 : i32
    %c0_i32_0 = arith.constant 0 : i32
    return %arg0, %c0_i32 : i32, i32
  }
}

module attributes {stable_mosaic.version = 11 : i64} {
  func.func @_inorm_relu_kernel(%arg0: i32, %arg1: memref<1x512x8xbf16, #tpu.memory_space<vmem>>, %arg2: memref<1x512x8xbf16, #tpu.memory_space<vmem>>) attributes {dimension_semantics = [#tpu.dimension_semantics<parallel>], iteration_bounds = array<i64: 2>, scalar_prefetch = 0 : i64, scratch_operands = 0 : i64, tpu.core_type = #tpu.core_type<tc>, window_params = [{transform_indices = @transform_0, window_bounds = array<i64: 1, 512, 8>}, {transform_indices = @transform_1, window_bounds = array<i64: 1, 512, 8>}]} {
    %c0 = arith.constant 0 : index
    %c0_0 = arith.constant 0 : index
    %c0_1 = arith.constant 0 : index
    %0 = vector.load %arg1[%c0, %c0_0, %c0_1] : memref<1x512x8xbf16, #tpu.memory_space<vmem>>, vector<1x512x8xbf16>
    %1 = arith.extf %0 : vector<1x512x8xbf16> to vector<1x512x8xf32>
    %cst = arith.constant dense<0.000000e+00> : vector<1x8xf32>
    %2 = vector.multi_reduction <add>, %1, %cst [1] : vector<1x512x8xf32> to vector<1x8xf32>
    %3 = vector.shape_cast %2 : vector<1x8xf32> to vector<1x1x8xf32>
    %cst_2 = arith.constant 5.120000e+02 : f32
    %4 = vector.broadcast %cst_2 : f32 to vector<1x1x8xf32>
    %5 = arith.divf %3, %4 : vector<1x1x8xf32>
    %6 = vector.broadcast %5 : vector<1x1x8xf32> to vector<1x512x8xf32>
    %7 = arith.subf %1, %6 : vector<1x512x8xf32>
    %8 = arith.mulf %7, %7 : vector<1x512x8xf32>
    %cst_3 = arith.constant dense<0.000000e+00> : vector<1x8xf32>
    %9 = vector.multi_reduction <add>, %8, %cst_3 [1] : vector<1x512x8xf32> to vector<1x8xf32>
    %10 = vector.shape_cast %9 : vector<1x8xf32> to vector<1x1x8xf32>
    %cst_4 = arith.constant 5.120000e+02 : f32
    %11 = vector.broadcast %cst_4 : f32 to vector<1x1x8xf32>
    %12 = arith.divf %10, %11 : vector<1x1x8xf32>
    %13 = vector.broadcast %5 : vector<1x1x8xf32> to vector<1x512x8xf32>
    %14 = arith.subf %1, %13 : vector<1x512x8xf32>
    %cst_5 = arith.constant 9.99999974E-6 : f32
    %15 = vector.broadcast %cst_5 : f32 to vector<1x1x8xf32>
    %16 = arith.addf %12, %15 : vector<1x1x8xf32>
    %17 = math.rsqrt %16 : vector<1x1x8xf32>
    %18 = vector.broadcast %17 : vector<1x1x8xf32> to vector<1x512x8xf32>
    %19 = arith.mulf %14, %18 : vector<1x512x8xf32>
    %cst_6 = arith.constant 0.000000e+00 : f32
    %20 = vector.broadcast %cst_6 : f32 to vector<1x512x8xf32>
    %21 = arith.maximumf %19, %20 : vector<1x512x8xf32>
    %22 = arith.truncf %21 : vector<1x512x8xf32> to vector<1x512x8xbf16>
    %c0_7 = arith.constant 0 : index
    %c0_8 = arith.constant 0 : index
    %c0_9 = arith.constant 0 : index
    %23 = vector.load %arg2[%c0_7, %c0_8, %c0_9] : memref<1x512x8xbf16, #tpu.memory_space<vmem>>, vector<1x512x8xbf16>
    tpu.vector_store %arg2[%c0_7, %c0_8, %c0_9], %22 {strides = array<i32>} : memref<1x512x8xbf16, #tpu.memory_space<vmem>>, vector<1x512x8xbf16>,
    return
  }
  func.func @transform_0(%arg0: i32) -> (i32, i32, i32) {
    %c0_i32 = arith.constant 0 : i32
    %c0_i32_0 = arith.constant 0 : i32
    %c0_i32_1 = arith.constant 0 : i32
    return %arg0, %c0_i32, %c0_i32_0 : i32, i32, i32
  }
  func.func @transform_1(%arg0: i32) -> (i32, i32, i32) {
    %c0_i32 = arith.constant 0 : i32
    %c0_i32_0 = arith.constant 0 : i32
    %c0_i32_1 = arith.constant 0 : i32
    return %arg0, %c0_i32, %c0_i32_0 : i32, i32, i32
  }
}

module attributes {stable_mosaic.version = 11 : i64} {
  func.func @_window_max_kernel(%arg0: i32, %arg1: memref<27x8x128xbf16, #tpu.memory_space<vmem>>, %arg2: memref<8x128xbf16, #tpu.memory_space<vmem>>) attributes {dimension_semantics = [#tpu.dimension_semantics<parallel>], iteration_bounds = array<i64: 1>, scalar_prefetch = 0 : i64, scratch_operands = 0 : i64, tpu.core_type = #tpu.core_type<tc>, window_params = [{transform_indices = @transform_0, window_bounds = array<i64: 27, 8, 128>}, {transform_indices = @transform_1, window_bounds = array<i64: 8, 128>}]} {
    %c0 = arith.constant 0 : index
    %c0_0 = arith.constant 0 : index
    %c0_1 = arith.constant 0 : index
    %0 = vector.load %arg1[%c0, %c0_0, %c0_1] : memref<27x8x128xbf16, #tpu.memory_space<vmem>>, vector<1x8x128xbf16>
    %1 = vector.shape_cast %0 : vector<1x8x128xbf16> to vector<8x128xbf16>
    %c1 = arith.constant 1 : index
    %c0_2 = arith.constant 0 : index
    %c0_3 = arith.constant 0 : index
    %2 = vector.load %arg1[%c1, %c0_2, %c0_3] : memref<27x8x128xbf16, #tpu.memory_space<vmem>>, vector<1x8x128xbf16>
    %3 = vector.shape_cast %2 : vector<1x8x128xbf16> to vector<8x128xbf16>
    %4 = arith.maximumf %1, %3 : vector<8x128xbf16>
    %c2 = arith.constant 2 : index
    %c0_4 = arith.constant 0 : index
    %c0_5 = arith.constant 0 : index
    %5 = vector.load %arg1[%c2, %c0_4, %c0_5] : memref<27x8x128xbf16, #tpu.memory_space<vmem>>, vector<1x8x128xbf16>
    %6 = vector.shape_cast %5 : vector<1x8x128xbf16> to vector<8x128xbf16>
    %7 = arith.maximumf %4, %6 : vector<8x128xbf16>
    %c3 = arith.constant 3 : index
    %c0_6 = arith.constant 0 : index
    %c0_7 = arith.constant 0 : index
    %8 = vector.load %arg1[%c3, %c0_6, %c0_7] : memref<27x8x128xbf16, #tpu.memory_space<vmem>>, vector<1x8x128xbf16>
    %9 = vector.shape_cast %8 : vector<1x8x128xbf16> to vector<8x128xbf16>
    %10 = arith.maximumf %7, %9 : vector<8x128xbf16>
    %c4 = arith.constant 4 : index
    %c0_8 = arith.constant 0 : index
    %c0_9 = arith.constant 0 : index
    %11 = vector.load %arg1[%c4, %c0_8, %c0_9] : memref<27x8x128xbf16, #tpu.memory_space<vmem>>, vector<1x8x128xbf16>
    %12 = vector.shape_cast %11 : vector<1x8x128xbf16> to vector<8x128xbf16>
    %13 = arith.maximumf %10, %12 : vector<8x128xbf16>
    %c5 = arith.constant 5 : index
    %c0_10 = arith.constant 0 : index
    %c0_11 = arith.constant 0 : index
    %14 = vector.load %arg1[%c5, %c0_10, %c0_11] : memref<27x8x128xbf16, #tpu.memory_space<vmem>>, vector<1x8x128xbf16>
    %15 = vector.shape_cast %14 : vector<1x8x128xbf16> to vector<8x128xbf16>
    %16 = arith.maximumf %13, %15 : vector<8x128xbf16>
    %c6 = arith.constant 6 : index
    %c0_12 = arith.constant 0 : index
    %c0_13 = arith.constant 0 : index
    %17 = vector.load %arg1[%c6, %c0_12, %c0_13] : memref<27x8x128xbf16, #tpu.memory_space<vmem>>, vector<1x8x128xbf16>
    %18 = vector.shape_cast %17 : vector<1x8x128xbf16> to vector<8x128xbf16>
    %19 = arith.maximumf %16, %18 : vector<8x128xbf16>
    %c7 = arith.constant 7 : index
    %c0_14 = arith.constant 0 : index
    %c0_15 = arith.constant 0 : index
    %20 = vector.load %arg1[%c7, %c0_14, %c0_15] : memref<27x8x128xbf16, #tpu.memory_space<vmem>>, vector<1x8x128xbf16>
    %21 = vector.shape_cast %20 : vector<1x8x128xbf16> to vector<8x128xbf16>
    %22 = arith.maximumf %19, %21 : vector<8x128xbf16>
    %c8 = arith.constant 8 : index
    %c0_16 = arith.constant 0 : index
    %c0_17 = arith.constant 0 : index
    %23 = vector.load %arg1[%c8, %c0_16, %c0_17] : memref<27x8x128xbf16, #tpu.memory_space<vmem>>, vector<1x8x128xbf16>
    %24 = vector.shape_cast %23 : vector<1x8x128xbf16> to vector<8x128xbf16>
    %25 = arith.maximumf %22, %24 : vector<8x128xbf16>
    %c9 = arith.constant 9 : index
    %c0_18 = arith.constant 0 : index
    %c0_19 = arith.constant 0 : index
    %26 = vector.load %arg1[%c9, %c0_18, %c0_19] : memref<27x8x128xbf16, #tpu.memory_space<vmem>>, vector<1x8x128xbf16>
    %27 = vector.shape_cast %26 : vector<1x8x128xbf16> to vector<8x128xbf16>
    %28 = arith.maximumf %25, %27 : vector<8x128xbf16>
    %c10 = arith.constant 10 : index
    %c0_20 = arith.constant 0 : index
    %c0_21 = arith.constant 0 : index
    %29 = vector.load %arg1[%c10, %c0_20, %c0_21] : memref<27x8x128xbf16, #tpu.memory_space<vmem>>, vector<1x8x128xbf16>
    %30 = vector.shape_cast %29 : vector<1x8x128xbf16> to vector<8x128xbf16>
    %31 = arith.maximumf %28, %30 : vector<8x128xbf16>
    %c11 = arith.constant 11 : index
    %c0_22 = arith.constant 0 : index
    %c0_23 = arith.constant 0 : index
    %32 = vector.load %arg1[%c11, %c0_22, %c0_23] : memref<27x8x128xbf16, #tpu.memory_space<vmem>>, vector<1x8x128xbf16>
    %33 = vector.shape_cast %32 : vector<1x8x128xbf16> to vector<8x128xbf16>
    %34 = arith.maximumf %31, %33 : vector<8x128xbf16>
    %c12 = arith.constant 12 : index
    %c0_24 = arith.constant 0 : index
    %c0_25 = arith.constant 0 : index
    %35 = vector.load %arg1[%c12, %c0_24, %c0_25] : memref<27x8x128xbf16, #tpu.memory_space<vmem>>, vector<1x8x128xbf16>
    %36 = vector.shape_cast %35 : vector<1x8x128xbf16> to vector<8x128xbf16>
    %37 = arith.maximumf %34, %36 : vector<8x128xbf16>
    %c13 = arith.constant 13 : index
    %c0_26 = arith.constant 0 : index
    %c0_27 = arith.constant 0 : index
    %38 = vector.load %arg1[%c13, %c0_26, %c0_27] : memref<27x8x128xbf16, #tpu.memory_space<vmem>>, vector<1x8x128xbf16>
    %39 = vector.shape_cast %38 : vector<1x8x128xbf16> to vector<8x128xbf16>
    %40 = arith.maximumf %37, %39 : vector<8x128xbf16>
    %c14 = arith.constant 14 : index
    %c0_28 = arith.constant 0 : index
    %c0_29 = arith.constant 0 : index
    %41 = vector.load %arg1[%c14, %c0_28, %c0_29] : memref<27x8x128xbf16, #tpu.memory_space<vmem>>, vector<1x8x128xbf16>
    %42 = vector.shape_cast %41 : vector<1x8x128xbf16> to vector<8x128xbf16>
    %43 = arith.maximumf %40, %42 : vector<8x128xbf16>
    %c15 = arith.constant 15 : index
    %c0_30 = arith.constant 0 : index
    %c0_31 = arith.constant 0 : index
    %44 = vector.load %arg1[%c15, %c0_30, %c0_31] : memref<27x8x128xbf16, #tpu.memory_space<vmem>>, vector<1x8x128xbf16>
    %45 = vector.shape_cast %44 : vector<1x8x128xbf16> to vector<8x128xbf16>
    %46 = arith.maximumf %43, %45 : vector<8x128xbf16>
    %c16 = arith.constant 16 : index
    %c0_32 = arith.constant 0 : index
    %c0_33 = arith.constant 0 : index
    %47 = vector.load %arg1[%c16, %c0_32, %c0_33] : memref<27x8x128xbf16, #tpu.memory_space<vmem>>, vector<1x8x128xbf16>
    %48 = vector.shape_cast %47 : vector<1x8x128xbf16> to vector<8x128xbf16>
    %49 = arith.maximumf %46, %48 : vector<8x128xbf16>
    %c17 = arith.constant 17 : index
    %c0_34 = arith.constant 0 : index
    %c0_35 = arith.constant 0 : index
    %50 = vector.load %arg1[%c17, %c0_34, %c0_35] : memref<27x8x128xbf16, #tpu.memory_space<vmem>>, vector<1x8x128xbf16>
    %51 = vector.shape_cast %50 : vector<1x8x128xbf16> to vector<8x128xbf16>
    %52 = arith.maximumf %49, %51 : vector<8x128xbf16>
    %c18 = arith.constant 18 : index
    %c0_36 = arith.constant 0 : index
    %c0_37 = arith.constant 0 : index
    %53 = vector.load %arg1[%c18, %c0_36, %c0_37] : memref<27x8x128xbf16, #tpu.memory_space<vmem>>, vector<1x8x128xbf16>
    %54 = vector.shape_cast %53 : vector<1x8x128xbf16> to vector<8x128xbf16>
    %55 = arith.maximumf %52, %54 : vector<8x128xbf16>
    %c19 = arith.constant 19 : index
    %c0_38 = arith.constant 0 : index
    %c0_39 = arith.constant 0 : index
    %56 = vector.load %arg1[%c19, %c0_38, %c0_39] : memref<27x8x128xbf16, #tpu.memory_space<vmem>>, vector<1x8x128xbf16>
    %57 = vector.shape_cast %56 : vector<1x8x128xbf16> to vector<8x128xbf16>
    %58 = arith.maximumf %55, %57 : vector<8x128xbf16>
    %c20 = arith.constant 20 : index
    %c0_40 = arith.constant 0 : index
    %c0_41 = arith.constant 0 : index
    %59 = vector.load %arg1[%c20, %c0_40, %c0_41] : memref<27x8x128xbf16, #tpu.memory_space<vmem>>, vector<1x8x128xbf16>
    %60 = vector.shape_cast %59 : vector<1x8x128xbf16> to vector<8x128xbf16>
    %61 = arith.maximumf %58, %60 : vector<8x128xbf16>
    %c21 = arith.constant 21 : index
    %c0_42 = arith.constant 0 : index
    %c0_43 = arith.constant 0 : index
    %62 = vector.load %arg1[%c21, %c0_42, %c0_43] : memref<27x8x128xbf16, #tpu.memory_space<vmem>>, vector<1x8x128xbf16>
    %63 = vector.shape_cast %62 : vector<1x8x128xbf16> to vector<8x128xbf16>
    %64 = arith.maximumf %61, %63 : vector<8x128xbf16>
    %c22 = arith.constant 22 : index
    %c0_44 = arith.constant 0 : index
    %c0_45 = arith.constant 0 : index
    %65 = vector.load %arg1[%c22, %c0_44, %c0_45] : memref<27x8x128xbf16, #tpu.memory_space<vmem>>, vector<1x8x128xbf16>
    %66 = vector.shape_cast %65 : vector<1x8x128xbf16> to vector<8x128xbf16>
    %67 = arith.maximumf %64, %66 : vector<8x128xbf16>
    %c23 = arith.constant 23 : index
    %c0_46 = arith.constant 0 : index
    %c0_47 = arith.constant 0 : index
    %68 = vector.load %arg1[%c23, %c0_46, %c0_47] : memref<27x8x128xbf16, #tpu.memory_space<vmem>>, vector<1x8x128xbf16>
    %69 = vector.shape_cast %68 : vector<1x8x128xbf16> to vector<8x128xbf16>
    %70 = arith.maximumf %67, %69 : vector<8x128xbf16>
    %c24 = arith.constant 24 : index
    %c0_48 = arith.constant 0 : index
    %c0_49 = arith.constant 0 : index
    %71 = vector.load %arg1[%c24, %c0_48, %c0_49] : memref<27x8x128xbf16, #tpu.memory_space<vmem>>, vector<1x8x128xbf16>
    %72 = vector.shape_cast %71 : vector<1x8x128xbf16> to vector<8x128xbf16>
    %73 = arith.maximumf %70, %72 : vector<8x128xbf16>
    %c25 = arith.constant 25 : index
    %c0_50 = arith.constant 0 : index
    %c0_51 = arith.constant 0 : index
    %74 = vector.load %arg1[%c25, %c0_50, %c0_51] : memref<27x8x128xbf16, #tpu.memory_space<vmem>>, vector<1x8x128xbf16>
    %75 = vector.shape_cast %74 : vector<1x8x128xbf16> to vector<8x128xbf16>
    %76 = arith.maximumf %73, %75 : vector<8x128xbf16>
    %c26 = arith.constant 26 : index
    %c0_52 = arith.constant 0 : index
    %c0_53 = arith.constant 0 : index
    %77 = vector.load %arg1[%c26, %c0_52, %c0_53] : memref<27x8x128xbf16, #tpu.memory_space<vmem>>, vector<1x8x128xbf16>
    %78 = vector.shape_cast %77 : vector<1x8x128xbf16> to vector<8x128xbf16>
    %79 = arith.maximumf %76, %78 : vector<8x128xbf16>
    %c0_54 = arith.constant 0 : index
    %c0_55 = arith.constant 0 : index
    %80 = vector.load %arg2[%c0_54, %c0_55] : memref<8x128xbf16, #tpu.memory_space<vmem>>, vector<8x128xbf16>
    tpu.vector_store %arg2[%c0_54, %c0_55], %79 {strides = array<i32>} : memref<8x128xbf16, #tpu.memory_space<vmem>>, vector<8x128xbf16>,
    return
  }
  func.func @transform_0(%arg0: i32) -> (i32, i32, i32) {
    %c0_i32 = arith.constant 0 : i32
    %c0_i32_0 = arith.constant 0 : i32
    %c0_i32_1 = arith.constant 0 : i32
    return %c0_i32, %arg0, %c0_i32_0 : i32, i32, i32
  }
  func.func @transform_1(%arg0: i32) -> (i32, i32) {
    %c0_i32 = arith.constant 0 : i32
    %c0_i32_0 = arith.constant 0 : i32
    return %arg0, %c0_i32 : i32, i32
  }
}

module attributes {stable_mosaic.version = 11 : i64} {
  func.func @_mm_epilogue_kernel(%arg0: i32, %arg1: memref<128x216xbf16, #tpu.memory_space<vmem>>, %arg2: memref<216x8xbf16, #tpu.memory_space<vmem>>, %arg3: memref<1x8xf32, #tpu.memory_space<vmem>>, %arg4: memref<1x8xf32, #tpu.memory_space<vmem>>, %arg5: memref<128x8xbf16, #tpu.memory_space<vmem>>) attributes {dimension_semantics = [#tpu.dimension_semantics<parallel>], iteration_bounds = array<i64: 1>, scalar_prefetch = 0 : i64, scratch_operands = 0 : i64, tpu.core_type = #tpu.core_type<tc>, window_params = [{transform_indices = @transform_0, window_bounds = array<i64: 128, 216>}, {pipeline_mode = #tpu.pipeline_mode<synchronous>, transform_indices = @transform_1, window_bounds = array<i64: 216, 8>}, {pipeline_mode = #tpu.pipeline_mode<synchronous>, transform_indices = @transform_2, window_bounds = array<i64: 1, 8>}, {pipeline_mode = #tpu.pipeline_mode<synchronous>, transform_indices = @transform_3, window_bounds = array<i64: 1, 8>}, {transform_indices = @transform_4, window_bounds = array<i64: 128, 8>}]} {
    %c0 = arith.constant 0 : index
    %c0_0 = arith.constant 0 : index
    %0 = vector.load %arg1[%c0, %c0_0] : memref<128x216xbf16, #tpu.memory_space<vmem>>, vector<128x216xbf16>
    %c0_1 = arith.constant 0 : index
    %c0_2 = arith.constant 0 : index
    %1 = vector.load %arg2[%c0_1, %c0_2] : memref<216x8xbf16, #tpu.memory_space<vmem>>, vector<216x8xbf16>
    %cst = arith.constant dense<0.000000e+00> : vector<128x8xf32>
    %2 = tpu.matmul %0, %1, %cst {dimension_numbers = #tpu.dot_dimension_numbers<[1], [0], [0], [1], [0, 0, 1, 1], [], []>} : vector<128x216xbf16>, vector<216x8xbf16>, vector<128x8xf32> -> vector<128x8xf32>
    %c0_3 = arith.constant 0 : index
    %c0_4 = arith.constant 0 : index
    %3 = vector.load %arg3[%c0_3, %c0_4] : memref<1x8xf32, #tpu.memory_space<vmem>>, vector<1x8xf32>
    %4 = vector.broadcast %3 : vector<1x8xf32> to vector<128x8xf32>
    %5 = arith.mulf %2, %4 : vector<128x8xf32>
    %c0_5 = arith.constant 0 : index
    %c0_6 = arith.constant 0 : index
    %6 = vector.load %arg4[%c0_5, %c0_6] : memref<1x8xf32, #tpu.memory_space<vmem>>, vector<1x8xf32>
    %7 = vector.broadcast %6 : vector<1x8xf32> to vector<128x8xf32>
    %8 = arith.addf %5, %7 : vector<128x8xf32>
    %cst_7 = arith.constant 0.000000e+00 : f32
    %9 = vector.broadcast %cst_7 : f32 to vector<128x8xf32>
    %10 = arith.maximumf %8, %9 : vector<128x8xf32>
    %11 = arith.truncf %10 : vector<128x8xf32> to vector<128x8xbf16>
    %c0_8 = arith.constant 0 : index
    %c0_9 = arith.constant 0 : index
    %12 = vector.load %arg5[%c0_8, %c0_9] : memref<128x8xbf16, #tpu.memory_space<vmem>>, vector<128x8xbf16>
    tpu.vector_store %arg5[%c0_8, %c0_9], %11 {strides = array<i32>} : memref<128x8xbf16, #tpu.memory_space<vmem>>, vector<128x8xbf16>,
    return
  }
  func.func @transform_0(%arg0: i32) -> (i32, i32) {
    %c0_i32 = arith.constant 0 : i32
    %c0_i32_0 = arith.constant 0 : i32
    return %arg0, %c0_i32 : i32, i32
  }
  func.func @transform_1(%arg0: i32) -> (i32, i32) {
    %c0_i32 = arith.constant 0 : i32
    %c0_i32_0 = arith.constant 0 : i32
    %c0_i32_1 = arith.constant 0 : i32
    return %c0_i32, %c0_i32_0 : i32, i32
  }
  func.func @transform_2(%arg0: i32) -> (i32, i32) {
    %c0_i32 = arith.constant 0 : i32
    %c0_i32_0 = arith.constant 0 : i32
    %c0_i32_1 = arith.constant 0 : i32
    return %c0_i32, %c0_i32_0 : i32, i32
  }
  func.func @transform_3(%arg0: i32) -> (i32, i32) {
    %c0_i32 = arith.constant 0 : i32
    %c0_i32_0 = arith.constant 0 : i32
    %c0_i32_1 = arith.constant 0 : i32
    return %c0_i32, %c0_i32_0 : i32, i32
  }
  func.func @transform_4(%arg0: i32) -> (i32, i32) {
    %c0_i32 = arith.constant 0 : i32
    %c0_i32_0 = arith.constant 0 : i32
    return %arg0, %c0_i32 : i32, i32
  }
}

module attributes {stable_mosaic.version = 11 : i64} {
  func.func @_mm_epilogue_res_kernel(%arg0: i32, %arg1: memref<128x216xbf16, #tpu.memory_space<vmem>>, %arg2: memref<216x8xbf16, #tpu.memory_space<vmem>>, %arg3: memref<1x8xf32, #tpu.memory_space<vmem>>, %arg4: memref<1x8xf32, #tpu.memory_space<vmem>>, %arg5: memref<128x8xbf16, #tpu.memory_space<vmem>>, %arg6: memref<128x8xbf16, #tpu.memory_space<vmem>>) attributes {dimension_semantics = [#tpu.dimension_semantics<parallel>], iteration_bounds = array<i64: 1>, scalar_prefetch = 0 : i64, scratch_operands = 0 : i64, tpu.core_type = #tpu.core_type<tc>, window_params = [{transform_indices = @transform_0, window_bounds = array<i64: 128, 216>}, {pipeline_mode = #tpu.pipeline_mode<synchronous>, transform_indices = @transform_1, window_bounds = array<i64: 216, 8>}, {pipeline_mode = #tpu.pipeline_mode<synchronous>, transform_indices = @transform_2, window_bounds = array<i64: 1, 8>}, {pipeline_mode = #tpu.pipeline_mode<synchronous>, transform_indices = @transform_3, window_bounds = array<i64: 1, 8>}, {transform_indices = @transform_4, window_bounds = array<i64: 128, 8>}, {transform_indices = @transform_5, window_bounds = array<i64: 128, 8>}]} {
    %c0 = arith.constant 0 : index
    %c0_0 = arith.constant 0 : index
    %0 = vector.load %arg1[%c0, %c0_0] : memref<128x216xbf16, #tpu.memory_space<vmem>>, vector<128x216xbf16>
    %c0_1 = arith.constant 0 : index
    %c0_2 = arith.constant 0 : index
    %1 = vector.load %arg2[%c0_1, %c0_2] : memref<216x8xbf16, #tpu.memory_space<vmem>>, vector<216x8xbf16>
    %cst = arith.constant dense<0.000000e+00> : vector<128x8xf32>
    %2 = tpu.matmul %0, %1, %cst {dimension_numbers = #tpu.dot_dimension_numbers<[1], [0], [0], [1], [0, 0, 1, 1], [], []>} : vector<128x216xbf16>, vector<216x8xbf16>, vector<128x8xf32> -> vector<128x8xf32>
    %c0_3 = arith.constant 0 : index
    %c0_4 = arith.constant 0 : index
    %3 = vector.load %arg3[%c0_3, %c0_4] : memref<1x8xf32, #tpu.memory_space<vmem>>, vector<1x8xf32>
    %4 = vector.broadcast %3 : vector<1x8xf32> to vector<128x8xf32>
    %5 = arith.mulf %2, %4 : vector<128x8xf32>
    %c0_5 = arith.constant 0 : index
    %c0_6 = arith.constant 0 : index
    %6 = vector.load %arg4[%c0_5, %c0_6] : memref<1x8xf32, #tpu.memory_space<vmem>>, vector<1x8xf32>
    %7 = vector.broadcast %6 : vector<1x8xf32> to vector<128x8xf32>
    %8 = arith.addf %5, %7 : vector<128x8xf32>
    %c0_7 = arith.constant 0 : index
    %c0_8 = arith.constant 0 : index
    %9 = vector.load %arg5[%c0_7, %c0_8] : memref<128x8xbf16, #tpu.memory_space<vmem>>, vector<128x8xbf16>
    %10 = arith.extf %9 : vector<128x8xbf16> to vector<128x8xf32>
    %11 = arith.addf %8, %10 : vector<128x8xf32>
    %cst_9 = arith.constant 0.000000e+00 : f32
    %12 = vector.broadcast %cst_9 : f32 to vector<128x8xf32>
    %13 = arith.maximumf %11, %12 : vector<128x8xf32>
    %14 = arith.truncf %13 : vector<128x8xf32> to vector<128x8xbf16>
    %c0_10 = arith.constant 0 : index
    %c0_11 = arith.constant 0 : index
    %15 = vector.load %arg6[%c0_10, %c0_11] : memref<128x8xbf16, #tpu.memory_space<vmem>>, vector<128x8xbf16>
    tpu.vector_store %arg6[%c0_10, %c0_11], %14 {strides = array<i32>} : memref<128x8xbf16, #tpu.memory_space<vmem>>, vector<128x8xbf16>,
    return
  }
  func.func @transform_0(%arg0: i32) -> (i32, i32) {
    %c0_i32 = arith.constant 0 : i32
    %c0_i32_0 = arith.constant 0 : i32
    return %arg0, %c0_i32 : i32, i32
  }
  func.func @transform_1(%arg0: i32) -> (i32, i32) {
    %c0_i32 = arith.constant 0 : i32
    %c0_i32_0 = arith.constant 0 : i32
    %c0_i32_1 = arith.constant 0 : i32
    return %c0_i32, %c0_i32_0 : i32, i32
  }
  func.func @transform_2(%arg0: i32) -> (i32, i32) {
    %c0_i32 = arith.constant 0 : i32
    %c0_i32_0 = arith.constant 0 : i32
    %c0_i32_1 = arith.constant 0 : i32
    return %c0_i32, %c0_i32_0 : i32, i32
  }
  func.func @transform_3(%arg0: i32) -> (i32, i32) {
    %c0_i32 = arith.constant 0 : i32
    %c0_i32_0 = arith.constant 0 : i32
    %c0_i32_1 = arith.constant 0 : i32
    return %c0_i32, %c0_i32_0 : i32, i32
  }
  func.func @transform_4(%arg0: i32) -> (i32, i32) {
    %c0_i32 = arith.constant 0 : i32
    %c0_i32_0 = arith.constant 0 : i32
    return %arg0, %c0_i32 : i32, i32
  }
  func.func @transform_5(%arg0: i32) -> (i32, i32) {
    %c0_i32 = arith.constant 0 : i32
    %c0_i32_0 = arith.constant 0 : i32
    return %arg0, %c0_i32 : i32, i32
  }
}

module attributes {stable_mosaic.version = 11 : i64} {
  func.func @_mm_epilogue_kernel(%arg0: i32, %arg1: memref<16x216xbf16, #tpu.memory_space<vmem>>, %arg2: memref<216x16xbf16, #tpu.memory_space<vmem>>, %arg3: memref<1x16xf32, #tpu.memory_space<vmem>>, %arg4: memref<1x16xf32, #tpu.memory_space<vmem>>, %arg5: memref<16x16xbf16, #tpu.memory_space<vmem>>) attributes {dimension_semantics = [#tpu.dimension_semantics<parallel>], iteration_bounds = array<i64: 1>, scalar_prefetch = 0 : i64, scratch_operands = 0 : i64, tpu.core_type = #tpu.core_type<tc>, window_params = [{transform_indices = @transform_0, window_bounds = array<i64: 16, 216>}, {pipeline_mode = #tpu.pipeline_mode<synchronous>, transform_indices = @transform_1, window_bounds = array<i64: 216, 16>}, {pipeline_mode = #tpu.pipeline_mode<synchronous>, transform_indices = @transform_2, window_bounds = array<i64: 1, 16>}, {pipeline_mode = #tpu.pipeline_mode<synchronous>, transform_indices = @transform_3, window_bounds = array<i64: 1, 16>}, {transform_indices = @transform_4, window_bounds = array<i64: 16, 16>}]} {
    %c0 = arith.constant 0 : index
    %c0_0 = arith.constant 0 : index
    %0 = vector.load %arg1[%c0, %c0_0] : memref<16x216xbf16, #tpu.memory_space<vmem>>, vector<16x216xbf16>
    %c0_1 = arith.constant 0 : index
    %c0_2 = arith.constant 0 : index
    %1 = vector.load %arg2[%c0_1, %c0_2] : memref<216x16xbf16, #tpu.memory_space<vmem>>, vector<216x16xbf16>
    %cst = arith.constant dense<0.000000e+00> : vector<16x16xf32>
    %2 = tpu.matmul %0, %1, %cst {dimension_numbers = #tpu.dot_dimension_numbers<[1], [0], [0], [1], [0, 0, 1, 1], [], []>} : vector<16x216xbf16>, vector<216x16xbf16>, vector<16x16xf32> -> vector<16x16xf32>
    %c0_3 = arith.constant 0 : index
    %c0_4 = arith.constant 0 : index
    %3 = vector.load %arg3[%c0_3, %c0_4] : memref<1x16xf32, #tpu.memory_space<vmem>>, vector<1x16xf32>
    %4 = vector.broadcast %3 : vector<1x16xf32> to vector<16x16xf32>
    %5 = arith.mulf %2, %4 : vector<16x16xf32>
    %c0_5 = arith.constant 0 : index
    %c0_6 = arith.constant 0 : index
    %6 = vector.load %arg4[%c0_5, %c0_6] : memref<1x16xf32, #tpu.memory_space<vmem>>, vector<1x16xf32>
    %7 = vector.broadcast %6 : vector<1x16xf32> to vector<16x16xf32>
    %8 = arith.addf %5, %7 : vector<16x16xf32>
    %cst_7 = arith.constant 0.000000e+00 : f32
    %9 = vector.broadcast %cst_7 : f32 to vector<16x16xf32>
    %10 = arith.maximumf %8, %9 : vector<16x16xf32>
    %11 = arith.truncf %10 : vector<16x16xf32> to vector<16x16xbf16>
    %c0_8 = arith.constant 0 : index
    %c0_9 = arith.constant 0 : index
    %12 = vector.load %arg5[%c0_8, %c0_9] : memref<16x16xbf16, #tpu.memory_space<vmem>>, vector<16x16xbf16>
    tpu.vector_store %arg5[%c0_8, %c0_9], %11 {strides = array<i32>} : memref<16x16xbf16, #tpu.memory_space<vmem>>, vector<16x16xbf16>,
    return
  }
  func.func @transform_0(%arg0: i32) -> (i32, i32) {
    %c0_i32 = arith.constant 0 : i32
    %c0_i32_0 = arith.constant 0 : i32
    return %arg0, %c0_i32 : i32, i32
  }
  func.func @transform_1(%arg0: i32) -> (i32, i32) {
    %c0_i32 = arith.constant 0 : i32
    %c0_i32_0 = arith.constant 0 : i32
    %c0_i32_1 = arith.constant 0 : i32
    return %c0_i32, %c0_i32_0 : i32, i32
  }
  func.func @transform_2(%arg0: i32) -> (i32, i32) {
    %c0_i32 = arith.constant 0 : i32
    %c0_i32_0 = arith.constant 0 : i32
    %c0_i32_1 = arith.constant 0 : i32
    return %c0_i32, %c0_i32_0 : i32, i32
  }
  func.func @transform_3(%arg0: i32) -> (i32, i32) {
    %c0_i32 = arith.constant 0 : i32
    %c0_i32_0 = arith.constant 0 : i32
    %c0_i32_1 = arith.constant 0 : i32
    return %c0_i32, %c0_i32_0 : i32, i32
  }
  func.func @transform_4(%arg0: i32) -> (i32, i32) {
    %c0_i32 = arith.constant 0 : i32
    %c0_i32_0 = arith.constant 0 : i32
    return %arg0, %c0_i32 : i32, i32
  }
}

module attributes {stable_mosaic.version = 11 : i64} {
  func.func @_mm_epilogue_kernel(%arg0: i32, %arg1: memref<16x8xbf16, #tpu.memory_space<vmem>>, %arg2: memref<8x16xbf16, #tpu.memory_space<vmem>>, %arg3: memref<1x16xf32, #tpu.memory_space<vmem>>, %arg4: memref<1x16xf32, #tpu.memory_space<vmem>>, %arg5: memref<16x16xbf16, #tpu.memory_space<vmem>>) attributes {dimension_semantics = [#tpu.dimension_semantics<parallel>], iteration_bounds = array<i64: 1>, scalar_prefetch = 0 : i64, scratch_operands = 0 : i64, tpu.core_type = #tpu.core_type<tc>, window_params = [{transform_indices = @transform_0, window_bounds = array<i64: 16, 8>}, {pipeline_mode = #tpu.pipeline_mode<synchronous>, transform_indices = @transform_1, window_bounds = array<i64: 8, 16>}, {pipeline_mode = #tpu.pipeline_mode<synchronous>, transform_indices = @transform_2, window_bounds = array<i64: 1, 16>}, {pipeline_mode = #tpu.pipeline_mode<synchronous>, transform_indices = @transform_3, window_bounds = array<i64: 1, 16>}, {transform_indices = @transform_4, window_bounds = array<i64: 16, 16>}]} {
    %c0 = arith.constant 0 : index
    %c0_0 = arith.constant 0 : index
    %0 = vector.load %arg1[%c0, %c0_0] : memref<16x8xbf16, #tpu.memory_space<vmem>>, vector<16x8xbf16>
    %c0_1 = arith.constant 0 : index
    %c0_2 = arith.constant 0 : index
    %1 = vector.load %arg2[%c0_1, %c0_2] : memref<8x16xbf16, #tpu.memory_space<vmem>>, vector<8x16xbf16>
    %cst = arith.constant dense<0.000000e+00> : vector<16x16xf32>
    %2 = tpu.matmul %0, %1, %cst {dimension_numbers = #tpu.dot_dimension_numbers<[1], [0], [0], [1], [0, 0, 1, 1], [], []>} : vector<16x8xbf16>, vector<8x16xbf16>, vector<16x16xf32> -> vector<16x16xf32>
    %c0_3 = arith.constant 0 : index
    %c0_4 = arith.constant 0 : index
    %3 = vector.load %arg3[%c0_3, %c0_4] : memref<1x16xf32, #tpu.memory_space<vmem>>, vector<1x16xf32>
    %4 = vector.broadcast %3 : vector<1x16xf32> to vector<16x16xf32>
    %5 = arith.mulf %2, %4 : vector<16x16xf32>
    %c0_5 = arith.constant 0 : index
    %c0_6 = arith.constant 0 : index
    %6 = vector.load %arg4[%c0_5, %c0_6] : memref<1x16xf32, #tpu.memory_space<vmem>>, vector<1x16xf32>
    %7 = vector.broadcast %6 : vector<1x16xf32> to vector<16x16xf32>
    %8 = arith.addf %5, %7 : vector<16x16xf32>
    %9 = arith.truncf %8 : vector<16x16xf32> to vector<16x16xbf16>
    %c0_7 = arith.constant 0 : index
    %c0_8 = arith.constant 0 : index
    %10 = vector.load %arg5[%c0_7, %c0_8] : memref<16x16xbf16, #tpu.memory_space<vmem>>, vector<16x16xbf16>
    tpu.vector_store %arg5[%c0_7, %c0_8], %9 {strides = array<i32>} : memref<16x16xbf16, #tpu.memory_space<vmem>>, vector<16x16xbf16>,
    return
  }
  func.func @transform_0(%arg0: i32) -> (i32, i32) {
    %c0_i32 = arith.constant 0 : i32
    %c0_i32_0 = arith.constant 0 : i32
    return %arg0, %c0_i32 : i32, i32
  }
  func.func @transform_1(%arg0: i32) -> (i32, i32) {
    %c0_i32 = arith.constant 0 : i32
    %c0_i32_0 = arith.constant 0 : i32
    %c0_i32_1 = arith.constant 0 : i32
    return %c0_i32, %c0_i32_0 : i32, i32
  }
  func.func @transform_2(%arg0: i32) -> (i32, i32) {
    %c0_i32 = arith.constant 0 : i32
    %c0_i32_0 = arith.constant 0 : i32
    %c0_i32_1 = arith.constant 0 : i32
    return %c0_i32, %c0_i32_0 : i32, i32
  }
  func.func @transform_3(%arg0: i32) -> (i32, i32) {
    %c0_i32 = arith.constant 0 : i32
    %c0_i32_0 = arith.constant 0 : i32
    %c0_i32_1 = arith.constant 0 : i32
    return %c0_i32, %c0_i32_0 : i32, i32
  }
  func.func @transform_4(%arg0: i32) -> (i32, i32) {
    %c0_i32 = arith.constant 0 : i32
    %c0_i32_0 = arith.constant 0 : i32
    return %arg0, %c0_i32 : i32, i32
  }
}

module attributes {stable_mosaic.version = 11 : i64} {
  func.func @_mm_epilogue_res_kernel(%arg0: i32, %arg1: memref<16x432xbf16, #tpu.memory_space<vmem>>, %arg2: memref<432x16xbf16, #tpu.memory_space<vmem>>, %arg3: memref<1x16xf32, #tpu.memory_space<vmem>>, %arg4: memref<1x16xf32, #tpu.memory_space<vmem>>, %arg5: memref<16x16xbf16, #tpu.memory_space<vmem>>, %arg6: memref<16x16xbf16, #tpu.memory_space<vmem>>) attributes {dimension_semantics = [#tpu.dimension_semantics<parallel>], iteration_bounds = array<i64: 1>, scalar_prefetch = 0 : i64, scratch_operands = 0 : i64, tpu.core_type = #tpu.core_type<tc>, window_params = [{transform_indices = @transform_0, window_bounds = array<i64: 16, 432>}, {pipeline_mode = #tpu.pipeline_mode<synchronous>, transform_indices = @transform_1, window_bounds = array<i64: 432, 16>}, {pipeline_mode = #tpu.pipeline_mode<synchronous>, transform_indices = @transform_2, window_bounds = array<i64: 1, 16>}, {pipeline_mode = #tpu.pipeline_mode<synchronous>, transform_indices = @transform_3, window_bounds = array<i64: 1, 16>}, {transform_indices = @transform_4, window_bounds = array<i64: 16, 16>}, {transform_indices = @transform_5, window_bounds = array<i64: 16, 16>}]} {
    %c0 = arith.constant 0 : index
    %c0_0 = arith.constant 0 : index
    %0 = vector.load %arg1[%c0, %c0_0] : memref<16x432xbf16, #tpu.memory_space<vmem>>, vector<16x432xbf16>
    %c0_1 = arith.constant 0 : index
    %c0_2 = arith.constant 0 : index
    %1 = vector.load %arg2[%c0_1, %c0_2] : memref<432x16xbf16, #tpu.memory_space<vmem>>, vector<432x16xbf16>
    %cst = arith.constant dense<0.000000e+00> : vector<16x16xf32>
    %2 = tpu.matmul %0, %1, %cst {dimension_numbers = #tpu.dot_dimension_numbers<[1], [0], [0], [1], [0, 0, 1, 1], [], []>} : vector<16x432xbf16>, vector<432x16xbf16>, vector<16x16xf32> -> vector<16x16xf32>
    %c0_3 = arith.constant 0 : index
    %c0_4 = arith.constant 0 : index
    %3 = vector.load %arg3[%c0_3, %c0_4] : memref<1x16xf32, #tpu.memory_space<vmem>>, vector<1x16xf32>
    %4 = vector.broadcast %3 : vector<1x16xf32> to vector<16x16xf32>
    %5 = arith.mulf %2, %4 : vector<16x16xf32>
    %c0_5 = arith.constant 0 : index
    %c0_6 = arith.constant 0 : index
    %6 = vector.load %arg4[%c0_5, %c0_6] : memref<1x16xf32, #tpu.memory_space<vmem>>, vector<1x16xf32>
    %7 = vector.broadcast %6 : vector<1x16xf32> to vector<16x16xf32>
    %8 = arith.addf %5, %7 : vector<16x16xf32>
    %c0_7 = arith.constant 0 : index
    %c0_8 = arith.constant 0 : index
    %9 = vector.load %arg5[%c0_7, %c0_8] : memref<16x16xbf16, #tpu.memory_space<vmem>>, vector<16x16xbf16>
    %10 = arith.extf %9 : vector<16x16xbf16> to vector<16x16xf32>
    %11 = arith.addf %8, %10 : vector<16x16xf32>
    %cst_9 = arith.constant 0.000000e+00 : f32
    %12 = vector.broadcast %cst_9 : f32 to vector<16x16xf32>
    %13 = arith.maximumf %11, %12 : vector<16x16xf32>
    %14 = arith.truncf %13 : vector<16x16xf32> to vector<16x16xbf16>
    %c0_10 = arith.constant 0 : index
    %c0_11 = arith.constant 0 : index
    %15 = vector.load %arg6[%c0_10, %c0_11] : memref<16x16xbf16, #tpu.memory_space<vmem>>, vector<16x16xbf16>
    tpu.vector_store %arg6[%c0_10, %c0_11], %14 {strides = array<i32>} : memref<16x16xbf16, #tpu.memory_space<vmem>>, vector<16x16xbf16>,
    return
  }
  func.func @transform_0(%arg0: i32) -> (i32, i32) {
    %c0_i32 = arith.constant 0 : i32
    %c0_i32_0 = arith.constant 0 : i32
    return %arg0, %c0_i32 : i32, i32
  }
  func.func @transform_1(%arg0: i32) -> (i32, i32) {
    %c0_i32 = arith.constant 0 : i32
    %c0_i32_0 = arith.constant 0 : i32
    %c0_i32_1 = arith.constant 0 : i32
    return %c0_i32, %c0_i32_0 : i32, i32
  }
  func.func @transform_2(%arg0: i32) -> (i32, i32) {
    %c0_i32 = arith.constant 0 : i32
    %c0_i32_0 = arith.constant 0 : i32
    %c0_i32_1 = arith.constant 0 : i32
    return %c0_i32, %c0_i32_0 : i32, i32
  }
  func.func @transform_3(%arg0: i32) -> (i32, i32) {
    %c0_i32 = arith.constant 0 : i32
    %c0_i32_0 = arith.constant 0 : i32
    %c0_i32_1 = arith.constant 0 : i32
    return %c0_i32, %c0_i32_0 : i32, i32
  }
  func.func @transform_4(%arg0: i32) -> (i32, i32) {
    %c0_i32 = arith.constant 0 : i32
    %c0_i32_0 = arith.constant 0 : i32
    return %arg0, %c0_i32 : i32, i32
  }
  func.func @transform_5(%arg0: i32) -> (i32, i32) {
    %c0_i32 = arith.constant 0 : i32
    %c0_i32_0 = arith.constant 0 : i32
    return %arg0, %c0_i32 : i32, i32
  }
}

module attributes {stable_mosaic.version = 11 : i64} {
  func.func @_mm_epilogue_kernel(%arg0: i32, %arg1: memref<2x432xbf16, #tpu.memory_space<vmem>>, %arg2: memref<432x32xbf16, #tpu.memory_space<vmem>>, %arg3: memref<1x32xf32, #tpu.memory_space<vmem>>, %arg4: memref<1x32xf32, #tpu.memory_space<vmem>>, %arg5: memref<2x32xbf16, #tpu.memory_space<vmem>>) attributes {dimension_semantics = [#tpu.dimension_semantics<parallel>], iteration_bounds = array<i64: 1>, scalar_prefetch = 0 : i64, scratch_operands = 0 : i64, tpu.core_type = #tpu.core_type<tc>, window_params = [{transform_indices = @transform_0, window_bounds = array<i64: 2, 432>}, {pipeline_mode = #tpu.pipeline_mode<synchronous>, transform_indices = @transform_1, window_bounds = array<i64: 432, 32>}, {pipeline_mode = #tpu.pipeline_mode<synchronous>, transform_indices = @transform_2, window_bounds = array<i64: 1, 32>}, {pipeline_mode = #tpu.pipeline_mode<synchronous>, transform_indices = @transform_3, window_bounds = array<i64: 1, 32>}, {transform_indices = @transform_4, window_bounds = array<i64: 2, 32>}]} {
    %c0 = arith.constant 0 : index
    %c0_0 = arith.constant 0 : index
    %0 = vector.load %arg1[%c0, %c0_0] : memref<2x432xbf16, #tpu.memory_space<vmem>>, vector<2x432xbf16>
    %c0_1 = arith.constant 0 : index
    %c0_2 = arith.constant 0 : index
    %1 = vector.load %arg2[%c0_1, %c0_2] : memref<432x32xbf16, #tpu.memory_space<vmem>>, vector<432x32xbf16>
    %cst = arith.constant dense<0.000000e+00> : vector<2x32xf32>
    %2 = tpu.matmul %0, %1, %cst {dimension_numbers = #tpu.dot_dimension_numbers<[1], [0], [0], [1], [0, 0, 1, 1], [], []>} : vector<2x432xbf16>, vector<432x32xbf16>, vector<2x32xf32> -> vector<2x32xf32>
    %c0_3 = arith.constant 0 : index
    %c0_4 = arith.constant 0 : index
    %3 = vector.load %arg3[%c0_3, %c0_4] : memref<1x32xf32, #tpu.memory_space<vmem>>, vector<1x32xf32>
    %4 = vector.broadcast %3 : vector<1x32xf32> to vector<2x32xf32>
    %5 = arith.mulf %2, %4 : vector<2x32xf32>
    %c0_5 = arith.constant 0 : index
    %c0_6 = arith.constant 0 : index
    %6 = vector.load %arg4[%c0_5, %c0_6] : memref<1x32xf32, #tpu.memory_space<vmem>>, vector<1x32xf32>
    %7 = vector.broadcast %6 : vector<1x32xf32> to vector<2x32xf32>
    %8 = arith.addf %5, %7 : vector<2x32xf32>
    %cst_7 = arith.constant 0.000000e+00 : f32
    %9 = vector.broadcast %cst_7 : f32 to vector<2x32xf32>
    %10 = arith.maximumf %8, %9 : vector<2x32xf32>
    %11 = arith.truncf %10 : vector<2x32xf32> to vector<2x32xbf16>
    %c0_8 = arith.constant 0 : index
    %c0_9 = arith.constant 0 : index
    %12 = vector.load %arg5[%c0_8, %c0_9] : memref<2x32xbf16, #tpu.memory_space<vmem>>, vector<2x32xbf16>
    tpu.vector_store %arg5[%c0_8, %c0_9], %11 {strides = array<i32>} : memref<2x32xbf16, #tpu.memory_space<vmem>>, vector<2x32xbf16>,
    return
  }
  func.func @transform_0(%arg0: i32) -> (i32, i32) {
    %c0_i32 = arith.constant 0 : i32
    %c0_i32_0 = arith.constant 0 : i32
    return %arg0, %c0_i32 : i32, i32
  }
  func.func @transform_1(%arg0: i32) -> (i32, i32) {
    %c0_i32 = arith.constant 0 : i32
    %c0_i32_0 = arith.constant 0 : i32
    %c0_i32_1 = arith.constant 0 : i32
    return %c0_i32, %c0_i32_0 : i32, i32
  }
  func.func @transform_2(%arg0: i32) -> (i32, i32) {
    %c0_i32 = arith.constant 0 : i32
    %c0_i32_0 = arith.constant 0 : i32
    %c0_i32_1 = arith.constant 0 : i32
    return %c0_i32, %c0_i32_0 : i32, i32
  }
  func.func @transform_3(%arg0: i32) -> (i32, i32) {
    %c0_i32 = arith.constant 0 : i32
    %c0_i32_0 = arith.constant 0 : i32
    %c0_i32_1 = arith.constant 0 : i32
    return %c0_i32, %c0_i32_0 : i32, i32
  }
  func.func @transform_4(%arg0: i32) -> (i32, i32) {
    %c0_i32 = arith.constant 0 : i32
    %c0_i32_0 = arith.constant 0 : i32
    return %arg0, %c0_i32 : i32, i32
  }
}

module attributes {stable_mosaic.version = 11 : i64} {
  func.func @_mm_epilogue_kernel(%arg0: i32, %arg1: memref<2x16xbf16, #tpu.memory_space<vmem>>, %arg2: memref<16x32xbf16, #tpu.memory_space<vmem>>, %arg3: memref<1x32xf32, #tpu.memory_space<vmem>>, %arg4: memref<1x32xf32, #tpu.memory_space<vmem>>, %arg5: memref<2x32xbf16, #tpu.memory_space<vmem>>) attributes {dimension_semantics = [#tpu.dimension_semantics<parallel>], iteration_bounds = array<i64: 1>, scalar_prefetch = 0 : i64, scratch_operands = 0 : i64, tpu.core_type = #tpu.core_type<tc>, window_params = [{transform_indices = @transform_0, window_bounds = array<i64: 2, 16>}, {pipeline_mode = #tpu.pipeline_mode<synchronous>, transform_indices = @transform_1, window_bounds = array<i64: 16, 32>}, {pipeline_mode = #tpu.pipeline_mode<synchronous>, transform_indices = @transform_2, window_bounds = array<i64: 1, 32>}, {pipeline_mode = #tpu.pipeline_mode<synchronous>, transform_indices = @transform_3, window_bounds = array<i64: 1, 32>}, {transform_indices = @transform_4, window_bounds = array<i64: 2, 32>}]} {
    %c0 = arith.constant 0 : index
    %c0_0 = arith.constant 0 : index
    %0 = vector.load %arg1[%c0, %c0_0] : memref<2x16xbf16, #tpu.memory_space<vmem>>, vector<2x16xbf16>
    %c0_1 = arith.constant 0 : index
    %c0_2 = arith.constant 0 : index
    %1 = vector.load %arg2[%c0_1, %c0_2] : memref<16x32xbf16, #tpu.memory_space<vmem>>, vector<16x32xbf16>
    %cst = arith.constant dense<0.000000e+00> : vector<2x32xf32>
    %2 = tpu.matmul %0, %1, %cst {dimension_numbers = #tpu.dot_dimension_numbers<[1], [0], [0], [1], [0, 0, 1, 1], [], []>} : vector<2x16xbf16>, vector<16x32xbf16>, vector<2x32xf32> -> vector<2x32xf32>
    %c0_3 = arith.constant 0 : index
    %c0_4 = arith.constant 0 : index
    %3 = vector.load %arg3[%c0_3, %c0_4] : memref<1x32xf32, #tpu.memory_space<vmem>>, vector<1x32xf32>
    %4 = vector.broadcast %3 : vector<1x32xf32> to vector<2x32xf32>
    %5 = arith.mulf %2, %4 : vector<2x32xf32>
    %c0_5 = arith.constant 0 : index
    %c0_6 = arith.constant 0 : index
    %6 = vector.load %arg4[%c0_5, %c0_6] : memref<1x32xf32, #tpu.memory_space<vmem>>, vector<1x32xf32>
    %7 = vector.broadcast %6 : vector<1x32xf32> to vector<2x32xf32>
    %8 = arith.addf %5, %7 : vector<2x32xf32>
    %9 = arith.truncf %8 : vector<2x32xf32> to vector<2x32xbf16>
    %c0_7 = arith.constant 0 : index
    %c0_8 = arith.constant 0 : index
    %10 = vector.load %arg5[%c0_7, %c0_8] : memref<2x32xbf16, #tpu.memory_space<vmem>>, vector<2x32xbf16>
    tpu.vector_store %arg5[%c0_7, %c0_8], %9 {strides = array<i32>} : memref<2x32xbf16, #tpu.memory_space<vmem>>, vector<2x32xbf16>,
    return
  }
  func.func @transform_0(%arg0: i32) -> (i32, i32) {
    %c0_i32 = arith.constant 0 : i32
    %c0_i32_0 = arith.constant 0 : i32
    return %arg0, %c0_i32 : i32, i32
  }
  func.func @transform_1(%arg0: i32) -> (i32, i32) {
    %c0_i32 = arith.constant 0 : i32
    %c0_i32_0 = arith.constant 0 : i32
    %c0_i32_1 = arith.constant 0 : i32
    return %c0_i32, %c0_i32_0 : i32, i32
  }
  func.func @transform_2(%arg0: i32) -> (i32, i32) {
    %c0_i32 = arith.constant 0 : i32
    %c0_i32_0 = arith.constant 0 : i32
    %c0_i32_1 = arith.constant 0 : i32
    return %c0_i32, %c0_i32_0 : i32, i32
  }
  func.func @transform_3(%arg0: i32) -> (i32, i32) {
    %c0_i32 = arith.constant 0 : i32
    %c0_i32_0 = arith.constant 0 : i32
    %c0_i32_1 = arith.constant 0 : i32
    return %c0_i32, %c0_i32_0 : i32, i32
  }
  func.func @transform_4(%arg0: i32) -> (i32, i32) {
    %c0_i32 = arith.constant 0 : i32
    %c0_i32_0 = arith.constant 0 : i32
    return %arg0, %c0_i32 : i32, i32
  }
}

module attributes {stable_mosaic.version = 11 : i64} {
  func.func @_mm_epilogue_res_kernel(%arg0: i32, %arg1: memref<2x864xbf16, #tpu.memory_space<vmem>>, %arg2: memref<864x32xbf16, #tpu.memory_space<vmem>>, %arg3: memref<1x32xf32, #tpu.memory_space<vmem>>, %arg4: memref<1x32xf32, #tpu.memory_space<vmem>>, %arg5: memref<2x32xbf16, #tpu.memory_space<vmem>>, %arg6: memref<2x32xbf16, #tpu.memory_space<vmem>>) attributes {dimension_semantics = [#tpu.dimension_semantics<parallel>], iteration_bounds = array<i64: 1>, scalar_prefetch = 0 : i64, scratch_operands = 0 : i64, tpu.core_type = #tpu.core_type<tc>, window_params = [{transform_indices = @transform_0, window_bounds = array<i64: 2, 864>}, {pipeline_mode = #tpu.pipeline_mode<synchronous>, transform_indices = @transform_1, window_bounds = array<i64: 864, 32>}, {pipeline_mode = #tpu.pipeline_mode<synchronous>, transform_indices = @transform_2, window_bounds = array<i64: 1, 32>}, {pipeline_mode = #tpu.pipeline_mode<synchronous>, transform_indices = @transform_3, window_bounds = array<i64: 1, 32>}, {transform_indices = @transform_4, window_bounds = array<i64: 2, 32>}, {transform_indices = @transform_5, window_bounds = array<i64: 2, 32>}]} {
    %c0 = arith.constant 0 : index
    %c0_0 = arith.constant 0 : index
    %0 = vector.load %arg1[%c0, %c0_0] : memref<2x864xbf16, #tpu.memory_space<vmem>>, vector<2x864xbf16>
    %c0_1 = arith.constant 0 : index
    %c0_2 = arith.constant 0 : index
    %1 = vector.load %arg2[%c0_1, %c0_2] : memref<864x32xbf16, #tpu.memory_space<vmem>>, vector<864x32xbf16>
    %cst = arith.constant dense<0.000000e+00> : vector<2x32xf32>
    %2 = tpu.matmul %0, %1, %cst {dimension_numbers = #tpu.dot_dimension_numbers<[1], [0], [0], [1], [0, 0, 1, 1], [], []>} : vector<2x864xbf16>, vector<864x32xbf16>, vector<2x32xf32> -> vector<2x32xf32>
    %c0_3 = arith.constant 0 : index
    %c0_4 = arith.constant 0 : index
    %3 = vector.load %arg3[%c0_3, %c0_4] : memref<1x32xf32, #tpu.memory_space<vmem>>, vector<1x32xf32>
    %4 = vector.broadcast %3 : vector<1x32xf32> to vector<2x32xf32>
    %5 = arith.mulf %2, %4 : vector<2x32xf32>
    %c0_5 = arith.constant 0 : index
    %c0_6 = arith.constant 0 : index
    %6 = vector.load %arg4[%c0_5, %c0_6] : memref<1x32xf32, #tpu.memory_space<vmem>>, vector<1x32xf32>
    %7 = vector.broadcast %6 : vector<1x32xf32> to vector<2x32xf32>
    %8 = arith.addf %5, %7 : vector<2x32xf32>
    %c0_7 = arith.constant 0 : index
    %c0_8 = arith.constant 0 : index
    %9 = vector.load %arg5[%c0_7, %c0_8] : memref<2x32xbf16, #tpu.memory_space<vmem>>, vector<2x32xbf16>
    %10 = arith.extf %9 : vector<2x32xbf16> to vector<2x32xf32>
    %11 = arith.addf %8, %10 : vector<2x32xf32>
    %cst_9 = arith.constant 0.000000e+00 : f32
    %12 = vector.broadcast %cst_9 : f32 to vector<2x32xf32>
    %13 = arith.maximumf %11, %12 : vector<2x32xf32>
    %14 = arith.truncf %13 : vector<2x32xf32> to vector<2x32xbf16>
    %c0_10 = arith.constant 0 : index
    %c0_11 = arith.constant 0 : index
    %15 = vector.load %arg6[%c0_10, %c0_11] : memref<2x32xbf16, #tpu.memory_space<vmem>>, vector<2x32xbf16>
    tpu.vector_store %arg6[%c0_10, %c0_11], %14 {strides = array<i32>} : memref<2x32xbf16, #tpu.memory_space<vmem>>, vector<2x32xbf16>,
    return
  }
  func.func @transform_0(%arg0: i32) -> (i32, i32) {
    %c0_i32 = arith.constant 0 : i32
    %c0_i32_0 = arith.constant 0 : i32
    return %arg0, %c0_i32 : i32, i32
  }
  func.func @transform_1(%arg0: i32) -> (i32, i32) {
    %c0_i32 = arith.constant 0 : i32
    %c0_i32_0 = arith.constant 0 : i32
    %c0_i32_1 = arith.constant 0 : i32
    return %c0_i32, %c0_i32_0 : i32, i32
  }
  func.func @transform_2(%arg0: i32) -> (i32, i32) {
    %c0_i32 = arith.constant 0 : i32
    %c0_i32_0 = arith.constant 0 : i32
    %c0_i32_1 = arith.constant 0 : i32
    return %c0_i32, %c0_i32_0 : i32, i32
  }
  func.func @transform_3(%arg0: i32) -> (i32, i32) {
    %c0_i32 = arith.constant 0 : i32
    %c0_i32_0 = arith.constant 0 : i32
    %c0_i32_1 = arith.constant 0 : i32
    return %c0_i32, %c0_i32_0 : i32, i32
  }
  func.func @transform_4(%arg0: i32) -> (i32, i32) {
    %c0_i32 = arith.constant 0 : i32
    %c0_i32_0 = arith.constant 0 : i32
    return %arg0, %c0_i32 : i32, i32
  }
  func.func @transform_5(%arg0: i32) -> (i32, i32) {
    %c0_i32 = arith.constant 0 : i32
    %c0_i32_0 = arith.constant 0 : i32
    return %arg0, %c0_i32 : i32, i32
  }
}

module attributes {stable_mosaic.version = 11 : i64} {
  func.func @_mm_epilogue_kernel(%arg0: i32, %arg1: memref<2x864xbf16, #tpu.memory_space<vmem>>, %arg2: memref<864x64xbf16, #tpu.memory_space<vmem>>, %arg3: memref<1x64xf32, #tpu.memory_space<vmem>>, %arg4: memref<1x64xf32, #tpu.memory_space<vmem>>, %arg5: memref<2x64xbf16, #tpu.memory_space<vmem>>) attributes {dimension_semantics = [#tpu.dimension_semantics<parallel>], iteration_bounds = array<i64: 1>, scalar_prefetch = 0 : i64, scratch_operands = 0 : i64, tpu.core_type = #tpu.core_type<tc>, window_params = [{transform_indices = @transform_0, window_bounds = array<i64: 2, 864>}, {pipeline_mode = #tpu.pipeline_mode<synchronous>, transform_indices = @transform_1, window_bounds = array<i64: 864, 64>}, {pipeline_mode = #tpu.pipeline_mode<synchronous>, transform_indices = @transform_2, window_bounds = array<i64: 1, 64>}, {pipeline_mode = #tpu.pipeline_mode<synchronous>, transform_indices = @transform_3, window_bounds = array<i64: 1, 64>}, {transform_indices = @transform_4, window_bounds = array<i64: 2, 64>}]} {
    %c0 = arith.constant 0 : index
    %c0_0 = arith.constant 0 : index
    %0 = vector.load %arg1[%c0, %c0_0] : memref<2x864xbf16, #tpu.memory_space<vmem>>, vector<2x864xbf16>
    %c0_1 = arith.constant 0 : index
    %c0_2 = arith.constant 0 : index
    %1 = vector.load %arg2[%c0_1, %c0_2] : memref<864x64xbf16, #tpu.memory_space<vmem>>, vector<864x64xbf16>
    %cst = arith.constant dense<0.000000e+00> : vector<2x64xf32>
    %2 = tpu.matmul %0, %1, %cst {dimension_numbers = #tpu.dot_dimension_numbers<[1], [0], [0], [1], [0, 0, 1, 1], [], []>} : vector<2x864xbf16>, vector<864x64xbf16>, vector<2x64xf32> -> vector<2x64xf32>
    %c0_3 = arith.constant 0 : index
    %c0_4 = arith.constant 0 : index
    %3 = vector.load %arg3[%c0_3, %c0_4] : memref<1x64xf32, #tpu.memory_space<vmem>>, vector<1x64xf32>
    %4 = vector.broadcast %3 : vector<1x64xf32> to vector<2x64xf32>
    %5 = arith.mulf %2, %4 : vector<2x64xf32>
    %c0_5 = arith.constant 0 : index
    %c0_6 = arith.constant 0 : index
    %6 = vector.load %arg4[%c0_5, %c0_6] : memref<1x64xf32, #tpu.memory_space<vmem>>, vector<1x64xf32>
    %7 = vector.broadcast %6 : vector<1x64xf32> to vector<2x64xf32>
    %8 = arith.addf %5, %7 : vector<2x64xf32>
    %cst_7 = arith.constant 0.000000e+00 : f32
    %9 = vector.broadcast %cst_7 : f32 to vector<2x64xf32>
    %10 = arith.maximumf %8, %9 : vector<2x64xf32>
    %11 = arith.truncf %10 : vector<2x64xf32> to vector<2x64xbf16>
    %c0_8 = arith.constant 0 : index
    %c0_9 = arith.constant 0 : index
    %12 = vector.load %arg5[%c0_8, %c0_9] : memref<2x64xbf16, #tpu.memory_space<vmem>>, vector<2x64xbf16>
    tpu.vector_store %arg5[%c0_8, %c0_9], %11 {strides = array<i32>} : memref<2x64xbf16, #tpu.memory_space<vmem>>, vector<2x64xbf16>,
    return
  }
  func.func @transform_0(%arg0: i32) -> (i32, i32) {
    %c0_i32 = arith.constant 0 : i32
    %c0_i32_0 = arith.constant 0 : i32
    return %arg0, %c0_i32 : i32, i32
  }
  func.func @transform_1(%arg0: i32) -> (i32, i32) {
    %c0_i32 = arith.constant 0 : i32
    %c0_i32_0 = arith.constant 0 : i32
    %c0_i32_1 = arith.constant 0 : i32
    return %c0_i32, %c0_i32_0 : i32, i32
  }
  func.func @transform_2(%arg0: i32) -> (i32, i32) {
    %c0_i32 = arith.constant 0 : i32
    %c0_i32_0 = arith.constant 0 : i32
    %c0_i32_1 = arith.constant 0 : i32
    return %c0_i32, %c0_i32_0 : i32, i32
  }
  func.func @transform_3(%arg0: i32) -> (i32, i32) {
    %c0_i32 = arith.constant 0 : i32
    %c0_i32_0 = arith.constant 0 : i32
    %c0_i32_1 = arith.constant 0 : i32
    return %c0_i32, %c0_i32_0 : i32, i32
  }
  func.func @transform_4(%arg0: i32) -> (i32, i32) {
    %c0_i32 = arith.constant 0 : i32
    %c0_i32_0 = arith.constant 0 : i32
    return %arg0, %c0_i32 : i32, i32
  }
}

module attributes {stable_mosaic.version = 11 : i64} {
  func.func @_mm_epilogue_res_kernel(%arg0: i32, %arg1: memref<2x1728xbf16, #tpu.memory_space<vmem>>, %arg2: memref<1728x64xbf16, #tpu.memory_space<vmem>>, %arg3: memref<1x64xf32, #tpu.memory_space<vmem>>, %arg4: memref<1x64xf32, #tpu.memory_space<vmem>>, %arg5: memref<2x64xbf16, #tpu.memory_space<vmem>>, %arg6: memref<2x64xbf16, #tpu.memory_space<vmem>>) attributes {dimension_semantics = [#tpu.dimension_semantics<parallel>], iteration_bounds = array<i64: 1>, scalar_prefetch = 0 : i64, scratch_operands = 0 : i64, tpu.core_type = #tpu.core_type<tc>, window_params = [{transform_indices = @transform_0, window_bounds = array<i64: 2, 1728>}, {pipeline_mode = #tpu.pipeline_mode<synchronous>, transform_indices = @transform_1, window_bounds = array<i64: 1728, 64>}, {pipeline_mode = #tpu.pipeline_mode<synchronous>, transform_indices = @transform_2, window_bounds = array<i64: 1, 64>}, {pipeline_mode = #tpu.pipeline_mode<synchronous>, transform_indices = @transform_3, window_bounds = array<i64: 1, 64>}, {transform_indices = @transform_4, window_bounds = array<i64: 2, 64>}, {transform_indices = @transform_5, window_bounds = array<i64: 2, 64>}]} {
    %c0 = arith.constant 0 : index
    %c0_0 = arith.constant 0 : index
    %0 = vector.load %arg1[%c0, %c0_0] : memref<2x1728xbf16, #tpu.memory_space<vmem>>, vector<2x1728xbf16>
    %c0_1 = arith.constant 0 : index
    %c0_2 = arith.constant 0 : index
    %1 = vector.load %arg2[%c0_1, %c0_2] : memref<1728x64xbf16, #tpu.memory_space<vmem>>, vector<1728x64xbf16>
    %cst = arith.constant dense<0.000000e+00> : vector<2x64xf32>
    %2 = tpu.matmul %0, %1, %cst {dimension_numbers = #tpu.dot_dimension_numbers<[1], [0], [0], [1], [0, 0, 1, 1], [], []>} : vector<2x1728xbf16>, vector<1728x64xbf16>, vector<2x64xf32> -> vector<2x64xf32>
    %c0_3 = arith.constant 0 : index
    %c0_4 = arith.constant 0 : index
    %3 = vector.load %arg3[%c0_3, %c0_4] : memref<1x64xf32, #tpu.memory_space<vmem>>, vector<1x64xf32>
    %4 = vector.broadcast %3 : vector<1x64xf32> to vector<2x64xf32>
    %5 = arith.mulf %2, %4 : vector<2x64xf32>
    %c0_5 = arith.constant 0 : index
    %c0_6 = arith.constant 0 : index
    %6 = vector.load %arg4[%c0_5, %c0_6] : memref<1x64xf32, #tpu.memory_space<vmem>>, vector<1x64xf32>
    %7 = vector.broadcast %6 : vector<1x64xf32> to vector<2x64xf32>
    %8 = arith.addf %5, %7 : vector<2x64xf32>
    %c0_7 = arith.constant 0 : index
    %c0_8 = arith.constant 0 : index
    %9 = vector.load %arg5[%c0_7, %c0_8] : memref<2x64xbf16, #tpu.memory_space<vmem>>, vector<2x64xbf16>
    %10 = arith.extf %9 : vector<2x64xbf16> to vector<2x64xf32>
    %11 = arith.addf %8, %10 : vector<2x64xf32>
    %cst_9 = arith.constant 0.000000e+00 : f32
    %12 = vector.broadcast %cst_9 : f32 to vector<2x64xf32>
    %13 = arith.maximumf %11, %12 : vector<2x64xf32>
    %14 = arith.truncf %13 : vector<2x64xf32> to vector<2x64xbf16>
    %c0_10 = arith.constant 0 : index
    %c0_11 = arith.constant 0 : index
    %15 = vector.load %arg6[%c0_10, %c0_11] : memref<2x64xbf16, #tpu.memory_space<vmem>>, vector<2x64xbf16>
    tpu.vector_store %arg6[%c0_10, %c0_11], %14 {strides = array<i32>} : memref<2x64xbf16, #tpu.memory_space<vmem>>, vector<2x64xbf16>,
    return
  }
  func.func @transform_0(%arg0: i32) -> (i32, i32) {
    %c0_i32 = arith.constant 0 : i32
    %c0_i32_0 = arith.constant 0 : i32
    return %arg0, %c0_i32 : i32, i32
  }
  func.func @transform_1(%arg0: i32) -> (i32, i32) {
    %c0_i32 = arith.constant 0 : i32
    %c0_i32_0 = arith.constant 0 : i32
    %c0_i32_1 = arith.constant 0 : i32
    return %c0_i32, %c0_i32_0 : i32, i32
  }
  func.func @transform_2(%arg0: i32) -> (i32, i32) {
    %c0_i32 = arith.constant 0 : i32
    %c0_i32_0 = arith.constant 0 : i32
    %c0_i32_1 = arith.constant 0 : i32
    return %c0_i32, %c0_i32_0 : i32, i32
  }
  func.func @transform_3(%arg0: i32) -> (i32, i32) {
    %c0_i32 = arith.constant 0 : i32
    %c0_i32_0 = arith.constant 0 : i32
    %c0_i32_1 = arith.constant 0 : i32
    return %c0_i32, %c0_i32_0 : i32, i32
  }
  func.func @transform_4(%arg0: i32) -> (i32, i32) {
    %c0_i32 = arith.constant 0 : i32
    %c0_i32_0 = arith.constant 0 : i32
    return %arg0, %c0_i32 : i32, i32
  }
  func.func @transform_5(%arg0: i32) -> (i32, i32) {
    %c0_i32 = arith.constant 0 : i32
    %c0_i32_0 = arith.constant 0 : i32
    return %arg0, %c0_i32 : i32, i32
  }
}

module attributes {stable_mosaic.version = 11 : i64} {
  func.func @_mm_epilogue_kernel(%arg0: i32, %arg1: memref<2x32xbf16, #tpu.memory_space<vmem>>, %arg2: memref<32x64xbf16, #tpu.memory_space<vmem>>, %arg3: memref<1x64xf32, #tpu.memory_space<vmem>>, %arg4: memref<1x64xf32, #tpu.memory_space<vmem>>, %arg5: memref<2x64xbf16, #tpu.memory_space<vmem>>) attributes {dimension_semantics = [#tpu.dimension_semantics<parallel>], iteration_bounds = array<i64: 1>, scalar_prefetch = 0 : i64, scratch_operands = 0 : i64, tpu.core_type = #tpu.core_type<tc>, window_params = [{transform_indices = @transform_0, window_bounds = array<i64: 2, 32>}, {pipeline_mode = #tpu.pipeline_mode<synchronous>, transform_indices = @transform_1, window_bounds = array<i64: 32, 64>}, {pipeline_mode = #tpu.pipeline_mode<synchronous>, transform_indices = @transform_2, window_bounds = array<i64: 1, 64>}, {pipeline_mode = #tpu.pipeline_mode<synchronous>, transform_indices = @transform_3, window_bounds = array<i64: 1, 64>}, {transform_indices = @transform_4, window_bounds = array<i64: 2, 64>}]} {
    %c0 = arith.constant 0 : index
    %c0_0 = arith.constant 0 : index
    %0 = vector.load %arg1[%c0, %c0_0] : memref<2x32xbf16, #tpu.memory_space<vmem>>, vector<2x32xbf16>
    %c0_1 = arith.constant 0 : index
    %c0_2 = arith.constant 0 : index
    %1 = vector.load %arg2[%c0_1, %c0_2] : memref<32x64xbf16, #tpu.memory_space<vmem>>, vector<32x64xbf16>
    %cst = arith.constant dense<0.000000e+00> : vector<2x64xf32>
    %2 = tpu.matmul %0, %1, %cst {dimension_numbers = #tpu.dot_dimension_numbers<[1], [0], [0], [1], [0, 0, 1, 1], [], []>} : vector<2x32xbf16>, vector<32x64xbf16>, vector<2x64xf32> -> vector<2x64xf32>
    %c0_3 = arith.constant 0 : index
    %c0_4 = arith.constant 0 : index
    %3 = vector.load %arg3[%c0_3, %c0_4] : memref<1x64xf32, #tpu.memory_space<vmem>>, vector<1x64xf32>
    %4 = vector.broadcast %3 : vector<1x64xf32> to vector<2x64xf32>
    %5 = arith.mulf %2, %4 : vector<2x64xf32>
    %c0_5 = arith.constant 0 : index
    %c0_6 = arith.constant 0 : index
    %6 = vector.load %arg4[%c0_5, %c0_6] : memref<1x64xf32, #tpu.memory_space<vmem>>, vector<1x64xf32>
    %7 = vector.broadcast %6 : vector<1x64xf32> to vector<2x64xf32>
    %8 = arith.addf %5, %7 : vector<2x64xf32>
    %9 = arith.truncf %8 : vector<2x64xf32> to vector<2x64xbf16>
    %c0_7 = arith.constant 0 : index
    %c0_8 = arith.constant 0 : index
    %10 = vector.load %arg5[%c0_7, %c0_8] : memref<2x64xbf16, #tpu.memory_space<vmem>>, vector<2x64xbf16>
    tpu.vector_store %arg5[%c0_7, %c0_8], %9 {strides = array<i32>} : memref<2x64xbf16, #tpu.memory_space<vmem>>, vector<2x64xbf16>,
    return
  }
  func.func @transform_0(%arg0: i32) -> (i32, i32) {
    %c0_i32 = arith.constant 0 : i32
    %c0_i32_0 = arith.constant 0 : i32
    return %arg0, %c0_i32 : i32, i32
  }
  func.func @transform_1(%arg0: i32) -> (i32, i32) {
    %c0_i32 = arith.constant 0 : i32
    %c0_i32_0 = arith.constant 0 : i32
    %c0_i32_1 = arith.constant 0 : i32
    return %c0_i32, %c0_i32_0 : i32, i32
  }
  func.func @transform_2(%arg0: i32) -> (i32, i32) {
    %c0_i32 = arith.constant 0 : i32
    %c0_i32_0 = arith.constant 0 : i32
    %c0_i32_1 = arith.constant 0 : i32
    return %c0_i32, %c0_i32_0 : i32, i32
  }
  func.func @transform_3(%arg0: i32) -> (i32, i32) {
    %c0_i32 = arith.constant 0 : i32
    %c0_i32_0 = arith.constant 0 : i32
    %c0_i32_1 = arith.constant 0 : i32
    return %c0_i32, %c0_i32_0 : i32, i32
  }
  func.func @transform_4(%arg0: i32) -> (i32, i32) {
    %c0_i32 = arith.constant 0 : i32
    %c0_i32_0 = arith.constant 0 : i32
    return %arg0, %c0_i32 : i32, i32
  }
}

module attributes {stable_mosaic.version = 11 : i64} {
  func.func @_avgpool_kernel(%arg0: i32, %arg1: memref<1x1x64xbf16, #tpu.memory_space<vmem>>, %arg2: memref<1x1x64xf32, #tpu.memory_space<vmem>>) attributes {dimension_semantics = [#tpu.dimension_semantics<parallel>], iteration_bounds = array<i64: 2>, scalar_prefetch = 0 : i64, scratch_operands = 0 : i64, tpu.core_type = #tpu.core_type<tc>, window_params = [{transform_indices = @transform_0, window_bounds = array<i64: 1, 1, 64>}, {transform_indices = @transform_1, window_bounds = array<i64: 1, 1, 64>}]} {
    %c0 = arith.constant 0 : index
    %c0_0 = arith.constant 0 : index
    %c0_1 = arith.constant 0 : index
    %0 = vector.load %arg1[%c0, %c0_0, %c0_1] : memref<1x1x64xbf16, #tpu.memory_space<vmem>>, vector<1x1x64xbf16>
    %1 = arith.extf %0 : vector<1x1x64xbf16> to vector<1x1x64xf32>
    %cst = arith.constant dense<0.000000e+00> : vector<1x64xf32>
    %2 = vector.multi_reduction <add>, %1, %cst [1] : vector<1x1x64xf32> to vector<1x64xf32>
    %3 = vector.shape_cast %2 : vector<1x64xf32> to vector<1x1x64xf32>
    %cst_2 = arith.constant 1.000000e+00 : f32
    %4 = vector.broadcast %cst_2 : f32 to vector<1x1x64xf32>
    %5 = arith.divf %3, %4 : vector<1x1x64xf32>
    %c0_3 = arith.constant 0 : index
    %c0_4 = arith.constant 0 : index
    %c0_5 = arith.constant 0 : index
    %6 = vector.load %arg2[%c0_3, %c0_4, %c0_5] : memref<1x1x64xf32, #tpu.memory_space<vmem>>, vector<1x1x64xf32>
    tpu.vector_store %arg2[%c0_3, %c0_4, %c0_5], %5 {strides = array<i32>} : memref<1x1x64xf32, #tpu.memory_space<vmem>>, vector<1x1x64xf32>,
    return
  }
  func.func @transform_0(%arg0: i32) -> (i32, i32, i32) {
    %c0_i32 = arith.constant 0 : i32
    %c0_i32_0 = arith.constant 0 : i32
    %c0_i32_1 = arith.constant 0 : i32
    return %arg0, %c0_i32, %c0_i32_0 : i32, i32, i32
  }
  func.func @transform_1(%arg0: i32) -> (i32, i32, i32) {
    %c0_i32 = arith.constant 0 : i32
    %c0_i32_0 = arith.constant 0 : i32
    %c0_i32_1 = arith.constant 0 : i32
    return %arg0, %c0_i32, %c0_i32_0 : i32, i32, i32
  }
}

module attributes {stable_mosaic.version = 11 : i64} {
  func.func @_mm_epilogue_kernel(%arg0: i32, %arg1: memref<2x64xbf16, #tpu.memory_space<vmem>>, %arg2: memref<64x16xbf16, #tpu.memory_space<vmem>>, %arg3: memref<1x16xf32, #tpu.memory_space<vmem>>, %arg4: memref<1x16xf32, #tpu.memory_space<vmem>>, %arg5: memref<2x16xf32, #tpu.memory_space<vmem>>) attributes {dimension_semantics = [#tpu.dimension_semantics<parallel>], iteration_bounds = array<i64: 1>, scalar_prefetch = 0 : i64, scratch_operands = 0 : i64, tpu.core_type = #tpu.core_type<tc>, window_params = [{transform_indices = @transform_0, window_bounds = array<i64: 2, 64>}, {pipeline_mode = #tpu.pipeline_mode<synchronous>, transform_indices = @transform_1, window_bounds = array<i64: 64, 16>}, {pipeline_mode = #tpu.pipeline_mode<synchronous>, transform_indices = @transform_2, window_bounds = array<i64: 1, 16>}, {pipeline_mode = #tpu.pipeline_mode<synchronous>, transform_indices = @transform_3, window_bounds = array<i64: 1, 16>}, {transform_indices = @transform_4, window_bounds = array<i64: 2, 16>}]} {
    %c0 = arith.constant 0 : index
    %c0_0 = arith.constant 0 : index
    %0 = vector.load %arg1[%c0, %c0_0] : memref<2x64xbf16, #tpu.memory_space<vmem>>, vector<2x64xbf16>
    %c0_1 = arith.constant 0 : index
    %c0_2 = arith.constant 0 : index
    %1 = vector.load %arg2[%c0_1, %c0_2] : memref<64x16xbf16, #tpu.memory_space<vmem>>, vector<64x16xbf16>
    %cst = arith.constant dense<0.000000e+00> : vector<2x16xf32>
    %2 = tpu.matmul %0, %1, %cst {dimension_numbers = #tpu.dot_dimension_numbers<[1], [0], [0], [1], [0, 0, 1, 1], [], []>} : vector<2x64xbf16>, vector<64x16xbf16>, vector<2x16xf32> -> vector<2x16xf32>
    %c0_3 = arith.constant 0 : index
    %c0_4 = arith.constant 0 : index
    %3 = vector.load %arg3[%c0_3, %c0_4] : memref<1x16xf32, #tpu.memory_space<vmem>>, vector<1x16xf32>
    %4 = vector.broadcast %3 : vector<1x16xf32> to vector<2x16xf32>
    %5 = arith.mulf %2, %4 : vector<2x16xf32>
    %c0_5 = arith.constant 0 : index
    %c0_6 = arith.constant 0 : index
    %6 = vector.load %arg4[%c0_5, %c0_6] : memref<1x16xf32, #tpu.memory_space<vmem>>, vector<1x16xf32>
    %7 = vector.broadcast %6 : vector<1x16xf32> to vector<2x16xf32>
    %8 = arith.addf %5, %7 : vector<2x16xf32>
    %c0_7 = arith.constant 0 : index
    %c0_8 = arith.constant 0 : index
    %9 = vector.load %arg5[%c0_7, %c0_8] : memref<2x16xf32, #tpu.memory_space<vmem>>, vector<2x16xf32>
    tpu.vector_store %arg5[%c0_7, %c0_8], %8 {strides = array<i32>} : memref<2x16xf32, #tpu.memory_space<vmem>>, vector<2x16xf32>,
    return
  }
  func.func @transform_0(%arg0: i32) -> (i32, i32) {
    %c0_i32 = arith.constant 0 : i32
    %c0_i32_0 = arith.constant 0 : i32
    return %arg0, %c0_i32 : i32, i32
  }
  func.func @transform_1(%arg0: i32) -> (i32, i32) {
    %c0_i32 = arith.constant 0 : i32
    %c0_i32_0 = arith.constant 0 : i32
    %c0_i32_1 = arith.constant 0 : i32
    return %c0_i32, %c0_i32_0 : i32, i32
  }
  func.func @transform_2(%arg0: i32) -> (i32, i32) {
    %c0_i32 = arith.constant 0 : i32
    %c0_i32_0 = arith.constant 0 : i32
    %c0_i32_1 = arith.constant 0 : i32
    return %c0_i32, %c0_i32_0 : i32, i32
  }
  func.func @transform_3(%arg0: i32) -> (i32, i32) {
    %c0_i32 = arith.constant 0 : i32
    %c0_i32_0 = arith.constant 0 : i32
    %c0_i32_1 = arith.constant 0 : i32
    return %c0_i32, %c0_i32_0 : i32, i32
  }
  func.func @transform_4(%arg0: i32) -> (i32, i32) {
    %c0_i32 = arith.constant 0 : i32
    %c0_i32_0 = arith.constant 0 : i32
    return %arg0, %c0_i32 : i32, i32
  }
}

module attributes {stable_mosaic.version = 11 : i64} {
  func.func @_mm_epilogue_kernel(%arg0: i32, %arg1: memref<2x16xbf16, #tpu.memory_space<vmem>>, %arg2: memref<16x2xbf16, #tpu.memory_space<vmem>>, %arg3: memref<1x2xf32, #tpu.memory_space<vmem>>, %arg4: memref<1x2xf32, #tpu.memory_space<vmem>>, %arg5: memref<2x2xf32, #tpu.memory_space<vmem>>) attributes {dimension_semantics = [#tpu.dimension_semantics<parallel>], iteration_bounds = array<i64: 1>, scalar_prefetch = 0 : i64, scratch_operands = 0 : i64, tpu.core_type = #tpu.core_type<tc>, window_params = [{transform_indices = @transform_0, window_bounds = array<i64: 2, 16>}, {pipeline_mode = #tpu.pipeline_mode<synchronous>, transform_indices = @transform_1, window_bounds = array<i64: 16, 2>}, {pipeline_mode = #tpu.pipeline_mode<synchronous>, transform_indices = @transform_2, window_bounds = array<i64: 1, 2>}, {pipeline_mode = #tpu.pipeline_mode<synchronous>, transform_indices = @transform_3, window_bounds = array<i64: 1, 2>}, {transform_indices = @transform_4, window_bounds = array<i64: 2, 2>}]} {
    %c0 = arith.constant 0 : index
    %c0_0 = arith.constant 0 : index
    %0 = vector.load %arg1[%c0, %c0_0] : memref<2x16xbf16, #tpu.memory_space<vmem>>, vector<2x16xbf16>
    %c0_1 = arith.constant 0 : index
    %c0_2 = arith.constant 0 : index
    %1 = vector.load %arg2[%c0_1, %c0_2] : memref<16x2xbf16, #tpu.memory_space<vmem>>, vector<16x2xbf16>
    %cst = arith.constant dense<0.000000e+00> : vector<2x2xf32>
    %2 = tpu.matmul %0, %1, %cst {dimension_numbers = #tpu.dot_dimension_numbers<[1], [0], [0], [1], [0, 0, 1, 1], [], []>} : vector<2x16xbf16>, vector<16x2xbf16>, vector<2x2xf32> -> vector<2x2xf32>
    %c0_3 = arith.constant 0 : index
    %c0_4 = arith.constant 0 : index
    %3 = vector.load %arg3[%c0_3, %c0_4] : memref<1x2xf32, #tpu.memory_space<vmem>>, vector<1x2xf32>
    %4 = vector.broadcast %3 : vector<1x2xf32> to vector<2x2xf32>
    %5 = arith.mulf %2, %4 : vector<2x2xf32>
    %c0_5 = arith.constant 0 : index
    %c0_6 = arith.constant 0 : index
    %6 = vector.load %arg4[%c0_5, %c0_6] : memref<1x2xf32, #tpu.memory_space<vmem>>, vector<1x2xf32>
    %7 = vector.broadcast %6 : vector<1x2xf32> to vector<2x2xf32>
    %8 = arith.addf %5, %7 : vector<2x2xf32>
    %c0_7 = arith.constant 0 : index
    %c0_8 = arith.constant 0 : index
    %9 = vector.load %arg5[%c0_7, %c0_8] : memref<2x2xf32, #tpu.memory_space<vmem>>, vector<2x2xf32>
    tpu.vector_store %arg5[%c0_7, %c0_8], %8 {strides = array<i32>} : memref<2x2xf32, #tpu.memory_space<vmem>>, vector<2x2xf32>,
    return
  }
  func.func @transform_0(%arg0: i32) -> (i32, i32) {
    %c0_i32 = arith.constant 0 : i32
    %c0_i32_0 = arith.constant 0 : i32
    return %arg0, %c0_i32 : i32, i32
  }
  func.func @transform_1(%arg0: i32) -> (i32, i32) {
    %c0_i32 = arith.constant 0 : i32
    %c0_i32_0 = arith.constant 0 : i32
    %c0_i32_1 = arith.constant 0 : i32
    return %c0_i32, %c0_i32_0 : i32, i32
  }
  func.func @transform_2(%arg0: i32) -> (i32, i32) {
    %c0_i32 = arith.constant 0 : i32
    %c0_i32_0 = arith.constant 0 : i32
    %c0_i32_1 = arith.constant 0 : i32
    return %c0_i32, %c0_i32_0 : i32, i32
  }
  func.func @transform_3(%arg0: i32) -> (i32, i32) {
    %c0_i32 = arith.constant 0 : i32
    %c0_i32_0 = arith.constant 0 : i32
    %c0_i32_1 = arith.constant 0 : i32
    return %c0_i32, %c0_i32_0 : i32, i32
  }
  func.func @transform_4(%arg0: i32) -> (i32, i32) {
    %c0_i32 = arith.constant 0 : i32
    %c0_i32_0 = arith.constant 0 : i32
    return %arg0, %c0_i32 : i32, i32
  }
}

</mosaic_0001>

<bundles_post_ra>
// kernel: resnet_forward.20
= control target key start
LH: loop header
LB: loop body
LE: loop exit
PB: predicated region body
PF: predicated region fallthrough
CT: control target
= control target key end

     0   :  { %s1176_s6 = smov 0   ;;  %s2332_s0 = inlined_call_operand.vmem [shape: bf16[2,512,8], index: 0, kind: input, shape index: {}]   ;;  %s2333_s1 = inlined_call_operand.vmem [shape: bf16[2,512,8], index: 1, kind: output, shape index: {}]  }
   0x1 LB: > { %s972_s7 = sadd.s32 4294967295, %s1163_s6   ;;  %p976_p0 = scmp.ge.s32.totalorder %s1163_s6, 1  ;;  %s1163_s6 = sphi %s1176_s6, %s11_s6  }
   0x2   : > { %p87_p1 = scmp.lt.s32.totalorder %s1163_s6, 3 }
   0x4   : > { %p88_p2 = pnand %p976_p0, %p87_p1 }
   0x6   : > { %91 = sbr.rel (%p88_p2) target bundleno = 395 (0x18b), region = 24 }
   0xb   : > { %p107_p3 = scmp.lt.s32.totalorder %s972_s7, 1  ;;  %vm245_vm0 = vcmask 64512   ;;  %vm852_vm5 = vcmask 60416  }
   0xd   : > { %s2501_s7 = smov (!%p107_p3, %s972_s7), 1 }
   0xe   : > { %s983_s8 = sshll.u32 %s2501_s7, 8 }
   0xf   : > { %s1192_s11 = scalar_lea.vmem %s2332_s0, %s983_s8  ;;  %s2087_s14 = scalar_lea.vmem %s2333_s1, %s983_s8 }
  0x10   : > { %v1195_v0 = vld [vmem:[%s1192_s11] sm:$0xff]   ;;  %v1198_v1 = vld [vmem:[%s1192_s11 + $0x8] sm:$0xff]   ;;  %v1204_v5 = vld [vmem:[%s1192_s11 + $0x10] sm:$0xff]  }
  0x11   : > { %v987_v2 = vunpack.c.l.bf16 %v1195_v0  ;;  %v988_v3 = vunpack.c.h.bf16 %v1195_v0  ;;  %v991_v4 = vunpack.c.l.bf16 %v1198_v1  ;;  %v992_v6 = vunpack.c.h.bf16 %v1198_v1  ;;  %v1218_v11 = vld [vmem:[%s1192_s11 + $0x18] sm:$0xff]   ;;  %v1229_v18 = vld [vmem:[%s1192_s11 + $0x20] sm:$0xff]   ;;  %v1240_v25 = vld [vmem:[%s1192_s11 + $0x28] sm:$0xff]  }
  0x12   : > { %v995_v7 = vunpack.c.l.bf16 %v1204_v5  ;;  %v996_v13 = vunpack.c.h.bf16 %v1204_v5  ;;  %v999_v16 = vunpack.c.l.bf16 %v1218_v11  ;;  %v1000_v20 = vunpack.c.h.bf16 %v1218_v11  ;;  %v1251_v32 = vld [vmem:[%s1192_s11 + $0x30] sm:$0xff]   ;;  %v1262_v39 = vld [vmem:[%s1192_s11 + $0x38] sm:$0xff]   ;;  %v1273_v46 = vld [vmem:[%s1192_s11 + $0x40] sm:$0xff]  }
  0x13   : > { %v246_v8 = vsel %vm245_vm0, %v987_v2, 0.0  ;;  %v247_v9 = vsel %vm245_vm0, %v988_v3, 0.0  ;;  %v249_v10 = vsel %vm245_vm0, %v991_v4, 0.0  ;;  %v251_v14 = vsel %vm245_vm0, %v992_v6, 0.0  ;;  %v1284_v53 = vld [vmem:[%s1192_s11 + $0x48] sm:$0xff]   ;;  %v1295_v60 = vld [vmem:[%s1192_s11 + $0x50] sm:$0xff]  }
  0x14   : > { %v248_v12 = vadd.f32 %v247_v9, %v246_v8  ;;  %v253_v17 = vsel %vm245_vm0, %v995_v7, 0.0  ;;  %v255_v21 = vsel %vm245_vm0, %v996_v13, 0.0  ;;  %v1003_v23 = vunpack.c.l.bf16 %v1229_v18 }
  0x15   : > { %v257_v24 = vsel %vm245_vm0, %v999_v16, 0.0  ;;  %v1004_v27 = vunpack.c.h.bf16 %v1229_v18  ;;  %v259_v28 = vsel %vm245_vm0, %v1000_v20, 0.0  ;;  %v1007_v30 = vunpack.c.l.bf16 %v1240_v25 }
  0x16   : > { %v250_v15 = vadd.f32 %v249_v10, %v248_v12  ;;  %v261_v31 = vsel %vm245_vm0, %v1003_v23, 0.0  ;;  %v1008_v34 = vunpack.c.h.bf16 %v1240_v25  ;;  %v1011_v37 = vunpack.c.l.bf16 %v1251_v32  ;;  %v1306_v12 = vld [vmem:[%s1192_s11 + $0x58] sm:$0xff]  }
  0x17   : > { %v263_v35 = vsel %vm245_vm0, %v1004_v27, 0.0  ;;  %v265_v38 = vsel %vm245_vm0, %v1007_v30, 0.0  ;;  %v1012_v41 = vunpack.c.h.bf16 %v1251_v32  ;;  %v2381_v44 = vunpack.c.l.bf16 %v1262_v39 }
  0x18   : > { %v252_v19 = vadd.f32 %v251_v14, %v250_v15  ;;  %v267_v42 = vsel %vm245_vm0, %v1008_v34, 0.0  ;;  %v269_v45 = vsel %vm245_vm0, %v1011_v37, 0.0  ;;  %v2380_v48 = vunpack.c.h.bf16 %v1262_v39 }
  0x19   : > { %v271_v49 = vsel %vm245_vm0, %v1012_v41, 0.0  ;;  %v2379_v51 = vunpack.c.l.bf16 %v1273_v46  ;;  %v273_v52 = vsel %vm245_vm0, %v2381_v44, 0.0  ;;  %v2377_v55 = vunpack.c.h.bf16 %v1273_v46 }
  0x1a   : > { %v254_v22 = vadd.f32 %v253_v17, %v252_v19  ;;  %v275_v56 = vsel %vm245_vm0, %v2380_v48, 0.0  ;;  %v2376_v58 = vunpack.c.l.bf16 %v1284_v53  ;;  %v2371_v62 = vunpack.c.h.bf16 %v1284_v53 }
  0x1b   : > { %v277_v59 = vsel %vm245_vm0, %v2379_v51, 0.0  ;;  %v279_v63 = vsel %vm245_vm0, %v2377_v55, 0.0  ;;  %v2368_v9 = vunpack.c.l.bf16 %v1295_v60  ;;  %v2365_v15 = vunpack.c.h.bf16 %v1295_v60 }
  0x1c   : > { %v256_v26 = vadd.f32 %v255_v21, %v254_v22  ;;  %v281_v10 = vsel %vm245_vm0, %v2376_v58, 0.0  ;;  %v283_v17 = vsel %vm245_vm0, %v2371_v62, 0.0  ;;  %v2361_v21 = vunpack.c.l.bf16 %v1306_v12 }
  0x1d   : > { %v285_v22 = vsel %vm245_vm0, %v2368_v9, 0.0  ;;  %v2407_v32 = vunpack.c.h.bf16 %v1262_v39 }
  0x1e   : > { %v258_v29 = vadd.f32 %v257_v24, %v256_v26  ;;  %v1317_v24 = vld [vmem:[%s1192_s11 + $0x60] sm:$0xff]  }
  0x20   : > { %v260_v33 = vadd.f32 %v259_v28, %v258_v29  ;;  %v2359_v28 = vunpack.c.h.bf16 %v1306_v12  ;;  %v287_v29 = vsel %vm245_vm0, %v2365_v15, 0.0 }
  0x22   : > { %v262_v36 = vadd.f32 %v261_v31, %v260_v33  ;;  %v2356_v33 = vunpack.c.l.bf16 %v1317_v24 }
  0x24   : > { %v264_v40 = vadd.f32 %v263_v35, %v262_v36  ;;  %v289_v35 = vsel %vm245_vm0, %v2361_v21, 0.0  ;;  %v1328_v36 = vld [vmem:[%s1192_s11 + $0x68] sm:$0xff]  }
  0x26   : > { %v266_v43 = vadd.f32 %v265_v38, %v264_v40  ;;  %v2353_v40 = vunpack.c.h.bf16 %v1317_v24 }
  0x28   : > { %v268_v47 = vadd.f32 %v267_v42, %v266_v43  ;;  %v291_v42 = vsel %vm245_vm0, %v2359_v28, 0.0 }
  0x2a   : > { %v270_v50 = vadd.f32 %v269_v45, %v268_v47  ;;  %v2350_v45 = vunpack.c.l.bf16 %v1328_v36  ;;  %v293_v47 = vsel %vm245_vm0, %v2356_v33, 0.0 }
  0x2c   : > { %v272_v54 = vadd.f32 %v271_v49, %v270_v50  ;;  %v1339_v49 = vld [vmem:[%s1192_s11 + $0x70] sm:$0xff]  }
  0x2e   : > { %v274_v57 = vadd.f32 %v273_v52, %v272_v54  ;;  %v2347_v52 = vunpack.c.h.bf16 %v1328_v36  ;;  %v295_v54 = vsel %vm245_vm0, %v2353_v40, 0.0 }
  0x30   : > { %v276_v61 = vadd.f32 %v275_v56, %v274_v57  ;;  %v2344_v57 = vunpack.c.l.bf16 %v1339_v49 }
  0x32   : > { %v278_v8 = vadd.f32 %v277_v59, %v276_v61  ;;  %v297_v59 = vsel %vm245_vm0, %v2350_v45, 0.0  ;;  %v1350_v61 = vld [vmem:[%s1192_s11 + $0x78] sm:$0xff]  }
  0x34   : > { %v280_v14 = vadd.f32 %v279_v63, %v278_v8  ;;  %v2341_v8 = vunpack.c.h.bf16 %v1339_v49 }
  0x36   : > { %v282_v19 = vadd.f32 %v281_v10, %v280_v14  ;;  %v299_v10 = vsel %vm245_vm0, %v2347_v52, 0.0 }
  0x38   : > { %v284_v26 = vadd.f32 %v283_v17, %v282_v19  ;;  %v2338_v17 = vunpack.c.l.bf16 %v1350_v61  ;;  %v301_v19 = vsel %vm245_vm0, %v2344_v57, 0.0 }
  0x3a   : > { %v286_v31 = vadd.f32 %v285_v22, %v284_v26  ;;  %v1361_v22 = vld [vmem:[%s1192_s11 + $0x80] sm:$0xff]  }
  0x3c   : > { %v288_v38 = vadd.f32 %v287_v29, %v286_v31  ;;  %v2335_v29 = vunpack.c.h.bf16 %v1350_v61  ;;  %v303_v31 = vsel %vm245_vm0, %v2341_v8, 0.0 }
  0x3e   : > { %v290_v43 = vadd.f32 %v289_v35, %v288_v38  ;;  %v2334_v38 = vunpack.c.l.bf16 %v1361_v22 }
  0x40   : > { %v292_v50 = vadd.f32 %v291_v42, %v290_v43  ;;  %v305_v42 = vsel %vm245_vm0, %v2338_v17, 0.0  ;;  %v1372_v43 = vld [vmem:[%s1192_s11 + $0x88] sm:$0xff]  }
  0x42   : > { %v294_v56 = vadd.f32 %v293_v47, %v292_v50  ;;  %v2336_v50 = vunpack.c.h.bf16 %v1361_v22 }
  0x44   : > { %v296_v63 = vadd.f32 %v295_v54, %v294_v56  ;;  %v307_v54 = vsel %vm245_vm0, %v2335_v29, 0.0 }
  0x46   : > { %v298_v14 = vadd.f32 %v297_v59, %v296_v63  ;;  %v2337_v59 = vunpack.c.l.bf16 %v1372_v43  ;;  %v309_v63 = vsel %vm245_vm0, %v2334_v38, 0.0 }
  0x48   : > { %v300_v26 = vadd.f32 %v299_v10, %v298_v14  ;;  %v1383_v10 = vld [vmem:[%s1192_s11 + $0x90] sm:$0xff]  }
  0x49   : > { %v2342_v29 = vunpack.c.h.bf16 %v1383_v10 }
  0x4a   : > { %v302_v35 = vadd.f32 %v301_v19, %v300_v26  ;;  %v2339_v19 = vunpack.c.h.bf16 %v1372_v43  ;;  %v311_v26 = vsel %vm245_vm0, %v2336_v50, 0.0 }
  0x4c   : > { %v304_v47 = vadd.f32 %v303_v31, %v302_v35  ;;  %v2340_v35 = vunpack.c.l.bf16 %v1383_v10 }
  0x4e   : > { %v306_v56 = vadd.f32 %v305_v42, %v304_v47  ;;  %v313_v42 = vsel %vm245_vm0, %v2337_v59, 0.0  ;;  %v1394_v47 = vld [vmem:[%s1192_s11 + $0x98] sm:$0xff]  }
  0x4f   : > { %v2343_v50 = vunpack.c.l.bf16 %v1394_v47  ;;  %v2345_v17 = vunpack.c.h.bf16 %v1394_v47 }
  0x50   : > { %v308_v14 = vadd.f32 %v307_v54, %v306_v56  ;;  %v315_v54 = vsel %vm245_vm0, %v2339_v19, 0.0 }
  0x52   : > { %v310_v31 = vadd.f32 %v309_v63, %v308_v14  ;;  %v317_v63 = vsel %vm245_vm0, %v2340_v35, 0.0  ;;  %v1405_v14 = vld [vmem:[%s1192_s11 + $0xa0] sm:$0xff]  }
  0x53   : > { %v2346_v19 = vunpack.c.l.bf16 %v1405_v14  ;;  %v2348_v8 = vunpack.c.h.bf16 %v1405_v14 }
  0x54   : > { %v312_v38 = vadd.f32 %v311_v26, %v310_v31  ;;  %v319_v26 = vsel %vm245_vm0, %v2342_v29, 0.0 }
  0x56   : > { %v314_v56 = vadd.f32 %v313_v42, %v312_v38  ;;  %v321_v38 = vsel %vm245_vm0, %v2343_v50, 0.0  ;;  %v1416_v42 = vld [vmem:[%s1192_s11 + $0xa8] sm:$0xff]  }
  0x57   : > { %v2349_v29 = vunpack.c.l.bf16 %v1416_v42  ;;  %v2351_v57 = vunpack.c.h.bf16 %v1416_v42 }
  0x58   : > { %v316_v59 = vadd.f32 %v315_v54, %v314_v56  ;;  %v323_v54 = vsel %vm245_vm0, %v2345_v17, 0.0 }
  0x5a   : > { %v318_v31 = vadd.f32 %v317_v63, %v316_v59  ;;  %v325_v59 = vsel %vm245_vm0, %v2346_v19, 0.0  ;;  %v1427_v63 = vld [vmem:[%s1192_s11 + $0xb0] sm:$0xff]  }
  0x5b   : > { %v2352_v17 = vunpack.c.l.bf16 %v1427_v63  ;;  %v2354_v52 = vunpack.c.h.bf16 %v1427_v63 }
  0x5c   : > { %v320_v35 = vadd.f32 %v319_v26, %v318_v31  ;;  %v327_v26 = vsel %vm245_vm0, %v2348_v8, 0.0 }
  0x5e   : > { %v322_v56 = vadd.f32 %v321_v38, %v320_v35  ;;  %v329_v35 = vsel %vm245_vm0, %v2349_v29, 0.0  ;;  %v1438_v38 = vld [vmem:[%s1192_s11 + $0xb8] sm:$0xff]  }
  0x5f   : > { %v2355_v8 = vunpack.c.l.bf16 %v1438_v38  ;;  %v2357_v45 = vunpack.c.h.bf16 %v1438_v38 }
  0x60   : > { %v324_v50 = vadd.f32 %v323_v54, %v322_v56  ;;  %v331_v54 = vsel %vm245_vm0, %v2351_v57, 0.0 }
  0x62   : > { %v326_v31 = vadd.f32 %v325_v59, %v324_v50  ;;  %v333_v50 = vsel %vm245_vm0, %v2352_v17, 0.0  ;;  %v1449_v59 = vld [vmem:[%s1192_s11 + $0xc0] sm:$0xff]  }
  0x63   : > { %v2358_v57 = vunpack.c.l.bf16 %v1449_v59  ;;  %v2360_v40 = vunpack.c.h.bf16 %v1449_v59 }
  0x64   : > { %v328_v19 = vadd.f32 %v327_v26, %v326_v31  ;;  %v335_v26 = vsel %vm245_vm0, %v2354_v52, 0.0 }
  0x66   : > { %v330_v56 = vadd.f32 %v329_v35, %v328_v19  ;;  %v337_v19 = vsel %vm245_vm0, %v2355_v8, 0.0  ;;  %v1460_v35 = vld [vmem:[%s1192_s11 + $0xc8] sm:$0xff]  }
  0x67   : > { %v2362_v52 = vunpack.c.l.bf16 %v1460_v35  ;;  %v2363_v33 = vunpack.c.h.bf16 %v1460_v35 }
  0x68   : > { %v332_v29 = vadd.f32 %v331_v54, %v330_v56  ;;  %v339_v54 = vsel %vm245_vm0, %v2357_v45, 0.0 }
  0x6a   : > { %v334_v31 = vadd.f32 %v333_v50, %v332_v29  ;;  %v341_v29 = vsel %vm245_vm0, %v2358_v57, 0.0  ;;  %v1471_v50 = vld [vmem:[%s1192_s11 + $0xd0] sm:$0xff]  }
  0x6b   : > { %v2364_v45 = vunpack.c.l.bf16 %v1471_v50  ;;  %v2366_v28 = vunpack.c.h.bf16 %v1471_v50 }
  0x6c   : > { %v336_v17 = vadd.f32 %v335_v26, %v334_v31  ;;  %v343_v26 = vsel %vm245_vm0, %v2360_v40, 0.0 }
  0x6e   : > { %v338_v56 = vadd.f32 %v337_v19, %v336_v17  ;;  %v345_v17 = vsel %vm245_vm0, %v2362_v52, 0.0  ;;  %v1482_v19 = vld [vmem:[%s1192_s11 + $0xd8] sm:$0xff]  }
  0x6f   : > { %v2367_v40 = vunpack.c.l.bf16 %v1482_v19  ;;  %v2369_v52 = vunpack.c.h.bf16 %v1482_v19 }
  0x70   : > { %v340_v8 = vadd.f32 %v339_v54, %v338_v56  ;;  %v347_v54 = vsel %vm245_vm0, %v2363_v33, 0.0 }
  0x72   : > { %v342_v31 = vadd.f32 %v341_v29, %v340_v8  ;;  %v349_v8 = vsel %vm245_vm0, %v2364_v45, 0.0  ;;  %v1493_v29 = vld [vmem:[%s1192_s11 + $0xe0] sm:$0xff]  }
  0x73   : > { %v2370_v33 = vunpack.c.l.bf16 %v1493_v29  ;;  %v2372_v15 = vunpack.c.h.bf16 %v1493_v29 }
  0x74   : > { %v344_v57 = vadd.f32 %v343_v26, %v342_v31  ;;  %v351_v26 = vsel %vm245_vm0, %v2366_v28, 0.0 }
  0x76   : > { %v346_v56 = vadd.f32 %v345_v17, %v344_v57  ;;  %v353_v57 = vsel %vm245_vm0, %v2367_v40, 0.0  ;;  %v1504_v17 = vld [vmem:[%s1192_s11 + $0xe8] sm:$0xff]  }
  0x77   : > { %v2373_v28 = vunpack.c.l.bf16 %v1504_v17  ;;  %v2374_v40 = vunpack.c.h.bf16 %v1504_v17 }
  0x78   : > { %v348_v21 = vadd.f32 %v347_v54, %v346_v56  ;;  %v355_v54 = vsel %vm245_vm0, %v2369_v52, 0.0 }
  0x7a   : > { %v350_v31 = vadd.f32 %v349_v8, %v348_v21  ;;  %v357_v21 = vsel %vm245_vm0, %v2370_v33, 0.0 }
  0x7c   : > { %v352_v45 = vadd.f32 %v351_v26, %v350_v31  ;;  %v359_v26 = vsel %vm245_vm0, %v2372_v15, 0.0  ;;  %v1519_v31 = vld [vmem:[%s1192_s11 + $0xf0] sm:$0xff]  }
  0x7d   : > { %v2375_v52 = vunpack.c.l.bf16 %v1519_v31  ;;  %v2378_v62 = vunpack.c.h.bf16 %v1519_v31 }
  0x7e   : > { %v354_v56 = vadd.f32 %v353_v57, %v352_v45  ;;  %v361_v45 = vsel %vm245_vm0, %v2373_v28, 0.0 }
  0x7f   : > { %v365_v15 = vsel %vm245_vm0, %v2375_v52, 0.0 }
  0x80   : > { %v356_v8 = vadd.f32 %v355_v54, %v354_v56  ;;  %v363_v54 = vsel %vm245_vm0, %v2374_v40, 0.0 }
  0x82   : > { %v358_v9 = vadd.f32 %v357_v21, %v356_v8  ;;  %v1533_v21 = vld [vmem:[%s1192_s11 + $0xf8] sm:$0xff]  }
  0x83   : > { %v2382_v28 = vunpack.c.l.bf16 %v1533_v21  ;;  %v2383_v40 = vunpack.c.h.bf16 %v1533_v21 }
  0x84   : > { %v360_v57 = vadd.f32 %v359_v26, %v358_v9  ;;  %v367_v9 = vsel %vm245_vm0, %v2378_v62, 0.0 }
  0x86   : > { %v362_v56 = vadd.f32 %v361_v45, %v360_v57  ;;  %v369_v45 = vsel %vm245_vm0, %v2382_v28, 0.0 }
  0x88   : > { %v364_v33 = vadd.f32 %v363_v54, %v362_v56  ;;  %v371_v54 = vsel %vm245_vm0, %v2383_v40, 0.0 }
  0x8a   : > { %v366_v8 = vadd.f32 %v365_v15, %v364_v33  ;;  %v1165_v15 = vmov 512.0  }
  0x8b   : > { %1153 = vrcp.f32 %v1165_v15 }
  0x8c   : > { %v368_v26 = vadd.f32 %v367_v9, %v366_v8 }
  0x8e   : > { %v370_v57 = vadd.f32 %v369_v45, %v368_v26 }
  0x90   : > { %v372_v56 = vadd.f32 %v371_v54, %v370_v57 }
  0x91   : > { %v1154_v52 = vpop.eup %1153 }
  0x92   : > { %v373_v33 = vrot.slane %v372_v56, 4  ;;  %v380_v55 = vmul.f32 512.0, %v1154_v52  ;;  %vm384_vm1 = vweird.f32 %v1154_v52 }
  0x94   : > { %v374_v58 = vadd.f32 %v373_v33, %v372_v56  ;;  %v381_v8 = vsub.f32 1.0, %v380_v55 }
  0x96   : > { %v375_v62 = vrot.slane %v374_v58, 2  ;;  %v382_v51 = vmul.f32 %v1154_v52, %v381_v8 }
  0x98   : > { %v376_v9 = vadd.f32 %v375_v62, %v374_v58  ;;  %v383_v44 = vadd.f32 %v1154_v52, %v382_v51 }
  0x9a   : > { %v377_v48 = vrot.slane %v376_v9, 1  ;;  %v1546_v26 = vsel %vm384_vm1, %v1154_v52, %v383_v44 }
  0x9c   : > { %v378_v28 = vadd.f32 %v377_v48, %v376_v9 }
  0x9e   : > { %v1549_v45 = vmul.f32 %v1546_v26, %v378_v28 }
  0xa0   : > { %v1554_v57 = vsub.f32 %v987_v2, %v1549_v45  ;;  %v1559_v55 = vsub.f32 %v988_v3, %v1549_v45  ;;  %v1564_v51 = vsub.f32 %v991_v4, %v1549_v45  ;;  %v1569_v44 = vsub.f32 %v992_v6, %v1549_v45 }
  0xa1   : > { %v1574_v2 = vsub.f32 %v995_v7, %v1549_v45  ;;  %v1585_v1 = vsub.f32 %v996_v13, %v1549_v45  ;;  %v1592_v7 = vsub.f32 %v999_v16, %v1549_v45  ;;  %v1602_v13 = vsub.f32 %v1000_v20, %v1549_v45 }
  0xa2   : > { %v451_v0 = vmul.f32 %v1554_v57, %v1554_v57  ;;  %v452_v3 = vmul.f32 %v1559_v55, %v1559_v55  ;;  %v453_v4 = vmul.f32 %v1564_v51, %v1564_v51  ;;  %v454_v6 = vmul.f32 %v1569_v44, %v1569_v44 }
  0xa3   : > { %v455_v48 = vmul.f32 %v1574_v2, %v1574_v2  ;;  %v456_v52 = vmul.f32 %v1585_v1, %v1585_v1  ;;  %v1610_v56 = vsub.f32 %v1003_v23, %v1549_v45  ;;  %v457_v15 = vmul.f32 %v1592_v7, %v1592_v7 }
  0xa4   : > { %v515_v58 = vsel %vm245_vm0, %v451_v0, 0.0  ;;  %v516_v62 = vsel %vm245_vm0, %v452_v3, 0.0  ;;  %v518_v28 = vsel %vm245_vm0, %v453_v4, 0.0  ;;  %v520_v16 = vsel %vm245_vm0, %v454_v6, 0.0 }
  0xa5   : > { %v517_v5 = vadd.f32 %v516_v62, %v515_v58  ;;  %v522_v33 = vsel %vm245_vm0, %v455_v48, 0.0  ;;  %v1618_v11 = vsub.f32 %v1004_v27, %v1549_v45  ;;  %v458_v20 = vmul.f32 %v1602_v13, %v1602_v13 }
  0xa6   : > { %v524_v9 = vsel %vm245_vm0, %v456_v52, 0.0  ;;  %v1626_v23 = vsub.f32 %v1007_v30, %v1549_v45  ;;  %v459_v3 = vmul.f32 %v1610_v56, %v1610_v56  ;;  %v526_v4 = vsel %vm245_vm0, %v457_v15, 0.0 }
  0xa7   : > { %v519_v54 = vadd.f32 %v518_v28, %v517_v5  ;;  %v1634_v18 = vsub.f32 %v1008_v34, %v1549_v45  ;;  %v460_v27 = vmul.f32 %v1618_v11, %v1618_v11  ;;  %v528_v48 = vsel %vm245_vm0, %v458_v20, 0.0 }
  0xa8   : > { %v1642_v30 = vsub.f32 %v1011_v37, %v1549_v45  ;;  %v461_v62 = vmul.f32 %v1626_v23, %v1626_v23  ;;  %v530_v28 = vsel %vm245_vm0, %v459_v3, 0.0  ;;  %v1650_v25 = vsub.f32 %v1012_v41, %v1549_v45 }
  0xa9   : > { %v521_v8 = vadd.f32 %v520_v16, %v519_v54  ;;  %v462_v34 = vmul.f32 %v1634_v18, %v1634_v18  ;;  %v532_v52 = vsel %vm245_vm0, %v460_v27, 0.0  ;;  %v2406_v37 = vunpack.c.l.bf16 %v1262_v39 }
  0xaa   : > { %v463_v15 = vmul.f32 %v1642_v30, %v1642_v30  ;;  %v1666_v41 = vsub.f32 %v2407_v32, %v1549_v45  ;;  %v464_v20 = vmul.f32 %v1650_v25, %v1650_v25  ;;  %v2408_v3 = vunpack.c.l.bf16 %v1273_v46 }
  0xab   : > { %v523_v0 = vadd.f32 %v522_v33, %v521_v8  ;;  %v1658_v54 = vsub.f32 %v2406_v37, %v1549_v45  ;;  %v534_v33 = vsel %vm245_vm0, %v461_v62, 0.0  ;;  %v2409_v39 = vunpack.c.h.bf16 %v1273_v46 }
  0xac   : > { %v538_v27 = vsel %vm245_vm0, %v463_v15, 0.0  ;;  %v466_v62 = vmul.f32 %v1666_v41, %v1666_v41  ;;  %v2411_v46 = vunpack.c.h.bf16 %v1284_v53 }
  0xad   : > { %v525_v6 = vadd.f32 %v524_v9, %v523_v0  ;;  %v536_v9 = vsel %vm245_vm0, %v462_v34, 0.0  ;;  %v2410_v34 = vunpack.c.l.bf16 %v1284_v53  ;;  %v2413_v53 = vunpack.c.h.bf16 %v1295_v60 }
  0xae   : > { %v544_v32 = vsel %vm245_vm0, %v466_v62, 0.0 }
  0xaf   : > { %v527_v58 = vadd.f32 %v526_v4, %v525_v6  ;;  %v1674_v4 = vsub.f32 %v2408_v3, %v1549_v45  ;;  %v465_v6 = vmul.f32 %v1658_v54, %v1658_v54 }
  0xb1   : > { %v529_v5 = vadd.f32 %v528_v48, %v527_v58  ;;  %v1682_v58 = vsub.f32 %v2409_v39, %v1549_v45  ;;  %v542_v37 = vsel %vm245_vm0, %v465_v6, 0.0 }
  0xb3   : > { %v531_v16 = vadd.f32 %v530_v28, %v529_v5  ;;  %v540_v28 = vsel %vm245_vm0, %v464_v20, 0.0 }
  0xb5   : > { %v533_v8 = vadd.f32 %v532_v52, %v531_v16  ;;  %v1690_v52 = vsub.f32 %v2410_v34, %v1549_v45  ;;  %v467_v16 = vmul.f32 %v1674_v4, %v1674_v4 }
  0xb7   : > { %v535_v0 = vadd.f32 %v534_v33, %v533_v8  ;;  %v1698_v33 = vsub.f32 %v2411_v46, %v1549_v45  ;;  %v468_v8 = vmul.f32 %v1682_v58, %v1682_v58  ;;  %v469_v3 = vmul.f32 %v1690_v52, %v1690_v52 }
  0xb8   : > { %v546_v6 = vsel %vm245_vm0, %v467_v16, 0.0 }
  0xb9   : > { %v537_v48 = vadd.f32 %v536_v9, %v535_v0  ;;  %v2412_v9 = vunpack.c.l.bf16 %v1295_v60  ;;  %v470_v39 = vmul.f32 %v1698_v33, %v1698_v33  ;;  %v548_v62 = vsel %vm245_vm0, %v468_v8, 0.0 }
  0xba   : > { %v2415_v60 = vunpack.c.h.bf16 %v1306_v12 }
  0xbb   : > { %v539_v5 = vadd.f32 %v538_v27, %v537_v48  ;;  %v1706_v0 = vsub.f32 %v2412_v9, %v1549_v45  ;;  %v1714_v48 = vsub.f32 %v2413_v53, %v1549_v45  ;;  %v2416_v9 = vunpack.c.l.bf16 %v1317_v24 }
  0xbc   : > { %v1730_v46 = vsub.f32 %v2415_v60, %v1549_v45 }
  0xbd   : > { %v541_v15 = vadd.f32 %v540_v28, %v539_v5  ;;  %v2414_v5 = vunpack.c.l.bf16 %v1306_v12  ;;  %v471_v16 = vmul.f32 %v1706_v0, %v1706_v0  ;;  %v472_v8 = vmul.f32 %v1714_v48, %v1714_v48 }
  0xbe   : > { %v2417_v12 = vunpack.c.h.bf16 %v1317_v24  ;;  %v2419_v24 = vunpack.c.h.bf16 %v1328_v36 }
  0xbf   : > { %v543_v20 = vadd.f32 %v542_v37, %v541_v15  ;;  %v1722_v34 = vsub.f32 %v2414_v5, %v1549_v45  ;;  %v550_v37 = vsel %vm245_vm0, %v469_v3, 0.0 }
  0xc1   : > { %v545_v27 = vadd.f32 %v544_v32, %v543_v20  ;;  %v552_v32 = vsel %vm245_vm0, %v470_v39, 0.0  ;;  %v473_v3 = vmul.f32 %v1722_v34, %v1722_v34  ;;  %v474_v39 = vmul.f32 %v1730_v46, %v1730_v46 }
  0xc3   : > { %v547_v28 = vadd.f32 %v546_v6, %v545_v27  ;;  %v1738_v6 = vsub.f32 %v2416_v9, %v1549_v45  ;;  %v554_v27 = vsel %vm245_vm0, %v471_v16, 0.0  ;;  %v558_v60 = vsel %vm245_vm0, %v473_v3, 0.0 }
  0xc4   : > { %v560_v9 = vsel %vm245_vm0, %v474_v39, 0.0 }
  0xc5   : > { %v549_v15 = vadd.f32 %v548_v62, %v547_v28  ;;  %v1746_v62 = vsub.f32 %v2417_v12, %v1549_v45  ;;  %v556_v28 = vsel %vm245_vm0, %v472_v8, 0.0  ;;  %v475_v16 = vmul.f32 %v1738_v6, %v1738_v6 }
  0xc7   : > { %v551_v20 = vadd.f32 %v550_v37, %v549_v15  ;;  %v2418_v37 = vunpack.c.l.bf16 %v1328_v36  ;;  %v476_v8 = vmul.f32 %v1746_v62, %v1746_v62  ;;  %v2421_v36 = vunpack.c.h.bf16 %v1339_v49 }
  0xc9   : > { %v553_v53 = vadd.f32 %v552_v32, %v551_v20  ;;  %v1754_v15 = vsub.f32 %v2418_v37, %v1549_v45  ;;  %v1762_v20 = vsub.f32 %v2419_v24, %v1549_v45  ;;  %v1778_v37 = vsub.f32 %v2421_v36, %v1549_v45 }
  0xca   : > { %v2423_v24 = vunpack.c.l.bf16 %v1350_v61 }
  0xcb   : > { %v555_v5 = vadd.f32 %v554_v27, %v553_v53  ;;  %v2420_v53 = vunpack.c.l.bf16 %v1339_v49  ;;  %v477_v3 = vmul.f32 %v1754_v15, %v1754_v15  ;;  %2422 = vst [vmem:[#allocation2_spill] sm:$0xff] %v1778_v37  ;;  %v478_v39 = vmul.f32 %v1762_v20, %v1762_v20 }
  0xcc   : > { %v2424_v49 = vunpack.c.h.bf16 %v1350_v61  ;;  %v2427_v61 = vunpack.c.h.bf16 %v1361_v22 }
  0xcd   : > { %v557_v32 = vadd.f32 %v556_v28, %v555_v5  ;;  %v1770_v12 = vsub.f32 %v2420_v53, %v1549_v45  ;;  %v562_v28 = vsel %vm245_vm0, %v475_v16, 0.0  ;;  %v1786_v53 = vsub.f32 %v2423_v24, %v1549_v45 }
  0xce   : > { %v1794_v36 = vsub.f32 %v2424_v49, %v1549_v45  ;;  %v2426_v24 = vunpack.c.l.bf16 %v1361_v22  ;;  %v1810_v49 = vsub.f32 %v2427_v61, %v1549_v45  ;;  %v2430_v22 = vunpack.c.h.bf16 %v1372_v43 }
  0xcf   : > { %v559_v27 = vadd.f32 %v558_v60, %v557_v32  ;;  %v564_v60 = vsel %vm245_vm0, %v476_v8, 0.0  ;;  %v479_v16 = vmul.f32 %v1770_v12, %v1770_v12  ;;  %v480_v8 = vmul.f32 %v1778_v37, %v1778_v37 }
  0xd0   : > { %2425 = vst [vmem:[#allocation3_spill] sm:$0xff] %v1794_v36  ;;  %v1802_v40 = vsub.f32 %v2426_v24, %v1549_v45  ;;  %v2429_v24 = vunpack.c.l.bf16 %v1372_v43  ;;  %v1826_v61 = vsub.f32 %v2430_v22, %v1549_v45  ;;  %v2433_v43 = vunpack.c.h.bf16 %v1383_v10 }
  0xd1   : > { %v561_v5 = vadd.f32 %v560_v9, %v559_v27  ;;  %v566_v9 = vsel %vm245_vm0, %v477_v3, 0.0  ;;  %v481_v3 = vmul.f32 %v1786_v53, %v1786_v53  ;;  %2428 = vst [vmem:[#allocation4_spill] sm:$0xff] %v1810_v49 }
  0xd2   : > { %v1818_v37 = vsub.f32 %v2429_v24, %v1549_v45  ;;  %2431 = vst [vmem:[#allocation5_spill] sm:$0xff] %v1826_v61  ;;  %v2432_v24 = vunpack.c.l.bf16 %v1383_v10  ;;  %v1842_v22 = vsub.f32 %v2433_v43, %v1549_v45  ;;  %v2436_v10 = vunpack.c.h.bf16 %v1394_v47 }
  0xd3   : > { %v563_v32 = vadd.f32 %v562_v28, %v561_v5  ;;  %v568_v28 = vsel %vm245_vm0, %v478_v39, 0.0  ;;  %v482_v39 = vmul.f32 %v1794_v36, %v1794_v36 }
  0xd4   : > { %v1834_v36 = vsub.f32 %v2432_v24, %v1549_v45  ;;  %2434 = vst [vmem:[#allocation6_spill] sm:$0xff] %v1842_v22  ;;  %v2435_v24 = vunpack.c.l.bf16 %v1394_v47  ;;  %v1858_v43 = vsub.f32 %v2436_v10, %v1549_v45  ;;  %v2439_v47 = vunpack.c.h.bf16 %v1405_v14 }
  0xd5   : > { %v565_v27 = vadd.f32 %v564_v60, %v563_v32  ;;  %v570_v60 = vsel %vm245_vm0, %v479_v16, 0.0  ;;  %v483_v16 = vmul.f32 %v1802_v40, %v1802_v40 }
  0xd6   : > { %2437 = vst [vmem:[#allocation7_spill] sm:$0xff] %v1858_v43  ;;  %v1874_v10 = vsub.f32 %v2439_v47, %v1549_v45 }
  0xd7   : > { %v567_v5 = vadd.f32 %v566_v9, %v565_v27  ;;  %v572_v9 = vsel %vm245_vm0, %v480_v8, 0.0  ;;  %v484_v8 = vmul.f32 %v1810_v49, %v1810_v49  ;;  %v1850_v49 = vsub.f32 %v2435_v24, %v1549_v45 }
  0xd8   : > { %v2438_v24 = vunpack.c.l.bf16 %v1405_v14  ;;  %2440 = vst [vmem:[#allocation8_spill] sm:$0xff] %v1874_v10  ;;  %v2442_v14 = vunpack.c.h.bf16 %v1416_v42 }
  0xd9   : > { %v569_v32 = vadd.f32 %v568_v28, %v567_v5  ;;  %v574_v28 = vsel %vm245_vm0, %v481_v3, 0.0  ;;  %v485_v3 = vmul.f32 %v1818_v37, %v1818_v37 }
  0xda   : > { %v1890_v47 = vsub.f32 %v2442_v14, %v1549_v45 }
  0xdb   : > { %v571_v27 = vadd.f32 %v570_v60, %v569_v32  ;;  %v576_v60 = vsel %vm245_vm0, %v482_v39, 0.0  ;;  %v486_v39 = vmul.f32 %v1826_v61, %v1826_v61  ;;  %v1866_v61 = vsub.f32 %v2438_v24, %v1549_v45 }
  0xdc   : > { %v2441_v24 = vunpack.c.l.bf16 %v1416_v42  ;;  %2443 = vst [vmem:[#allocation9_spill] sm:$0xff] %v1890_v47  ;;  %v2445_v42 = vunpack.c.h.bf16 %v1427_v63 }
  0xdd   : > { %v573_v5 = vadd.f32 %v572_v9, %v571_v27  ;;  %v578_v9 = vsel %vm245_vm0, %v483_v16, 0.0  ;;  %v487_v16 = vmul.f32 %v1834_v36, %v1834_v36 }
  0xde   : > { %v1906_v14 = vsub.f32 %v2445_v42, %v1549_v45 }
  0xdf   : > { %v575_v32 = vadd.f32 %v574_v28, %v573_v5  ;;  %v580_v28 = vsel %vm245_vm0, %v484_v8, 0.0  ;;  %v488_v8 = vmul.f32 %v1842_v22, %v1842_v22  ;;  %v1882_v22 = vsub.f32 %v2441_v24, %v1549_v45 }
  0xe0   : > { %v2444_v24 = vunpack.c.l.bf16 %v1427_v63  ;;  %2446 = vst [vmem:[#allocation10_spill] sm:$0xff] %v1906_v14  ;;  %v2448_v63 = vunpack.c.h.bf16 %v1438_v38 }
  0xe1   : > { %v577_v27 = vadd.f32 %v576_v60, %v575_v32  ;;  %v582_v60 = vsel %vm245_vm0, %v485_v3, 0.0  ;;  %v489_v3 = vmul.f32 %v1850_v49, %v1850_v49 }
  0xe2   : > { %v1922_v42 = vsub.f32 %v2448_v63, %v1549_v45 }
  0xe3   : > { %v579_v5 = vadd.f32 %v578_v9, %v577_v27  ;;  %v584_v9 = vsel %vm245_vm0, %v486_v39, 0.0  ;;  %v490_v39 = vmul.f32 %v1858_v43, %v1858_v43  ;;  %v1898_v43 = vsub.f32 %v2444_v24, %v1549_v45 }
  0xe4   : > { %v2447_v24 = vunpack.c.l.bf16 %v1438_v38  ;;  %2449 = vst [vmem:[#allocation11_spill] sm:$0xff] %v1922_v42  ;;  %v2451_v38 = vunpack.c.h.bf16 %v1449_v59 }
  0xe5   : > { %v581_v32 = vadd.f32 %v580_v28, %v579_v5  ;;  %v586_v28 = vsel %vm245_vm0, %v487_v16, 0.0  ;;  %v491_v16 = vmul.f32 %v1866_v61, %v1866_v61 }
  0xe6   : > { %v1938_v63 = vsub.f32 %v2451_v38, %v1549_v45 }
  0xe7   : > { %v583_v27 = vadd.f32 %v582_v60, %v581_v32  ;;  %v588_v60 = vsel %vm245_vm0, %v488_v8, 0.0  ;;  %v492_v8 = vmul.f32 %v1874_v10, %v1874_v10  ;;  %v1914_v10 = vsub.f32 %v2447_v24, %v1549_v45 }
  0xe8   : > { %v2450_v24 = vunpack.c.l.bf16 %v1449_v59  ;;  %2452 = vst [vmem:[#allocation12_spill] sm:$0xff] %v1938_v63  ;;  %v2454_v59 = vunpack.c.h.bf16 %v1460_v35 }
  0xe9   : > { %v585_v5 = vadd.f32 %v584_v9, %v583_v27  ;;  %v590_v9 = vsel %vm245_vm0, %v489_v3, 0.0  ;;  %v493_v3 = vmul.f32 %v1882_v22, %v1882_v22 }
  0xea   : > { %v1954_v38 = vsub.f32 %v2454_v59, %v1549_v45 }
  0xeb   : > { %v587_v32 = vadd.f32 %v586_v28, %v585_v5  ;;  %v592_v28 = vsel %vm245_vm0, %v490_v39, 0.0  ;;  %v494_v39 = vmul.f32 %v1890_v47, %v1890_v47  ;;  %v1930_v47 = vsub.f32 %v2450_v24, %v1549_v45 }
  0xec   : > { %v2453_v24 = vunpack.c.l.bf16 %v1460_v35  ;;  %2455 = vst [vmem:[#allocation13_spill] sm:$0xff] %v1954_v38  ;;  %v2457_v35 = vunpack.c.h.bf16 %v1471_v50 }
  0xed   : > { %v589_v27 = vadd.f32 %v588_v60, %v587_v32  ;;  %v594_v60 = vsel %vm245_vm0, %v491_v16, 0.0  ;;  %v495_v16 = vmul.f32 %v1898_v43, %v1898_v43 }
  0xee   : > { %v1970_v59 = vsub.f32 %v2457_v35, %v1549_v45 }
  0xef   : > { %v591_v5 = vadd.f32 %v590_v9, %v589_v27  ;;  %v596_v9 = vsel %vm245_vm0, %v492_v8, 0.0  ;;  %v496_v8 = vmul.f32 %v1906_v14, %v1906_v14  ;;  %v1946_v14 = vsub.f32 %v2453_v24, %v1549_v45 }
  0xf0   : > { %v2456_v24 = vunpack.c.l.bf16 %v1471_v50  ;;  %2458 = vst [vmem:[#allocation14_spill] sm:$0xff] %v1970_v59  ;;  %v2460_v50 = vunpack.c.h.bf16 %v1482_v19 }
  0xf1   : > { %v593_v32 = vadd.f32 %v592_v28, %v591_v5  ;;  %v598_v28 = vsel %vm245_vm0, %v493_v3, 0.0  ;;  %v497_v3 = vmul.f32 %v1914_v10, %v1914_v10 }
  0xf2   : > { %v1986_v35 = vsub.f32 %v2460_v50, %v1549_v45 }
  0xf3   : > { %v595_v27 = vadd.f32 %v594_v60, %v593_v32  ;;  %v600_v60 = vsel %vm245_vm0, %v494_v39, 0.0  ;;  %v498_v39 = vmul.f32 %v1922_v42, %v1922_v42  ;;  %v1962_v42 = vsub.f32 %v2456_v24, %v1549_v45 }
  0xf4   : > { %v2459_v24 = vunpack.c.l.bf16 %v1482_v19  ;;  %2461 = vst [vmem:[#allocation15_spill] sm:$0xff] %v1986_v35  ;;  %v2464_v19 = vunpack.c.h.bf16 %v1493_v29 }
  0xf5   : > { %v597_v5 = vadd.f32 %v596_v9, %v595_v27  ;;  %v602_v9 = vsel %vm245_vm0, %v495_v16, 0.0  ;;  %v499_v16 = vmul.f32 %v1930_v47, %v1930_v47 }
  0xf6   : > { %v2002_v50 = vsub.f32 %v2464_v19, %v1549_v45 }
  0xf7   : > { %v599_v32 = vadd.f32 %v598_v28, %v597_v5  ;;  %v604_v28 = vsel %vm245_vm0, %v496_v8, 0.0  ;;  %v500_v8 = vmul.f32 %v1938_v63, %v1938_v63  ;;  %v1978_v63 = vsub.f32 %v2459_v24, %v1549_v45 }
  0xf8   : > { %v2462_v24 = vunpack.c.l.bf16 %v1493_v29  ;;  %2465 = vst [vmem:[#allocation17_spill] sm:$0xff] %v2002_v50  ;;  %v2468_v29 = vunpack.c.h.bf16 %v1504_v17 }
  0xf9   : > { %v601_v27 = vadd.f32 %v600_v60, %v599_v32  ;;  %v606_v60 = vsel %vm245_vm0, %v497_v3, 0.0  ;;  %v501_v3 = vmul.f32 %v1946_v14, %v1946_v14 }
  0xfa   : > { %v2018_v19 = vsub.f32 %v2468_v29, %v1549_v45 }
  0xfb   : > { %v603_v5 = vadd.f32 %v602_v9, %v601_v27  ;;  %v608_v9 = vsel %vm245_vm0, %v498_v39, 0.0  ;;  %v502_v39 = vmul.f32 %v1954_v38, %v1954_v38  ;;  %v1994_v38 = vsub.f32 %v2462_v24, %v1549_v45 }
  0xfc   : > { %v2466_v24 = vunpack.c.l.bf16 %v1504_v17  ;;  %2469 = vst [vmem:[#allocation19_spill] sm:$0xff] %v2018_v19  ;;  %v2472_v17 = vunpack.c.h.bf16 %v1519_v31 }
  0xfd   : > { %v605_v32 = vadd.f32 %v604_v28, %v603_v5  ;;  %v610_v28 = vsel %vm245_vm0, %v499_v16, 0.0  ;;  %v503_v16 = vmul.f32 %v1962_v42, %v1962_v42  ;;  %2463 = vst [vmem:[#allocation16_spill] sm:$0xff] %v1994_v38 }
  0xfe   : > { %v2034_v29 = vsub.f32 %v2472_v17, %v1549_v45 }
  0xff   : > { %v607_v27 = vadd.f32 %v606_v60, %v605_v32  ;;  %v612_v60 = vsel %vm245_vm0, %v500_v8, 0.0  ;;  %v504_v8 = vmul.f32 %v1970_v59, %v1970_v59  ;;  %v2010_v59 = vsub.f32 %v2466_v24, %v1549_v45 }
 0x100   : > { %v2470_v24 = vunpack.c.l.bf16 %v1519_v31  ;;  %2473 = vst [vmem:[#allocation21_spill] sm:$0xff] %v2034_v29  ;;  %v2476_v31 = vunpack.c.h.bf16 %v1533_v21 }
 0x101   : > { %v609_v5 = vadd.f32 %v608_v9, %v607_v27  ;;  %v614_v9 = vsel %vm245_vm0, %v501_v3, 0.0  ;;  %v505_v3 = vmul.f32 %v1978_v63, %v1978_v63  ;;  %2467 = vst [vmem:[#allocation18_spill] sm:$0xff] %v2010_v59 }
 0x102   : > { %v2050_v17 = vsub.f32 %v2476_v31, %v1549_v45 }
 0x103   : > { %v611_v32 = vadd.f32 %v610_v28, %v609_v5  ;;  %v616_v28 = vsel %vm245_vm0, %v502_v39, 0.0  ;;  %v506_v39 = vmul.f32 %v1986_v35, %v1986_v35  ;;  %v2026_v35 = vsub.f32 %v2470_v24, %v1549_v45 }
 0x104   : > { %v2474_v24 = vunpack.c.l.bf16 %v1533_v21  ;;  %2477 = vst [vmem:[#allocation23_spill] sm:$0xff] %v2050_v17 }
 0x105   : > { %v613_v27 = vadd.f32 %v612_v60, %v611_v32  ;;  %v618_v60 = vsel %vm245_vm0, %v503_v16, 0.0  ;;  %v507_v16 = vmul.f32 %v1994_v38, %v1994_v38  ;;  %2471 = vst [vmem:[#allocation20_spill] sm:$0xff] %v2026_v35 }
 0x107   : > { %v615_v5 = vadd.f32 %v614_v9, %v613_v27  ;;  %v620_v9 = vsel %vm245_vm0, %v504_v8, 0.0  ;;  %v508_v8 = vmul.f32 %v2002_v50, %v2002_v50  ;;  %v2042_v50 = vsub.f32 %v2474_v24, %v1549_v45 }
 0x109   : > { %v617_v32 = vadd.f32 %v616_v28, %v615_v5  ;;  %v622_v28 = vsel %vm245_vm0, %v505_v3, 0.0  ;;  %v509_v3 = vmul.f32 %v2010_v59, %v2010_v59  ;;  %2475 = vst [vmem:[#allocation22_spill] sm:$0xff] %v2042_v50  ;;  %v513_v24 = vmul.f32 %v2042_v50, %v2042_v50 }
 0x10b   : > { %v619_v27 = vadd.f32 %v618_v60, %v617_v32  ;;  %v624_v60 = vsel %vm245_vm0, %v506_v39, 0.0  ;;  %v510_v39 = vmul.f32 %v2018_v19, %v2018_v19  ;;  %v638_v45 = vsel %vm245_vm0, %v513_v24, 0.0 }
 0x10d   : > { %v621_v5 = vadd.f32 %v620_v9, %v619_v27  ;;  %v626_v9 = vsel %vm245_vm0, %v507_v16, 0.0  ;;  %v511_v16 = vmul.f32 %v2026_v35, %v2026_v35 }
 0x10f   : > { %v623_v32 = vadd.f32 %v622_v28, %v621_v5  ;;  %v628_v28 = vsel %vm245_vm0, %v508_v8, 0.0  ;;  %v512_v8 = vmul.f32 %v2034_v29, %v2034_v29  ;;  %v634_v19 = vsel %vm245_vm0, %v511_v16, 0.0 }
 0x111   : > { %v625_v27 = vadd.f32 %v624_v60, %v623_v32  ;;  %v630_v60 = vsel %vm245_vm0, %v509_v3, 0.0  ;;  %v514_v3 = vmul.f32 %v2050_v17, %v2050_v17 }
 0x113   : > { %v627_v5 = vadd.f32 %v626_v9, %v625_v27  ;;  %v632_v9 = vsel %vm245_vm0, %v510_v39, 0.0  ;;  %v640_v31 = vsel %vm245_vm0, %v514_v3, 0.0 }
 0x115   : > { %v629_v32 = vadd.f32 %v628_v28, %v627_v5  ;;  %v636_v28 = vsel %vm245_vm0, %v512_v8, 0.0 }
 0x117   : > { %v631_v27 = vadd.f32 %v630_v60, %v629_v32 }
 0x119   : > { %v633_v35 = vadd.f32 %v632_v9, %v631_v27 }
 0x11b   : > { %v635_v21 = vadd.f32 %v634_v19, %v633_v35 }
 0x11d   : > { %v637_v5 = vadd.f32 %v636_v28, %v635_v21 }
 0x11f   : > { %v639_v29 = vadd.f32 %v638_v45, %v637_v5 }
 0x121   : > { %v641_v39 = vadd.f32 %v640_v31, %v639_v29 }
 0x123   : > { %v642_v60 = vrot.slane %v641_v39, 4 }
 0x125   : > { %v643_v32 = vadd.f32 %v642_v60, %v641_v39 }
 0x127   : > { %v644_v59 = vrot.slane %v643_v32, 2 }
 0x129   : > { %v645_v50 = vadd.f32 %v644_v59, %v643_v32 }
 0x12b   : > { %v646_v38 = vrot.slane %v645_v50, 1 }
 0x12d   : > { %v647_v16 = vadd.f32 %v646_v38, %v645_v50 }
 0x12f   : > { %v648_v9 = vmul.f32 %v647_v16, %v1546_v26 }
 0x131   : > { %v649_v27 = vadd.f32 1e-05, %v648_v9 }
 0x133   : > { %1155 = vrsqrt.f32 %v649_v27  ;;  %vm656_vm2 = vweird.f32 %v649_v27 }
 0x139   : > { %v1156_v17 = vpop.eup %1155 }
 0x13a   : > { %v651_v8 = vmul.f32 %v1156_v17, %v649_v27  ;;  %vm657_vm3 = vweird.f32 %v1156_v17 }
 0x13b   : > { %vm658_vm4 = vmor %vm656_vm2, %vm657_vm3 }
 0x13c   : > { %v652_v35 = vmul.f32 %v1156_v17, %v651_v8 }
 0x13e   : > { %v653_v19 = vmul.f32 0.5, %v652_v35 }
 0x140   : > { %v654_v24 = vsub.f32 1.5, %v653_v19 }
 0x142   : > { %v655_v29 = vmul.f32 %v1156_v17, %v654_v24 }
 0x144   : > { %v2064_v3 = vsel %vm658_vm4, %v1156_v17, %v655_v29 }
 0x145   : > { %v660_v59 = vmul.f32 %v2064_v3, %v1554_v57  ;;  %v661_v26 = vmul.f32 %v2064_v3, %v1559_v55  ;;  %v662_v38 = vmul.f32 %v2064_v3, %v1564_v51  ;;  %v663_v50 = vmul.f32 %v2064_v3, %v1569_v44 }
 0x146   : > { %v664_v28 = vmul.f32 %v2064_v3, %v1574_v2  ;;  %v665_v21 = vmul.f32 %v2064_v3, %v1585_v1  ;;  %v666_v17 = vmul.f32 %v2064_v3, %v1592_v7  ;;  %v667_v57 = vmul.f32 %v2064_v3, %v1602_v13 }
 0x147   : > { %v724_v45 = vmax.f32 %v660_v59, 0.0  ;;  %v725_v55 = vmax.f32 %v661_v26, 0.0  ;;  %v726_v5 = vmax.f32 %v662_v38, 0.0  ;;  %v727_v31 = vmax.f32 %v663_v50, 0.0 }
 0x148   : > { %v728_v51 = vmax.f32 %v664_v28, 0.0  ;;  %v729_v44 = vmax.f32 %v665_v21, 0.0  ;;  %v730_v13 = vmax.f32 %v666_v17, 0.0  ;;  %v731_v32 = vmax.f32 %v667_v57, 0.0 }
 0x149   : > { %v788_v2 = vpack.c.bf16 %v724_v45, %v724_v45  ;;  %v789_v1 = vpack.c.bf16 %v725_v55, %v725_v55  ;;  %v790_v7 = vpack.c.bf16 %v726_v5, %v726_v5  ;;  %v791_v39 = vpack.c.bf16 %v727_v31, %v727_v31 }
 0x14a   : > { %v792_v60 = vpack.c.bf16 %v728_v51, %v728_v51  ;;  %v668_v16 = vmul.f32 %v2064_v3, %v1610_v56  ;;  %v669_v9 = vmul.f32 %v2064_v3, %v1618_v11  ;;  %v670_v27 = vmul.f32 %v2064_v3, %v1626_v23 }
 0x14b   : > { %853 = vst.msk [vmem:[%s2087_s14] sm:$0xf] %vm852_vm5, %v788_v2  ;;  %v671_v8 = vmul.f32 %v2064_v3, %v1634_v18  ;;  %v793_v35 = vpack.c.bf16 %v729_v44, %v729_v44  ;;  %v672_v19 = vmul.f32 %v2064_v3, %v1642_v30  ;;  %v673_v56 = vmul.f32 %v2064_v3, %v1650_v25 }
 0x14c   : > { %854 = vst.msk [vmem:[%s2087_s14 + $0x4] sm:$0xf] %vm852_vm5, %v789_v1  ;;  %v674_v11 = vmul.f32 %v2064_v3, %v1658_v54  ;;  %v794_v23 = vpack.c.bf16 %v730_v13, %v730_v13  ;;  %v732_v24 = vmax.f32 %v668_v16, 0.0  ;;  %v733_v29 = vmax.f32 %v669_v9, 0.0 }
 0x14d   : > { %855 = vst.msk [vmem:[%s2087_s14 + $0x8] sm:$0xf] %vm852_vm5, %v790_v7  ;;  %v734_v18 = vmax.f32 %v670_v27, 0.0  ;;  %v795_v59 = vpack.c.bf16 %v731_v32, %v731_v32  ;;  %v735_v26 = vmax.f32 %v671_v8, 0.0  ;;  %v675_v30 = vmul.f32 %v2064_v3, %v1666_v41 }
 0x14e   : > { %856 = vst.msk [vmem:[%s2087_s14 + $0xc] sm:$0xf] %vm852_vm5, %v791_v39  ;;  %v796_v25 = vpack.c.bf16 %v732_v24, %v732_v24  ;;  %v736_v54 = vmax.f32 %v672_v19, 0.0  ;;  %v797_v38 = vpack.c.bf16 %v733_v29, %v733_v29  ;;  %v737_v50 = vmax.f32 %v673_v56, 0.0 }
 0x14f   : > { %857 = vst.msk [vmem:[%s2087_s14 + $0x10] sm:$0xf] %vm852_vm5, %v792_v60  ;;  %v738_v28 = vmax.f32 %v674_v11, 0.0  ;;  %v798_v21 = vpack.c.bf16 %v734_v18, %v734_v18  ;;  %v676_v17 = vmul.f32 %v2064_v3, %v1674_v4  ;;  %v677_v41 = vmul.f32 %v2064_v3, %v1682_v58 }
 0x150   : > { %858 = vst.msk [vmem:[%s2087_s14 + $0x14] sm:$0xf] %vm852_vm5, %v793_v35  ;;  %v678_v57 = vmul.f32 %v2064_v3, %v1690_v52  ;;  %v799_v45 = vpack.c.bf16 %v735_v26, %v735_v26  ;;  %v739_v55 = vmax.f32 %v675_v30, 0.0  ;;  %v679_v5 = vmul.f32 %v2064_v3, %v1698_v33  ;;  %v2479_v26 = vld [vmem:[#allocation3_spill] sm:$0xff] }
 0x151   : > { %859 = vst.msk [vmem:[%s2087_s14 + $0x18] sm:$0xf] %vm852_vm5, %v794_v23  ;;  %v800_v31 = vpack.c.bf16 %v736_v54, %v736_v54  ;;  %v740_v51 = vmax.f32 %v676_v17, 0.0  ;;  %v680_v4 = vmul.f32 %v2064_v3, %v1706_v0  ;;  %v801_v58 = vpack.c.bf16 %v737_v50, %v737_v50  ;;  %v2478_v23 = vld [vmem:[#allocation2_spill] sm:$0xff] }
 0x152   : > { %860 = vst.msk [vmem:[%s2087_s14 + $0x1c] sm:$0xf] %vm852_vm5, %v795_v59  ;;  %v741_v52 = vmax.f32 %v677_v41, 0.0  ;;  %v681_v44 = vmul.f32 %v2064_v3, %v1714_v48  ;;  %v802_v33 = vpack.c.bf16 %v738_v28, %v738_v28  ;;  %v742_v2 = vmax.f32 %v678_v57, 0.0  ;;  %v2480_v28 = vld [vmem:[#allocation4_spill] sm:$0xff] }
 0x153   : > { %861 = vst.msk [vmem:[%s2087_s14 + $0x20] sm:$0xf] %vm852_vm5, %v796_v25  ;;  %v682_v1 = vmul.f32 %v2064_v3, %v1722_v34  ;;  %v803_v0 = vpack.c.bf16 %v739_v55, %v739_v55  ;;  %v743_v7 = vmax.f32 %v679_v5, 0.0  ;;  %v683_v13 = vmul.f32 %v2064_v3, %v1730_v46  ;;  %v2481_v55 = vld [vmem:[#allocation5_spill] sm:$0xff] }
 0x154   : > { %862 = vst.msk [vmem:[%s2087_s14 + $0x24] sm:$0xf] %vm852_vm5, %v797_v38  ;;  %v804_v48 = vpack.c.bf16 %v740_v51, %v740_v51  ;;  %v744_v39 = vmax.f32 %v680_v4, 0.0  ;;  %v684_v60 = vmul.f32 %v2064_v3, %v1738_v6  ;;  %v805_v34 = vpack.c.bf16 %v741_v52, %v741_v52  ;;  %v2482_v52 = vld [vmem:[#allocation6_spill] sm:$0xff] }
 0x155   : > { %863 = vst.msk [vmem:[%s2087_s14 + $0x28] sm:$0xf] %vm852_vm5, %v798_v21  ;;  %v745_v32 = vmax.f32 %v681_v44, 0.0  ;;  %v685_v16 = vmul.f32 %v2064_v3, %v1746_v62  ;;  %v806_v46 = vpack.c.bf16 %v742_v2, %v742_v2  ;;  %v746_v9 = vmax.f32 %v682_v1, 0.0 }
 0x156   : > { %864 = vst.msk [vmem:[%s2087_s14 + $0x2c] sm:$0xf] %vm852_vm5, %v799_v45  ;;  %v686_v27 = vmul.f32 %v2064_v3, %v1754_v15  ;;  %v807_v6 = vpack.c.bf16 %v743_v7, %v743_v7  ;;  %v747_v8 = vmax.f32 %v683_v13, 0.0  ;;  %v687_v35 = vmul.f32 %v2064_v3, %v1762_v20  ;;  %v2483_v7 = vld [vmem:[#allocation7_spill] sm:$0xff] }
 0x157   : > { %865 = vst.msk [vmem:[%s2087_s14 + $0x30] sm:$0xf] %vm852_vm5, %v800_v31  ;;  %v808_v62 = vpack.c.bf16 %v744_v39, %v744_v39  ;;  %v748_v19 = vmax.f32 %v684_v60, 0.0  ;;  %v688_v56 = vmul.f32 %v2064_v3, %v1770_v12  ;;  %v809_v15 = vpack.c.bf16 %v745_v32, %v745_v32  ;;  %v2484_v32 = vld [vmem:[#allocation8_spill] sm:$0xff] }
 0x158   : > { %866 = vst.msk [vmem:[%s2087_s14 + $0x34] sm:$0xf] %vm852_vm5, %v801_v58  ;;  %v749_v11 = vmax.f32 %v685_v16, 0.0  ;;  %v689_v24 = vmul.f32 %v2064_v3, %v2478_v23  ;;  %v810_v20 = vpack.c.bf16 %v746_v9, %v746_v9  ;;  %v750_v29 = vmax.f32 %v686_v27, 0.0 }
 0x159   : > { %867 = vst.msk [vmem:[%s2087_s14 + $0x38] sm:$0xf] %vm852_vm5, %v802_v33  ;;  %v690_v18 = vmul.f32 %v2064_v3, %v1786_v53  ;;  %v811_v12 = vpack.c.bf16 %v747_v8, %v747_v8  ;;  %v751_v59 = vmax.f32 %v687_v35, 0.0  ;;  %v691_v30 = vmul.f32 %v2064_v3, %v2479_v26  ;;  %v2485_v8 = vld [vmem:[#allocation9_spill] sm:$0xff] }
 0x15a   : > { %868 = vst.msk [vmem:[%s2087_s14 + $0x3c] sm:$0xf] %vm852_vm5, %v803_v0  ;;  %v812_v25 = vpack.c.bf16 %v748_v19, %v748_v19  ;;  %v752_v54 = vmax.f32 %v688_v56, 0.0  ;;  %v692_v38 = vmul.f32 %v2064_v3, %v1802_v40  ;;  %v813_v53 = vpack.c.bf16 %v749_v11, %v749_v11  ;;  %v2486_v11 = vld [vmem:[#allocation10_spill] sm:$0xff] }
 0x15b   : > { %869 = vst.msk [vmem:[%s2087_s14 + $0x40] sm:$0xf] %vm852_vm5, %v804_v48  ;;  %v753_v50 = vmax.f32 %v689_v24, 0.0  ;;  %v693_v21 = vmul.f32 %v2064_v3, %v2480_v28  ;;  %v814_v17 = vpack.c.bf16 %v750_v29, %v750_v29  ;;  %v754_v41 = vmax.f32 %v690_v18, 0.0 }
 0x15c   : > { %870 = vst.msk [vmem:[%s2087_s14 + $0x44] sm:$0xf] %vm852_vm5, %v805_v34  ;;  %v694_v57 = vmul.f32 %v2064_v3, %v1818_v37  ;;  %v815_v40 = vpack.c.bf16 %v751_v59, %v751_v59  ;;  %v755_v45 = vmax.f32 %v691_v30, 0.0  ;;  %v695_v5 = vmul.f32 %v2064_v3, %v2481_v55 }
 0x15d   : > { %871 = vst.msk [vmem:[%s2087_s14 + $0x48] sm:$0xf] %vm852_vm5, %v806_v46  ;;  %v816_v31 = vpack.c.bf16 %v752_v54, %v752_v54  ;;  %v756_v51 = vmax.f32 %v692_v38, 0.0  ;;  %v696_v4 = vmul.f32 %v2064_v3, %v1834_v36  ;;  %v817_v37 = vpack.c.bf16 %v753_v50, %v753_v50  ;;  %v2488_v38 = vld [vmem:[#allocation12_spill] sm:$0xff] }
 0x15e   : > { %872 = vst.msk [vmem:[%s2087_s14 + $0x4c] sm:$0xf] %vm852_vm5, %v807_v6  ;;  %v757_v58 = vmax.f32 %v693_v21, 0.0  ;;  %v697_v44 = vmul.f32 %v2064_v3, %v2482_v52  ;;  %v818_v33 = vpack.c.bf16 %v754_v41, %v754_v41  ;;  %v758_v2 = vmax.f32 %v694_v57, 0.0  ;;  %v2489_v41 = vld [vmem:[#allocation13_spill] sm:$0xff] }
 0x15f   : > { %873 = vst.msk [vmem:[%s2087_s14 + $0x50] sm:$0xf] %vm852_vm5, %v808_v62  ;;  %v698_v1 = vmul.f32 %v2064_v3, %v1850_v49  ;;  %v819_v36 = vpack.c.bf16 %v755_v45, %v755_v45  ;;  %v759_v0 = vmax.f32 %v695_v5, 0.0  ;;  %v699_v13 = vmul.f32 %v2064_v3, %v2483_v7 }
 0x160   : > { %874 = vst.msk [vmem:[%s2087_s14 + $0x54] sm:$0xf] %vm852_vm5, %v809_v15  ;;  %v820_v48 = vpack.c.bf16 %v756_v51, %v756_v51  ;;  %v760_v39 = vmax.f32 %v696_v4, 0.0  ;;  %v700_v60 = vmul.f32 %v2064_v3, %v1866_v61  ;;  %v821_v49 = vpack.c.bf16 %v757_v58, %v757_v58 }
 0x161   : > { %875 = vst.msk [vmem:[%s2087_s14 + $0x58] sm:$0xf] %vm852_vm5, %v810_v20  ;;  %v761_v34 = vmax.f32 %v697_v44, 0.0  ;;  %v701_v16 = vmul.f32 %v2064_v3, %v2484_v32  ;;  %v822_v46 = vpack.c.bf16 %v758_v2, %v758_v2  ;;  %v762_v9 = vmax.f32 %v698_v1, 0.0  ;;  %v2491_v44 = vld [vmem:[#allocation15_spill] sm:$0xff] }
 0x162   : > { %876 = vst.msk [vmem:[%s2087_s14 + $0x5c] sm:$0xf] %vm852_vm5, %v811_v12  ;;  %v702_v27 = vmul.f32 %v2064_v3, %v1882_v22  ;;  %v823_v61 = vpack.c.bf16 %v759_v0, %v759_v0  ;;  %v763_v6 = vmax.f32 %v699_v13, 0.0  ;;  %v703_v35 = vmul.f32 %v2064_v3, %v2485_v8  ;;  %v2487_v12 = vld [vmem:[#allocation11_spill] sm:$0xff]  ;;  %v2493_v13 = vld [vmem:[#allocation17_spill] sm:$0xff] }
 0x163   : > { %877 = vst.msk [vmem:[%s2087_s14 + $0x60] sm:$0xf] %vm852_vm5, %v812_v25  ;;  %v824_v62 = vpack.c.bf16 %v760_v39, %v760_v39  ;;  %v764_v19 = vmax.f32 %v700_v60, 0.0  ;;  %v704_v56 = vmul.f32 %v2064_v3, %v1898_v43  ;;  %v825_v22 = vpack.c.bf16 %v761_v34, %v761_v34 }
 0x164   : > { %878 = vst.msk [vmem:[%s2087_s14 + $0x64] sm:$0xf] %vm852_vm5, %v813_v53  ;;  %v765_v15 = vmax.f32 %v701_v16, 0.0  ;;  %v705_v23 = vmul.f32 %v2064_v3, %v2486_v11  ;;  %v826_v24 = vpack.c.bf16 %v762_v9, %v762_v9  ;;  %v766_v20 = vmax.f32 %v702_v27, 0.0  ;;  %v2498_v11 = vld [vmem:[#allocation22_spill] sm:$0xff] }
 0x165   : > { %879 = vst.msk [vmem:[%s2087_s14 + $0x68] sm:$0xf] %vm852_vm5, %v814_v17  ;;  %v706_v29 = vmul.f32 %v2064_v3, %v1914_v10  ;;  %v827_v43 = vpack.c.bf16 %v763_v6, %v763_v6  ;;  %v767_v18 = vmax.f32 %v703_v35, 0.0  ;;  %v707_v59 = vmul.f32 %v2064_v3, %v2487_v12  ;;  %v2496_v6 = vld [vmem:[#allocation20_spill] sm:$0xff] }
 0x166   : > { %880 = vst.msk [vmem:[%s2087_s14 + $0x6c] sm:$0xf] %vm852_vm5, %v815_v40  ;;  %v828_v26 = vpack.c.bf16 %v764_v19, %v764_v19  ;;  %v768_v30 = vmax.f32 %v704_v56, 0.0  ;;  %v708_v25 = vmul.f32 %v2064_v3, %v1930_v47  ;;  %v829_v10 = vpack.c.bf16 %v765_v15, %v765_v15  ;;  %v2497_v19 = vld [vmem:[#allocation21_spill] sm:$0xff] }
 0x167   : > { %881 = vst.msk [vmem:[%s2087_s14 + $0x70] sm:$0xf] %vm852_vm5, %v816_v31  ;;  %v769_v54 = vmax.f32 %v705_v23, 0.0  ;;  %v709_v53 = vmul.f32 %v2064_v3, %v2488_v38  ;;  %v830_v50 = vpack.c.bf16 %v766_v20, %v766_v20  ;;  %v770_v28 = vmax.f32 %v706_v29, 0.0  ;;  %v2490_v31 = vld [vmem:[#allocation14_spill] sm:$0xff]  ;;  %v2499_v29 = vld [vmem:[#allocation23_spill] sm:$0xff] }
 0x168   : > { %882 = vst.msk [vmem:[%s2087_s14 + $0x74] sm:$0xf] %vm852_vm5, %v817_v37  ;;  %v710_v21 = vmul.f32 %v2064_v3, %v1946_v14  ;;  %v831_v47 = vpack.c.bf16 %v767_v18, %v767_v18  ;;  %v771_v17 = vmax.f32 %v707_v59, 0.0  ;;  %v711_v57 = vmul.f32 %v2064_v3, %v2489_v41 }
 0x169   : > { %883 = vst.msk [vmem:[%s2087_s14 + $0x78] sm:$0xf] %vm852_vm5, %v818_v33  ;;  %v832_v40 = vpack.c.bf16 %v768_v30, %v768_v30  ;;  %v772_v45 = vmax.f32 %v708_v25, 0.0  ;;  %v712_v55 = vmul.f32 %v2064_v3, %v1962_v42  ;;  %v833_v14 = vpack.c.bf16 %v769_v54, %v769_v54 }
 0x16a   : > { %884 = vst.msk [vmem:[%s2087_s14 + $0x7c] sm:$0xf] %vm852_vm5, %v819_v36  ;;  %v773_v5 = vmax.f32 %v709_v53, 0.0  ;;  %v713_v51 = vmul.f32 %v2064_v3, %v2490_v31  ;;  %v834_v4 = vpack.c.bf16 %v770_v28, %v770_v28  ;;  %v774_v37 = vmax.f32 %v710_v21, 0.0  ;;  %v2492_v36 = vld [vmem:[#allocation16_spill] sm:$0xff] }
 0x16b   : > { %885 = vst.msk [vmem:[%s2087_s14 + $0x80] sm:$0xf] %vm852_vm5, %v820_v48  ;;  %v714_v58 = vmul.f32 %v2064_v3, %v1978_v63  ;;  %v835_v42 = vpack.c.bf16 %v771_v17, %v771_v17  ;;  %v775_v52 = vmax.f32 %v711_v57, 0.0  ;;  %v715_v33 = vmul.f32 %v2064_v3, %v2491_v44 }
 0x16c   : > { %886 = vst.msk [vmem:[%s2087_s14 + $0x84] sm:$0xf] %vm852_vm5, %v821_v49  ;;  %v836_v2 = vpack.c.bf16 %v772_v45, %v772_v45  ;;  %v776_v1 = vmax.f32 %v712_v55, 0.0  ;;  %v716_v0 = vmul.f32 %v2064_v3, %v2492_v36  ;;  %v837_v63 = vpack.c.bf16 %v773_v5, %v773_v5  ;;  %v2494_v49 = vld [vmem:[#allocation18_spill] sm:$0xff] }
 0x16d   : > { %887 = vst.msk [vmem:[%s2087_s14 + $0x88] sm:$0xf] %vm852_vm5, %v822_v46  ;;  %v777_v7 = vmax.f32 %v713_v51, 0.0  ;;  %v717_v48 = vmul.f32 %v2064_v3, %v2493_v13  ;;  %v838_v39 = vpack.c.bf16 %v774_v37, %v774_v37  ;;  %v778_v60 = vmax.f32 %v714_v58, 0.0  ;;  %v2495_v46 = vld [vmem:[#allocation19_spill] sm:$0xff] }
 0x16e   : > { %888 = vst.msk [vmem:[%s2087_s14 + $0x8c] sm:$0xf] %vm852_vm5, %v823_v61  ;;  %v718_v34 = vmul.f32 %v2064_v3, %v2494_v49  ;;  %v839_v32 = vpack.c.bf16 %v775_v52, %v775_v52  ;;  %v779_v16 = vmax.f32 %v715_v33, 0.0  ;;  %v719_v9 = vmul.f32 %v2064_v3, %v2495_v46 }
 0x16f   : > { %889 = vst.msk [vmem:[%s2087_s14 + $0x90] sm:$0xf] %vm852_vm5, %v824_v62  ;;  %v840_v27 = vpack.c.bf16 %v776_v1, %v776_v1  ;;  %v780_v61 = vmax.f32 %v716_v0, 0.0  ;;  %v720_v8 = vmul.f32 %v2064_v3, %v2496_v6  ;;  %v841_v35 = vpack.c.bf16 %v777_v7, %v777_v7 }
 0x170   : > { %890 = vst.msk [vmem:[%s2087_s14 + $0x94] sm:$0xf] %vm852_vm5, %v825_v22  ;;  %v781_v62 = vmax.f32 %v717_v48, 0.0  ;;  %v721_v56 = vmul.f32 %v2064_v3, %v2497_v19  ;;  %v842_v22 = vpack.c.bf16 %v778_v60, %v778_v60  ;;  %v782_v15 = vmax.f32 %v718_v34, 0.0 }
 0x171   : > { %891 = vst.msk [vmem:[%s2087_s14 + $0x98] sm:$0xf] %vm852_vm5, %v826_v24  ;;  %v722_v23 = vmul.f32 %v2064_v3, %v2498_v11  ;;  %v843_v24 = vpack.c.bf16 %v779_v16, %v779_v16  ;;  %v783_v20 = vmax.f32 %v719_v9, 0.0  ;;  %v844_v18 = vpack.c.bf16 %v780_v61, %v780_v61 }
 0x172   : > { %892 = vst.msk [vmem:[%s2087_s14 + $0x9c] sm:$0xf] %vm852_vm5, %v827_v43  ;;  %v723_v43 = vmul.f32 %v2064_v3, %v2499_v29  ;;  %v784_v12 = vmax.f32 %v720_v8, 0.0  ;;  %v845_v59 = vpack.c.bf16 %v781_v62, %v781_v62  ;;  %v846_v30 = vpack.c.bf16 %v782_v15, %v782_v15 }
 0x173   : > { %893 = vst.msk [vmem:[%s2087_s14 + $0xa0] sm:$0xf] %vm852_vm5, %v828_v26  ;;  %v785_v26 = vmax.f32 %v721_v56, 0.0  ;;  %v786_v25 = vmax.f32 %v722_v23, 0.0  ;;  %v847_v3 = vpack.c.bf16 %v783_v20, %v783_v20 }
 0x174   : > { %894 = vst.msk [vmem:[%s2087_s14 + $0xa4] sm:$0xf] %vm852_vm5, %v829_v10  ;;  %v787_v10 = vmax.f32 %v723_v43, 0.0  ;;  %v848_v54 = vpack.c.bf16 %v784_v12, %v784_v12 }
 0x175   : > { %895 = vst.msk [vmem:[%s2087_s14 + $0xa8] sm:$0xf] %vm852_vm5, %v830_v50  ;;  %v849_v38 = vpack.c.bf16 %v785_v26, %v785_v26  ;;  %v850_v53 = vpack.c.bf16 %v786_v25, %v786_v25 }
 0x176   : > { %896 = vst.msk [vmem:[%s2087_s14 + $0xac] sm:$0xf] %vm852_vm5, %v831_v47  ;;  %v851_v50 = vpack.c.bf16 %v787_v10, %v787_v10 }
 0x177   : > { %897 = vst.msk [vmem:[%s2087_s14 + $0xb0] sm:$0xf] %vm852_vm5, %v832_v40 }
 0x178   : > { %898 = vst.msk [vmem:[%s2087_s14 + $0xb4] sm:$0xf] %vm852_vm5, %v833_v14 }
 0x179   : > { %899 = vst.msk [vmem:[%s2087_s14 + $0xb8] sm:$0xf] %vm852_vm5, %v834_v4 }
 0x17a   : > { %900 = vst.msk [vmem:[%s2087_s14 + $0xbc] sm:$0xf] %vm852_vm5, %v835_v42 }
 0x17b   : > { %901 = vst.msk [vmem:[%s2087_s14 + $0xc0] sm:$0xf] %vm852_vm5, %v836_v2 }
 0x17c   : > { %902 = vst.msk [vmem:[%s2087_s14 + $0xc4] sm:$0xf] %vm852_vm5, %v837_v63 }
 0x17d   : > { %903 = vst.msk [vmem:[%s2087_s14 + $0xc8] sm:$0xf] %vm852_vm5, %v838_v39 }
 0x17e   : > { %904 = vst.msk [vmem:[%s2087_s14 + $0xcc] sm:$0xf] %vm852_vm5, %v839_v32 }
 0x17f   : > { %905 = vst.msk [vmem:[%s2087_s14 + $0xd0] sm:$0xf] %vm852_vm5, %v840_v27 }
 0x180   : > { %906 = vst.msk [vmem:[%s2087_s14 + $0xd4] sm:$0xf] %vm852_vm5, %v841_v35 }
 0x181   : > { %907 = vst.msk [vmem:[%s2087_s14 + $0xd8] sm:$0xf] %vm852_vm5, %v842_v22 }
 0x182   : > { %908 = vst.msk [vmem:[%s2087_s14 + $0xdc] sm:$0xf] %vm852_vm5, %v843_v24 }
 0x183   : > { %909 = vst.msk [vmem:[%s2087_s14 + $0xe0] sm:$0xf] %vm852_vm5, %v844_v18 }
 0x184   : > { %910 = vst.msk [vmem:[%s2087_s14 + $0xe4] sm:$0xf] %vm852_vm5, %v845_v59 }
 0x185   : > { %911 = vst.msk [vmem:[%s2087_s14 + $0xe8] sm:$0xf] %vm852_vm5, %v846_v30 }
 0x186   : > { %912 = vst.msk [vmem:[%s2087_s14 + $0xec] sm:$0xf] %vm852_vm5, %v847_v3 }
 0x187   : > { %913 = vst.msk [vmem:[%s2087_s14 + $0xf0] sm:$0xf] %vm852_vm5, %v848_v54 }
 0x188   : > { %914 = vst.msk [vmem:[%s2087_s14 + $0xf4] sm:$0xf] %vm852_vm5, %v849_v38 }
 0x189   : > { %915 = vst.msk [vmem:[%s2087_s14 + $0xf8] sm:$0xf] %vm852_vm5, %v850_v53 }
 0x18a   : > { %916 = vst.msk [vmem:[%s2087_s14 + $0xfc] sm:$0xf] %vm852_vm5, %v851_v50 }
 0x18b PF: > { %s11_s6 = sadd.s32 1, %s1163_s6  }
 0x18c   : > { %p8_p4 = scmp.ge.s32.totalorder %s11_s6, 4  }
 0x18e   :  { %10 = sbr.rel (!%p8_p4) target bundleno = 1 (0x1), region = 54 }

// kernel: resnet_forward.19
= control target key start
LH: loop header
LB: loop body
LE: loop exit
PB: predicated region body
PF: predicated region fallthrough
CT: control target
= control target key end

     0   :  { %s1322_s15 = smov 0   ;;  %s1692_s0 = inlined_call_operand.vmem [shape: bf16[1024,49], index: 0, kind: input, shape index: {}]   ;;  %s1693_s1 = inlined_call_operand.vmem [shape: bf16[49,8], index: 1, kind: input, shape index: {}]   ;;  %s1694_s2 = inlined_call_operand.vmem [shape: f32[1,8], index: 2, kind: input, shape index: {}]   ;;  %s1695_s3 = inlined_call_operand.vmem [shape: f32[1,8], index: 3, kind: input, shape index: {}]   ;;  %s1696_s4 = inlined_call_operand.vmem [shape: bf16[1024,8], index: 4, kind: output, shape index: {}]  }
   0x1 LB: > { %s1047_s16 = sadd.s32 4294967295, %s1294_s15   ;;  %p1051_p0 = scmp.ge.s32.totalorder %s1294_s15, 1  ;;  %s1294_s15 = sphi %s1322_s15, %s14_s15  }
   0x2   : > { %p163_p1 = scmp.lt.s32.totalorder %s1294_s15, 3 }
   0x4   : > { %p164_p2 = pnand %p1051_p0, %p163_p1 }
   0x5   : > { %s1052_s19 = sshll.u32 (!%p164_p2), %s1047_s16, 6 }
   0x6   : > { %167 = sbr.rel (%p164_p2) target bundleno = 294 (0x126), region = 36  ;;  %p190_p3 = scmp.lt.s32.totalorder (!%p164_p2), %s1052_s19, 127 }
   0xb   : > { %v272_v0 = vld [vmem:[%s1693_s1 + $0x18] sm:$0x1]  ;;  %vm551_vm0 = vcmask 1040384   ;;  %v1296_v2 = vmov 0   ;;  %v1264_v6 = vld [vmem:[%s1693_s1 + $0x10] sm:$0xff]  ;;  %s1698_s19 = smov (!%p190_p3, %s1052_s19), 127 }
   0xc   : > { %v446_v1 = vunpack.c.l.b16 %v272_v0  ;;  %v553_v3 = vsel %vm551_vm0, 65535, %v1296_v2  ;;  %v1263_v7 = vld [vmem:[%s1693_s1 + $0x8] sm:$0xff]  ;;  %s1053_s24 = sshll.u32 %s1698_s19, 2  ;;  %v1262_v8 = vld [vmem:[%s1693_s1] sm:$0xff]  ;;  %vm454_vm1 = vcmask 400384   ;;  %vm926_vm2 = vcmask 60416  }
   0xd   : > { %s1350_s29 = scalar_lea.vmem %s1692_s0, %s1053_s24  ;;  %v1419_v41 = vld [vmem:[%s1694_s2] ss:$0 sm:$0xff]  ;;  %s1435_s10 = scalar_lea.vmem %s1696_s4, %s1053_s24 }
   0xe   : > { %v450_v4 = vpack.c.b16 %v446_v1, %v446_v1  ;;  %v1230_v9 = vld [vmem:[%s1350_s29] sm:$0xff]  ;;  %v1231_v13 = vld [vmem:[%s1350_s29 + $0x8] sm:$0xff]  ;;  %v1232_v17 = vld [vmem:[%s1350_s29 + $0x10] sm:$0xff] }
   0xf   : > { %v1238_v10 = vld [vmem:[%s1350_s29 + $0x40] sm:$0xff]  ;;  %v1239_v14 = vld [vmem:[%s1350_s29 + $0x48] sm:$0xff]  ;;  %v1240_v18 = vld [vmem:[%s1350_s29 + $0x50] sm:$0xff] }
  0x10   : > { %v555_v5 = vand.u32 %v553_v3, %v450_v4  ;;  %v1246_v11 = vld [vmem:[%s1350_s29 + $0x80] sm:$0xff]  ;;  %v1247_v15 = vld [vmem:[%s1350_s29 + $0x88] sm:$0xff]  ;;  %v1248_v19 = vld [vmem:[%s1350_s29 + $0x90] sm:$0xff] }
  0x11   : > { %v1254_v12 = vld [vmem:[%s1350_s29 + $0xc0] sm:$0xff]  ;;  %v1255_v16 = vld [vmem:[%s1350_s29 + $0xc8] sm:$0xff]  ;;  %v1256_v20 = vld [vmem:[%s1350_s29 + $0xd0] sm:$0xff] }
  0x12   : > { %561 = vmatpush.bf16.msra.mxu0 %v555_v5  ;;  %1265 = vmatpush.bf16.msra.mxu1 %v555_v5  ;;  %v1233_v21 = vld [vmem:[%s1350_s29 + $0x18] sm:$0xff]  ;;  %v1234_v25 = vld [vmem:[%s1350_s29 + $0x20] sm:$0xff]  ;;  %v1235_v29 = vld [vmem:[%s1350_s29 + $0x28] sm:$0xff] }
  0x13   : > { %1266 = vmatpush.bf16.msra.mxu2 %v555_v5  ;;  %1267 = vmatpush.bf16.msra.mxu3 %v555_v5  ;;  %v1241_v22 = vld [vmem:[%s1350_s29 + $0x58] sm:$0xff]  ;;  %v1242_v26 = vld [vmem:[%s1350_s29 + $0x60] sm:$0xff]  ;;  %v1243_v30 = vld [vmem:[%s1350_s29 + $0x68] sm:$0xff] }
  0x14   : > { %v1249_v23 = vld [vmem:[%s1350_s29 + $0x98] sm:$0xff]  ;;  %v1250_v27 = vld [vmem:[%s1350_s29 + $0xa0] sm:$0xff]  ;;  %v1251_v31 = vld [vmem:[%s1350_s29 + $0xa8] sm:$0xff] }
  0x15   : > { %v1257_v24 = vld [vmem:[%s1350_s29 + $0xd8] sm:$0xff]  ;;  %v1258_v28 = vld [vmem:[%s1350_s29 + $0xe0] sm:$0xff]  ;;  %v1259_v32 = vld [vmem:[%s1350_s29 + $0xe8] sm:$0xff] }
  0x16   : > { %562 = vmatpush.bf16.msra.mxu0 %v1264_v6  ;;  %1268 = vmatpush.bf16.msra.mxu1 %v1264_v6  ;;  %v1236_v33 = vld [vmem:[%s1350_s29 + $0x30] sm:$0xff]  ;;  %v1237_v37 = vld [vmem:[%s1350_s29 + $0x38] sm:$0xff]  ;;  %v1424_v42 = vld [vmem:[%s1695_s3] ss:$0 sm:$0xff] }
  0x17   : > { %1269 = vmatpush.bf16.msra.mxu2 %v1264_v6  ;;  %1270 = vmatpush.bf16.msra.mxu3 %v1264_v6  ;;  %v1244_v34 = vld [vmem:[%s1350_s29 + $0x70] sm:$0xff]  ;;  %v1245_v38 = vld [vmem:[%s1350_s29 + $0x78] sm:$0xff] }
  0x18   : > { %v1252_v35 = vld [vmem:[%s1350_s29 + $0xb0] sm:$0xff]  ;;  %v1253_v39 = vld [vmem:[%s1350_s29 + $0xb8] sm:$0xff] }
  0x19   : > { %v1260_v36 = vld [vmem:[%s1350_s29 + $0xf0] sm:$0xff]  ;;  %v1261_v40 = vld [vmem:[%s1350_s29 + $0xf8] sm:$0xff] }
  0x1a   : > { %563 = vmatpush.bf16.msra.mxu0 %v1263_v7  ;;  %1271 = vmatpush.bf16.msra.mxu1 %v1263_v7 }
  0x1b   : > { %1272 = vmatpush.bf16.msra.mxu2 %v1263_v7  ;;  %1273 = vmatpush.bf16.msra.mxu3 %v1263_v7 }
  0x1e   : > { %564 = vmatpush.bf16.msra.mxu0 %v1262_v8  ;;  %1274 = vmatpush.bf16.msra.mxu1 %v1262_v8 }
  0x1f   : > { %1275 = vmatpush.bf16.msra.mxu2 %v1262_v8  ;;  %1276 = vmatpush.bf16.msra.mxu3 %v1262_v8 }
  0x21   : > { %1196 = vmatmul.msk.bf16.vlgmr.msra.gmra.mxu0 %vm454_vm1, %v1230_v9  ;;  %1204 = vmatmul.msk.bf16.vlgmr.msra.gmra.mxu1 %vm454_vm1, %v1238_v10 }
  0x22   : > { %1212 = vmatmul.msk.bf16.vlgmr.msra.gmra.mxu2 %vm454_vm1, %v1246_v11  ;;  %1220 = vmatmul.msk.bf16.vlgmr.msra.gmra.mxu3 %vm454_vm1, %v1254_v12 }
  0x31   : > { %1197 = vmatmul.msk.bf16.gmra.mxu0 %vm454_vm1, %v1231_v13  ;;  %1205 = vmatmul.msk.bf16.gmra.mxu1 %vm454_vm1, %v1239_v14 }
  0x32   : > { %1213 = vmatmul.msk.bf16.gmra.mxu2 %vm454_vm1, %v1247_v15  ;;  %1221 = vmatmul.msk.bf16.gmra.mxu3 %vm454_vm1, %v1255_v16 }
  0x41   : > { %1198 = vmatmul.msk.bf16.gmra.mxu0 %vm454_vm1, %v1232_v17  ;;  %1206 = vmatmul.msk.bf16.gmra.mxu1 %vm454_vm1, %v1240_v18 }
  0x42   : > { %1214 = vmatmul.msk.bf16.gmra.mxu2 %vm454_vm1, %v1248_v19  ;;  %1222 = vmatmul.msk.bf16.gmra.mxu3 %vm454_vm1, %v1256_v20 }
  0x51   : > { %1199 = vmatmul.msk.bf16.gmra.mxu0 %vm454_vm1, %v1233_v21  ;;  %1207 = vmatmul.msk.bf16.gmra.mxu1 %vm454_vm1, %v1241_v22 }
  0x52   : > { %1215 = vmatmul.msk.bf16.gmra.mxu2 %vm454_vm1, %v1249_v23  ;;  %1223 = vmatmul.msk.bf16.gmra.mxu3 %vm454_vm1, %v1257_v24 }
  0x61   : > { %1200 = vmatmul.msk.bf16.gmra.mxu0 %vm454_vm1, %v1234_v25  ;;  %1208 = vmatmul.msk.bf16.gmra.mxu1 %vm454_vm1, %v1242_v26 }
  0x62   : > { %1216 = vmatmul.msk.bf16.gmra.mxu2 %vm454_vm1, %v1250_v27  ;;  %1224 = vmatmul.msk.bf16.gmra.mxu3 %vm454_vm1, %v1258_v28 }
  0x71   : > { %1201 = vmatmul.msk.bf16.gmra.mxu0 %vm454_vm1, %v1235_v29  ;;  %1209 = vmatmul.msk.bf16.gmra.mxu1 %vm454_vm1, %v1243_v30 }
  0x72   : > { %1217 = vmatmul.msk.bf16.gmra.mxu2 %vm454_vm1, %v1251_v31  ;;  %1225 = vmatmul.msk.bf16.gmra.mxu3 %vm454_vm1, %v1259_v32 }
  0x81   : > { %1202 = vmatmul.msk.bf16.gmra.mxu0 %vm454_vm1, %v1236_v33  ;;  %1210 = vmatmul.msk.bf16.gmra.mxu1 %vm454_vm1, %v1244_v34 }
  0x82   : > { %1218 = vmatmul.msk.bf16.gmra.mxu2 %vm454_vm1, %v1252_v35  ;;  %1226 = vmatmul.msk.bf16.gmra.mxu3 %vm454_vm1, %v1260_v36 }
  0x91   : > { %1203 = vmatmul.msk.bf16.gmra.mxu0 %vm454_vm1, %v1237_v37  ;;  %1211 = vmatmul.msk.bf16.gmra.mxu1 %vm454_vm1, %v1245_v38 }
  0x92   : > { %1219 = vmatmul.msk.bf16.gmra.mxu2 %vm454_vm1, %v1253_v39  ;;  %1227 = vmatmul.msk.bf16.gmra.mxu3 %vm454_vm1, %v1261_v40 }
  0x9e   : > { %v566_v43 = vpop.f32.mrf.mxu0  ;;  %v606_v44 = vpop.f32.mrf.mxu1 }
  0x9f   : > { %v730_v45 = vmul.f32 %v1419_v41, %v566_v43  ;;  %v746_v46 = vmul.f32 %v1419_v41, %v606_v44 }
  0xa1   : > { %v798_v47 = vadd.f32 %v1424_v42, %v730_v45  ;;  %v814_v48 = vadd.f32 %v1424_v42, %v746_v46 }
  0xa3   : > { %v862_v49 = vpack.c.bf16 %v798_v47, %v798_v47  ;;  %v878_v50 = vpack.c.bf16 %v814_v48, %v814_v48 }
  0xa5   : > { %927 = vst.msk [vmem:[%s1435_s10] sm:$0xf] %vm926_vm2, %v862_v49  ;;  %v646_v51 = vpop.f32.mrf.mxu2  ;;  %v686_v52 = vpop.f32.mrf.mxu3 }
  0xa6   : > { %943 = vst.msk [vmem:[%s1435_s10 + $0x40] sm:$0xf] %vm926_vm2, %v878_v50  ;;  %v762_v53 = vmul.f32 %v1419_v41, %v646_v51  ;;  %v778_v54 = vmul.f32 %v1419_v41, %v686_v52  ;;  %v568_v55 = vpop.f32.mrf.mxu0  ;;  %v608_v56 = vpop.f32.mrf.mxu1 }
  0xa7   : > { %v731_v57 = vmul.f32 %v1419_v41, %v568_v55  ;;  %v747_v58 = vmul.f32 %v1419_v41, %v608_v56 }
  0xa8   : > { %v830_v59 = vadd.f32 %v1424_v42, %v762_v53  ;;  %v846_v60 = vadd.f32 %v1424_v42, %v778_v54 }
  0xa9   : > { %v799_v61 = vadd.f32 %v1424_v42, %v731_v57  ;;  %v815_v62 = vadd.f32 %v1424_v42, %v747_v58 }
  0xaa   : > { %v894_v63 = vpack.c.bf16 %v830_v59, %v830_v59  ;;  %v910_v0 = vpack.c.bf16 %v846_v60, %v846_v60 }
  0xab   : > { %v863_v1 = vpack.c.bf16 %v799_v61, %v799_v61  ;;  %v879_v2 = vpack.c.bf16 %v815_v62, %v815_v62 }
  0xac   : > { %959 = vst.msk [vmem:[%s1435_s10 + $0x80] sm:$0xf] %vm926_vm2, %v894_v63 }
  0xad   : > { %975 = vst.msk [vmem:[%s1435_s10 + $0xc0] sm:$0xf] %vm926_vm2, %v910_v0  ;;  %v648_v3 = vpop.f32.mrf.mxu2  ;;  %v688_v4 = vpop.f32.mrf.mxu3 }
  0xae   : > { %928 = vst.msk [vmem:[%s1435_s10 + $0x4] sm:$0xf] %vm926_vm2, %v863_v1  ;;  %v763_v5 = vmul.f32 %v1419_v41, %v648_v3  ;;  %v779_v6 = vmul.f32 %v1419_v41, %v688_v4  ;;  %v571_v7 = vpop.f32.mrf.mxu0  ;;  %v611_v8 = vpop.f32.mrf.mxu1 }
  0xaf   : > { %944 = vst.msk [vmem:[%s1435_s10 + $0x44] sm:$0xf] %vm926_vm2, %v879_v2  ;;  %v732_v9 = vmul.f32 %v1419_v41, %v571_v7  ;;  %v748_v10 = vmul.f32 %v1419_v41, %v611_v8 }
  0xb0   : > { %v831_v11 = vadd.f32 %v1424_v42, %v763_v5  ;;  %v847_v12 = vadd.f32 %v1424_v42, %v779_v6 }
  0xb1   : > { %v800_v13 = vadd.f32 %v1424_v42, %v732_v9  ;;  %v816_v14 = vadd.f32 %v1424_v42, %v748_v10 }
  0xb2   : > { %v895_v15 = vpack.c.bf16 %v831_v11, %v831_v11  ;;  %v911_v16 = vpack.c.bf16 %v847_v12, %v847_v12 }
  0xb3   : > { %v864_v17 = vpack.c.bf16 %v800_v13, %v800_v13  ;;  %v880_v18 = vpack.c.bf16 %v816_v14, %v816_v14 }
  0xb4   : > { %960 = vst.msk [vmem:[%s1435_s10 + $0x84] sm:$0xf] %vm926_vm2, %v895_v15 }
  0xb5   : > { %976 = vst.msk [vmem:[%s1435_s10 + $0xc4] sm:$0xf] %vm926_vm2, %v911_v16  ;;  %v651_v19 = vpop.f32.mrf.mxu2  ;;  %v691_v20 = vpop.f32.mrf.mxu3 }
  0xb6   : > { %929 = vst.msk [vmem:[%s1435_s10 + $0x8] sm:$0xf] %vm926_vm2, %v864_v17  ;;  %v764_v21 = vmul.f32 %v1419_v41, %v651_v19  ;;  %v780_v22 = vmul.f32 %v1419_v41, %v691_v20  ;;  %v573_v23 = vpop.f32.mrf.mxu0  ;;  %v613_v24 = vpop.f32.mrf.mxu1 }
  0xb7   : > { %945 = vst.msk [vmem:[%s1435_s10 + $0x48] sm:$0xf] %vm926_vm2, %v880_v18  ;;  %v733_v25 = vmul.f32 %v1419_v41, %v573_v23  ;;  %v749_v26 = vmul.f32 %v1419_v41, %v613_v24 }
  0xb8   : > { %v832_v27 = vadd.f32 %v1424_v42, %v764_v21  ;;  %v848_v28 = vadd.f32 %v1424_v42, %v780_v22 }
  0xb9   : > { %v801_v29 = vadd.f32 %v1424_v42, %v733_v25  ;;  %v817_v30 = vadd.f32 %v1424_v42, %v749_v26 }
  0xba   : > { %v896_v31 = vpack.c.bf16 %v832_v27, %v832_v27  ;;  %v912_v32 = vpack.c.bf16 %v848_v28, %v848_v28 }
  0xbb   : > { %v865_v33 = vpack.c.bf16 %v801_v29, %v801_v29  ;;  %v881_v34 = vpack.c.bf16 %v817_v30, %v817_v30 }
  0xbc   : > { %961 = vst.msk [vmem:[%s1435_s10 + $0x88] sm:$0xf] %vm926_vm2, %v896_v31 }
  0xbd   : > { %977 = vst.msk [vmem:[%s1435_s10 + $0xc8] sm:$0xf] %vm926_vm2, %v912_v32  ;;  %v653_v35 = vpop.f32.mrf.mxu2  ;;  %v693_v36 = vpop.f32.mrf.mxu3 }
  0xbe   : > { %930 = vst.msk [vmem:[%s1435_s10 + $0xc] sm:$0xf] %vm926_vm2, %v865_v33  ;;  %v765_v37 = vmul.f32 %v1419_v41, %v653_v35  ;;  %v781_v38 = vmul.f32 %v1419_v41, %v693_v36  ;;  %v576_v39 = vpop.f32.mrf.mxu0  ;;  %v616_v40 = vpop.f32.mrf.mxu1 }
  0xbf   : > { %946 = vst.msk [vmem:[%s1435_s10 + $0x4c] sm:$0xf] %vm926_vm2, %v881_v34  ;;  %v734_v43 = vmul.f32 %v1419_v41, %v576_v39  ;;  %v750_v44 = vmul.f32 %v1419_v41, %v616_v40 }
  0xc0   : > { %v833_v45 = vadd.f32 %v1424_v42, %v765_v37  ;;  %v849_v46 = vadd.f32 %v1424_v42, %v781_v38 }
  0xc1   : > { %v802_v47 = vadd.f32 %v1424_v42, %v734_v43  ;;  %v818_v48 = vadd.f32 %v1424_v42, %v750_v44 }
  0xc2   : > { %v897_v49 = vpack.c.bf16 %v833_v45, %v833_v45  ;;  %v913_v50 = vpack.c.bf16 %v849_v46, %v849_v46 }
  0xc3   : > { %v866_v51 = vpack.c.bf16 %v802_v47, %v802_v47  ;;  %v882_v52 = vpack.c.bf16 %v818_v48, %v818_v48 }
  0xc4   : > { %962 = vst.msk [vmem:[%s1435_s10 + $0x8c] sm:$0xf] %vm926_vm2, %v897_v49 }
  0xc5   : > { %978 = vst.msk [vmem:[%s1435_s10 + $0xcc] sm:$0xf] %vm926_vm2, %v913_v50  ;;  %v656_v53 = vpop.f32.mrf.mxu2  ;;  %v696_v54 = vpop.f32.mrf.mxu3 }
  0xc6   : > { %931 = vst.msk [vmem:[%s1435_s10 + $0x10] sm:$0xf] %vm926_vm2, %v866_v51  ;;  %v766_v55 = vmul.f32 %v1419_v41, %v656_v53  ;;  %v782_v56 = vmul.f32 %v1419_v41, %v696_v54  ;;  %v578_v57 = vpop.f32.mrf.mxu0  ;;  %v618_v58 = vpop.f32.mrf.mxu1 }
  0xc7   : > { %947 = vst.msk [vmem:[%s1435_s10 + $0x50] sm:$0xf] %vm926_vm2, %v882_v52  ;;  %v735_v59 = vmul.f32 %v1419_v41, %v578_v57  ;;  %v751_v60 = vmul.f32 %v1419_v41, %v618_v58 }
  0xc8   : > { %v834_v61 = vadd.f32 %v1424_v42, %v766_v55  ;;  %v850_v62 = vadd.f32 %v1424_v42, %v782_v56 }
  0xc9   : > { %v803_v63 = vadd.f32 %v1424_v42, %v735_v59  ;;  %v819_v0 = vadd.f32 %v1424_v42, %v751_v60 }
  0xca   : > { %v898_v1 = vpack.c.bf16 %v834_v61, %v834_v61  ;;  %v914_v2 = vpack.c.bf16 %v850_v62, %v850_v62 }
  0xcb   : > { %v867_v3 = vpack.c.bf16 %v803_v63, %v803_v63  ;;  %v883_v4 = vpack.c.bf16 %v819_v0, %v819_v0 }
  0xcc   : > { %963 = vst.msk [vmem:[%s1435_s10 + $0x90] sm:$0xf] %vm926_vm2, %v898_v1 }
  0xcd   : > { %979 = vst.msk [vmem:[%s1435_s10 + $0xd0] sm:$0xf] %vm926_vm2, %v914_v2  ;;  %v658_v5 = vpop.f32.mrf.mxu2  ;;  %v698_v6 = vpop.f32.mrf.mxu3 }
  0xce   : > { %932 = vst.msk [vmem:[%s1435_s10 + $0x14] sm:$0xf] %vm926_vm2, %v867_v3  ;;  %v767_v7 = vmul.f32 %v1419_v41, %v658_v5  ;;  %v783_v8 = vmul.f32 %v1419_v41, %v698_v6  ;;  %v581_v9 = vpop.f32.mrf.mxu0  ;;  %v621_v10 = vpop.f32.mrf.mxu1 }
  0xcf   : > { %948 = vst.msk [vmem:[%s1435_s10 + $0x54] sm:$0xf] %vm926_vm2, %v883_v4  ;;  %v736_v11 = vmul.f32 %v1419_v41, %v581_v9  ;;  %v752_v12 = vmul.f32 %v1419_v41, %v621_v10 }
  0xd0   : > { %v835_v13 = vadd.f32 %v1424_v42, %v767_v7  ;;  %v851_v14 = vadd.f32 %v1424_v42, %v783_v8 }
  0xd1   : > { %v804_v15 = vadd.f32 %v1424_v42, %v736_v11  ;;  %v820_v16 = vadd.f32 %v1424_v42, %v752_v12 }
  0xd2   : > { %v899_v17 = vpack.c.bf16 %v835_v13, %v835_v13  ;;  %v915_v18 = vpack.c.bf16 %v851_v14, %v851_v14 }
  0xd3   : > { %v868_v19 = vpack.c.bf16 %v804_v15, %v804_v15  ;;  %v884_v20 = vpack.c.bf16 %v820_v16, %v820_v16 }
  0xd4   : > { %964 = vst.msk [vmem:[%s1435_s10 + $0x94] sm:$0xf] %vm926_vm2, %v899_v17 }
  0xd5   : > { %980 = vst.msk [vmem:[%s1435_s10 + $0xd4] sm:$0xf] %vm926_vm2, %v915_v18  ;;  %v661_v21 = vpop.f32.mrf.mxu2  ;;  %v701_v22 = vpop.f32.mrf.mxu3 }
  0xd6   : > { %933 = vst.msk [vmem:[%s1435_s10 + $0x18] sm:$0xf] %vm926_vm2, %v868_v19  ;;  %v768_v23 = vmul.f32 %v1419_v41, %v661_v21  ;;  %v784_v24 = vmul.f32 %v1419_v41, %v701_v22  ;;  %v583_v25 = vpop.f32.mrf.mxu0  ;;  %v623_v26 = vpop.f32.mrf.mxu1 }
  0xd7   : > { %949 = vst.msk [vmem:[%s1435_s10 + $0x58] sm:$0xf] %vm926_vm2, %v884_v20  ;;  %v737_v27 = vmul.f32 %v1419_v41, %v583_v25  ;;  %v753_v28 = vmul.f32 %v1419_v41, %v623_v26 }
  0xd8   : > { %v836_v29 = vadd.f32 %v1424_v42, %v768_v23  ;;  %v852_v30 = vadd.f32 %v1424_v42, %v784_v24 }
  0xd9   : > { %v805_v31 = vadd.f32 %v1424_v42, %v737_v27  ;;  %v821_v32 = vadd.f32 %v1424_v42, %v753_v28 }
  0xda   : > { %v900_v33 = vpack.c.bf16 %v836_v29, %v836_v29  ;;  %v916_v34 = vpack.c.bf16 %v852_v30, %v852_v30 }
  0xdb   : > { %v869_v35 = vpack.c.bf16 %v805_v31, %v805_v31  ;;  %v885_v36 = vpack.c.bf16 %v821_v32, %v821_v32 }
  0xdc   : > { %965 = vst.msk [vmem:[%s1435_s10 + $0x98] sm:$0xf] %vm926_vm2, %v900_v33 }
  0xdd   : > { %981 = vst.msk [vmem:[%s1435_s10 + $0xd8] sm:$0xf] %vm926_vm2, %v916_v34  ;;  %v663_v37 = vpop.f32.mrf.mxu2  ;;  %v703_v38 = vpop.f32.mrf.mxu3 }
  0xde   : > { %934 = vst.msk [vmem:[%s1435_s10 + $0x1c] sm:$0xf] %vm926_vm2, %v869_v35  ;;  %v769_v39 = vmul.f32 %v1419_v41, %v663_v37  ;;  %v785_v40 = vmul.f32 %v1419_v41, %v703_v38  ;;  %v586_v43 = vpop.f32.mrf.mxu0  ;;  %v626_v44 = vpop.f32.mrf.mxu1 }
  0xdf   : > { %950 = vst.msk [vmem:[%s1435_s10 + $0x5c] sm:$0xf] %vm926_vm2, %v885_v36  ;;  %v738_v45 = vmul.f32 %v1419_v41, %v586_v43  ;;  %v754_v46 = vmul.f32 %v1419_v41, %v626_v44 }
  0xe0   : > { %v837_v47 = vadd.f32 %v1424_v42, %v769_v39  ;;  %v853_v48 = vadd.f32 %v1424_v42, %v785_v40 }
  0xe1   : > { %v806_v49 = vadd.f32 %v1424_v42, %v738_v45  ;;  %v822_v50 = vadd.f32 %v1424_v42, %v754_v46 }
  0xe2   : > { %v901_v51 = vpack.c.bf16 %v837_v47, %v837_v47  ;;  %v917_v52 = vpack.c.bf16 %v853_v48, %v853_v48 }
  0xe3   : > { %v870_v53 = vpack.c.bf16 %v806_v49, %v806_v49  ;;  %v886_v54 = vpack.c.bf16 %v822_v50, %v822_v50 }
  0xe4   : > { %966 = vst.msk [vmem:[%s1435_s10 + $0x9c] sm:$0xf] %vm926_vm2, %v901_v51 }
  0xe5   : > { %982 = vst.msk [vmem:[%s1435_s10 + $0xdc] sm:$0xf] %vm926_vm2, %v917_v52  ;;  %v666_v55 = vpop.f32.mrf.mxu2  ;;  %v706_v56 = vpop.f32.mrf.mxu3 }
  0xe6   : > { %935 = vst.msk [vmem:[%s1435_s10 + $0x20] sm:$0xf] %vm926_vm2, %v870_v53  ;;  %v770_v57 = vmul.f32 %v1419_v41, %v666_v55  ;;  %v786_v58 = vmul.f32 %v1419_v41, %v706_v56  ;;  %v588_v59 = vpop.f32.mrf.mxu0  ;;  %v628_v60 = vpop.f32.mrf.mxu1 }
  0xe7   : > { %951 = vst.msk [vmem:[%s1435_s10 + $0x60] sm:$0xf] %vm926_vm2, %v886_v54  ;;  %v739_v61 = vmul.f32 %v1419_v41, %v588_v59  ;;  %v755_v62 = vmul.f32 %v1419_v41, %v628_v60 }
  0xe8   : > { %v838_v63 = vadd.f32 %v1424_v42, %v770_v57  ;;  %v854_v0 = vadd.f32 %v1424_v42, %v786_v58 }
  0xe9   : > { %v807_v1 = vadd.f32 %v1424_v42, %v739_v61  ;;  %v823_v2 = vadd.f32 %v1424_v42, %v755_v62 }
  0xea   : > { %v902_v3 = vpack.c.bf16 %v838_v63, %v838_v63  ;;  %v918_v4 = vpack.c.bf16 %v854_v0, %v854_v0 }
  0xeb   : > { %v871_v5 = vpack.c.bf16 %v807_v1, %v807_v1  ;;  %v887_v6 = vpack.c.bf16 %v823_v2, %v823_v2 }
  0xec   : > { %967 = vst.msk [vmem:[%s1435_s10 + $0xa0] sm:$0xf] %vm926_vm2, %v902_v3 }
  0xed   : > { %983 = vst.msk [vmem:[%s1435_s10 + $0xe0] sm:$0xf] %vm926_vm2, %v918_v4  ;;  %v668_v7 = vpop.f32.mrf.mxu2  ;;  %v708_v8 = vpop.f32.mrf.mxu3 }
  0xee   : > { %936 = vst.msk [vmem:[%s1435_s10 + $0x24] sm:$0xf] %vm926_vm2, %v871_v5  ;;  %v771_v9 = vmul.f32 %v1419_v41, %v668_v7  ;;  %v787_v10 = vmul.f32 %v1419_v41, %v708_v8  ;;  %v591_v11 = vpop.f32.mrf.mxu0  ;;  %v631_v12 = vpop.f32.mrf.mxu1 }
  0xef   : > { %952 = vst.msk [vmem:[%s1435_s10 + $0x64] sm:$0xf] %vm926_vm2, %v887_v6  ;;  %v740_v13 = vmul.f32 %v1419_v41, %v591_v11  ;;  %v756_v14 = vmul.f32 %v1419_v41, %v631_v12 }
  0xf0   : > { %v839_v15 = vadd.f32 %v1424_v42, %v771_v9  ;;  %v855_v16 = vadd.f32 %v1424_v42, %v787_v10 }
  0xf1   : > { %v808_v17 = vadd.f32 %v1424_v42, %v740_v13  ;;  %v824_v18 = vadd.f32 %v1424_v42, %v756_v14 }
  0xf2   : > { %v903_v19 = vpack.c.bf16 %v839_v15, %v839_v15  ;;  %v919_v20 = vpack.c.bf16 %v855_v16, %v855_v16 }
  0xf3   : > { %v872_v21 = vpack.c.bf16 %v808_v17, %v808_v17  ;;  %v888_v22 = vpack.c.bf16 %v824_v18, %v824_v18 }
  0xf4   : > { %968 = vst.msk [vmem:[%s1435_s10 + $0xa4] sm:$0xf] %vm926_vm2, %v903_v19 }
  0xf5   : > { %984 = vst.msk [vmem:[%s1435_s10 + $0xe4] sm:$0xf] %vm926_vm2, %v919_v20  ;;  %v671_v23 = vpop.f32.mrf.mxu2  ;;  %v711_v24 = vpop.f32.mrf.mxu3 }
  0xf6   : > { %937 = vst.msk [vmem:[%s1435_s10 + $0x28] sm:$0xf] %vm926_vm2, %v872_v21  ;;  %v772_v25 = vmul.f32 %v1419_v41, %v671_v23  ;;  %v788_v26 = vmul.f32 %v1419_v41, %v711_v24  ;;  %v593_v27 = vpop.f32.mrf.mxu0  ;;  %v633_v28 = vpop.f32.mrf.mxu1 }
  0xf7   : > { %953 = vst.msk [vmem:[%s1435_s10 + $0x68] sm:$0xf] %vm926_vm2, %v888_v22  ;;  %v741_v29 = vmul.f32 %v1419_v41, %v593_v27  ;;  %v757_v30 = vmul.f32 %v1419_v41, %v633_v28 }
  0xf8   : > { %v840_v31 = vadd.f32 %v1424_v42, %v772_v25  ;;  %v856_v32 = vadd.f32 %v1424_v42, %v788_v26 }
  0xf9   : > { %v809_v33 = vadd.f32 %v1424_v42, %v741_v29  ;;  %v825_v34 = vadd.f32 %v1424_v42, %v757_v30 }
  0xfa   : > { %v904_v35 = vpack.c.bf16 %v840_v31, %v840_v31  ;;  %v920_v36 = vpack.c.bf16 %v856_v32, %v856_v32 }
  0xfb   : > { %v873_v37 = vpack.c.bf16 %v809_v33, %v809_v33  ;;  %v889_v38 = vpack.c.bf16 %v825_v34, %v825_v34 }
  0xfc   : > { %969 = vst.msk [vmem:[%s1435_s10 + $0xa8] sm:$0xf] %vm926_vm2, %v904_v35 }
  0xfd   : > { %985 = vst.msk [vmem:[%s1435_s10 + $0xe8] sm:$0xf] %vm926_vm2, %v920_v36  ;;  %v673_v39 = vpop.f32.mrf.mxu2  ;;  %v713_v40 = vpop.f32.mrf.mxu3 }
  0xfe   : > { %938 = vst.msk [vmem:[%s1435_s10 + $0x2c] sm:$0xf] %vm926_vm2, %v873_v37  ;;  %v773_v43 = vmul.f32 %v1419_v41, %v673_v39  ;;  %v789_v44 = vmul.f32 %v1419_v41, %v713_v40  ;;  %v596_v45 = vpop.f32.mrf.mxu0  ;;  %v636_v46 = vpop.f32.mrf.mxu1 }
  0xff   : > { %954 = vst.msk [vmem:[%s1435_s10 + $0x6c] sm:$0xf] %vm926_vm2, %v889_v38  ;;  %v742_v47 = vmul.f32 %v1419_v41, %v596_v45  ;;  %v758_v48 = vmul.f32 %v1419_v41, %v636_v46 }
 0x100   : > { %v841_v49 = vadd.f32 %v1424_v42, %v773_v43  ;;  %v857_v50 = vadd.f32 %v1424_v42, %v789_v44 }
 0x101   : > { %v810_v51 = vadd.f32 %v1424_v42, %v742_v47  ;;  %v826_v52 = vadd.f32 %v1424_v42, %v758_v48 }
 0x102   : > { %v905_v53 = vpack.c.bf16 %v841_v49, %v841_v49  ;;  %v921_v54 = vpack.c.bf16 %v857_v50, %v857_v50 }
 0x103   : > { %v874_v55 = vpack.c.bf16 %v810_v51, %v810_v51  ;;  %v890_v56 = vpack.c.bf16 %v826_v52, %v826_v52 }
 0x104   : > { %970 = vst.msk [vmem:[%s1435_s10 + $0xac] sm:$0xf] %vm926_vm2, %v905_v53 }
 0x105   : > { %986 = vst.msk [vmem:[%s1435_s10 + $0xec] sm:$0xf] %vm926_vm2, %v921_v54  ;;  %v676_v57 = vpop.f32.mrf.mxu2  ;;  %v716_v58 = vpop.f32.mrf.mxu3 }
 0x106   : > { %939 = vst.msk [vmem:[%s1435_s10 + $0x30] sm:$0xf] %vm926_vm2, %v874_v55  ;;  %v774_v59 = vmul.f32 %v1419_v41, %v676_v57  ;;  %v790_v60 = vmul.f32 %v1419_v41, %v716_v58  ;;  %v598_v61 = vpop.f32.mrf.mxu0  ;;  %v638_v62 = vpop.f32.mrf.mxu1 }
 0x107   : > { %955 = vst.msk [vmem:[%s1435_s10 + $0x70] sm:$0xf] %vm926_vm2, %v890_v56  ;;  %v743_v63 = vmul.f32 %v1419_v41, %v598_v61  ;;  %v759_v0 = vmul.f32 %v1419_v41, %v638_v62 }
 0x108   : > { %v842_v1 = vadd.f32 %v1424_v42, %v774_v59  ;;  %v858_v2 = vadd.f32 %v1424_v42, %v790_v60 }
 0x109   : > { %v811_v3 = vadd.f32 %v1424_v42, %v743_v63  ;;  %v827_v4 = vadd.f32 %v1424_v42, %v759_v0 }
 0x10a   : > { %v906_v5 = vpack.c.bf16 %v842_v1, %v842_v1  ;;  %v922_v6 = vpack.c.bf16 %v858_v2, %v858_v2 }
 0x10b   : > { %v875_v7 = vpack.c.bf16 %v811_v3, %v811_v3  ;;  %v891_v8 = vpack.c.bf16 %v827_v4, %v827_v4 }
 0x10c   : > { %971 = vst.msk [vmem:[%s1435_s10 + $0xb0] sm:$0xf] %vm926_vm2, %v906_v5 }
 0x10d   : > { %987 = vst.msk [vmem:[%s1435_s10 + $0xf0] sm:$0xf] %vm926_vm2, %v922_v6  ;;  %v678_v9 = vpop.f32.mrf.mxu2  ;;  %v718_v10 = vpop.f32.mrf.mxu3 }
 0x10e   : > { %940 = vst.msk [vmem:[%s1435_s10 + $0x34] sm:$0xf] %vm926_vm2, %v875_v7  ;;  %v775_v11 = vmul.f32 %v1419_v41, %v678_v9  ;;  %v791_v12 = vmul.f32 %v1419_v41, %v718_v10  ;;  %v601_v13 = vpop.f32.mrf.mxu0  ;;  %v641_v14 = vpop.f32.mrf.mxu1 }
 0x10f   : > { %956 = vst.msk [vmem:[%s1435_s10 + $0x74] sm:$0xf] %vm926_vm2, %v891_v8  ;;  %v744_v15 = vmul.f32 %v1419_v41, %v601_v13  ;;  %v760_v16 = vmul.f32 %v1419_v41, %v641_v14 }
 0x110   : > { %v843_v17 = vadd.f32 %v1424_v42, %v775_v11  ;;  %v859_v18 = vadd.f32 %v1424_v42, %v791_v12 }
 0x111   : > { %v812_v19 = vadd.f32 %v1424_v42, %v744_v15  ;;  %v828_v20 = vadd.f32 %v1424_v42, %v760_v16 }
 0x112   : > { %v907_v21 = vpack.c.bf16 %v843_v17, %v843_v17  ;;  %v923_v22 = vpack.c.bf16 %v859_v18, %v859_v18 }
 0x113   : > { %v876_v23 = vpack.c.bf16 %v812_v19, %v812_v19  ;;  %v892_v24 = vpack.c.bf16 %v828_v20, %v828_v20 }
 0x114   : > { %972 = vst.msk [vmem:[%s1435_s10 + $0xb4] sm:$0xf] %vm926_vm2, %v907_v21 }
 0x115   : > { %988 = vst.msk [vmem:[%s1435_s10 + $0xf4] sm:$0xf] %vm926_vm2, %v923_v22  ;;  %v681_v25 = vpop.f32.mrf.mxu2  ;;  %v721_v26 = vpop.f32.mrf.mxu3 }
 0x116   : > { %941 = vst.msk [vmem:[%s1435_s10 + $0x38] sm:$0xf] %vm926_vm2, %v876_v23  ;;  %v776_v27 = vmul.f32 %v1419_v41, %v681_v25  ;;  %v792_v28 = vmul.f32 %v1419_v41, %v721_v26  ;;  %v603_v29 = vpop.f32.mrf.mxu0  ;;  %v643_v30 = vpop.f32.mrf.mxu1 }
 0x117   : > { %957 = vst.msk [vmem:[%s1435_s10 + $0x78] sm:$0xf] %vm926_vm2, %v892_v24  ;;  %v745_v31 = vmul.f32 %v1419_v41, %v603_v29  ;;  %v761_v32 = vmul.f32 %v1419_v41, %v643_v30 }
 0x118   : > { %v844_v33 = vadd.f32 %v1424_v42, %v776_v27  ;;  %v860_v34 = vadd.f32 %v1424_v42, %v792_v28 }
 0x119   : > { %v813_v35 = vadd.f32 %v1424_v42, %v745_v31  ;;  %v829_v36 = vadd.f32 %v1424_v42, %v761_v32 }
 0x11a   : > { %v908_v37 = vpack.c.bf16 %v844_v33, %v844_v33  ;;  %v924_v38 = vpack.c.bf16 %v860_v34, %v860_v34 }
 0x11b   : > { %v877_v39 = vpack.c.bf16 %v813_v35, %v813_v35  ;;  %v893_v40 = vpack.c.bf16 %v829_v36, %v829_v36 }
 0x11c   : > { %973 = vst.msk [vmem:[%s1435_s10 + $0xb8] sm:$0xf] %vm926_vm2, %v908_v37 }
 0x11d   : > { %989 = vst.msk [vmem:[%s1435_s10 + $0xf8] sm:$0xf] %vm926_vm2, %v924_v38  ;;  %v683_v43 = vpop.f32.mrf.mxu2  ;;  %v723_v44 = vpop.f32.mrf.mxu3 }
 0x11e   : > { %942 = vst.msk [vmem:[%s1435_s10 + $0x3c] sm:$0xf] %vm926_vm2, %v877_v39  ;;  %v777_v45 = vmul.f32 %v1419_v41, %v683_v43  ;;  %v793_v46 = vmul.f32 %v1419_v41, %v723_v44 }
 0x11f   : > { %958 = vst.msk [vmem:[%s1435_s10 + $0x7c] sm:$0xf] %vm926_vm2, %v893_v40 }
 0x120   : > { %v845_v47 = vadd.f32 %v1424_v42, %v777_v45  ;;  %v861_v48 = vadd.f32 %v1424_v42, %v793_v46 }
 0x122   : > { %v909_v49 = vpack.c.bf16 %v845_v47, %v845_v47  ;;  %v925_v50 = vpack.c.bf16 %v861_v48, %v861_v48 }
 0x124   : > { %974 = vst.msk [vmem:[%s1435_s10 + $0xbc] sm:$0xf] %vm926_vm2, %v909_v49 }
 0x125   : > { %990 = vst.msk [vmem:[%s1435_s10 + $0xfc] sm:$0xf] %vm926_vm2, %v925_v50 }
 0x126 PF: > { %s14_s15 = sadd.s32 1, %s1294_s15  }
 0x127   : > { %p11_p4 = scmp.ge.s32.totalorder %s14_s15, 4  }
 0x129   :  { %13 = sbr.rel (!%p11_p4) target bundleno = 1 (0x1), region = 66 }

// kernel: resnet_forward.21
= control target key start
LH: loop header
LB: loop body
LE: loop exit
PB: predicated region body
PF: predicated region fallthrough
CT: control target
= control target key end

     0   :  { %s315_s0 = inlined_call_operand.vmem [shape: bf16[27,8,128], index: 0, kind: input, shape index: {}]   ;;  %s316_s1 = inlined_call_operand.vmem [shape: bf16[8,128], index: 1, kind: output, shape index: {}]  }
   0x1   :  { %v197_v0 = vld [vmem:[%s315_s0] sm:$0xff]   ;;  %v248_v1 = vld [vmem:[%s315_s0 + $0x8] sm:$0xff]   ;;  %v249_v5 = vld [vmem:[%s315_s0 + $0x10] sm:$0xff]  }
   0x2   :  { %v198_v2 = vunpack.c.l.bf16 %v197_v0  ;;  %v199_v3 = vunpack.c.h.bf16 %v197_v0  ;;  %v202_v4 = vunpack.c.l.bf16 %v248_v1  ;;  %v203_v7 = vunpack.c.h.bf16 %v248_v1  ;;  %v250_v10 = vld [vmem:[%s315_s0 + $0x18] sm:$0xff]   ;;  %v251_v15 = vld [vmem:[%s315_s0 + $0x20] sm:$0xff]   ;;  %v252_v20 = vld [vmem:[%s315_s0 + $0x28] sm:$0xff]  }
   0x3   :  { %v206_v9 = vunpack.c.l.bf16 %v249_v5  ;;  %v207_v12 = vunpack.c.h.bf16 %v249_v5  ;;  %v210_v14 = vunpack.c.l.bf16 %v250_v10  ;;  %v211_v17 = vunpack.c.h.bf16 %v250_v10  ;;  %v253_v25 = vld [vmem:[%s315_s0 + $0x30] sm:$0xff]   ;;  %v254_v30 = vld [vmem:[%s315_s0 + $0x38] sm:$0xff]   ;;  %v255_v35 = vld [vmem:[%s315_s0 + $0x40] sm:$0xff]  }
   0x4   :  { %v13_v6 = vmax.f32 %v198_v2, %v199_v3  ;;  %v214_v19 = vunpack.c.l.bf16 %v251_v15  ;;  %v215_v22 = vunpack.c.h.bf16 %v251_v15  ;;  %v218_v24 = vunpack.c.l.bf16 %v252_v20  ;;  %v256_v40 = vld [vmem:[%s315_s0 + $0x48] sm:$0xff]   ;;  %v257_v45 = vld [vmem:[%s315_s0 + $0x50] sm:$0xff]   ;;  %v258_v50 = vld [vmem:[%s315_s0 + $0x58] sm:$0xff]  }
   0x5   :  { %v219_v27 = vunpack.c.h.bf16 %v252_v20  ;;  %v222_v29 = vunpack.c.l.bf16 %v253_v25  ;;  %v223_v32 = vunpack.c.h.bf16 %v253_v25  ;;  %v226_v34 = vunpack.c.l.bf16 %v254_v30  ;;  %v259_v55 = vld [vmem:[%s315_s0 + $0x60] sm:$0xff]   ;;  %v195_v60 = vld [vmem:[%s315_s0 + $0x68] sm:$0xf] }
   0x6   :  { %v19_v8 = vmax.f32 %v13_v6, %v202_v4  ;;  %v227_v37 = vunpack.c.h.bf16 %v254_v30  ;;  %v230_v39 = vunpack.c.l.bf16 %v255_v35  ;;  %v231_v42 = vunpack.c.h.bf16 %v255_v35 }
   0x7   :  { %v234_v44 = vunpack.c.l.bf16 %v256_v40  ;;  %v235_v47 = vunpack.c.h.bf16 %v256_v40  ;;  %v238_v49 = vunpack.c.l.bf16 %v257_v45  ;;  %v239_v52 = vunpack.c.h.bf16 %v257_v45 }
   0x8   :  { %v25_v11 = vmax.f32 %v19_v8, %v203_v7  ;;  %v242_v54 = vunpack.c.l.bf16 %v258_v50  ;;  %v243_v57 = vunpack.c.h.bf16 %v258_v50  ;;  %v246_v59 = vunpack.c.l.bf16 %v259_v55 }
   0x9   :  { %v247_v62 = vunpack.c.h.bf16 %v259_v55  ;;  %v162_v0 = vunpack.c.l.bf16 %v195_v60 }
   0xa   :  { %v31_v13 = vmax.f32 %v25_v11, %v206_v9 }
   0xc   :  { %v37_v16 = vmax.f32 %v31_v13, %v207_v12 }
   0xe   :  { %v43_v18 = vmax.f32 %v37_v16, %v210_v14 }
  0x10   :  { %v49_v21 = vmax.f32 %v43_v18, %v211_v17 }
  0x12   :  { %v55_v23 = vmax.f32 %v49_v21, %v214_v19 }
  0x14   :  { %v61_v26 = vmax.f32 %v55_v23, %v215_v22 }
  0x16   :  { %v67_v28 = vmax.f32 %v61_v26, %v218_v24 }
  0x18   :  { %v73_v31 = vmax.f32 %v67_v28, %v219_v27 }
  0x1a   :  { %v79_v33 = vmax.f32 %v73_v31, %v222_v29 }
  0x1c   :  { %v85_v36 = vmax.f32 %v79_v33, %v223_v32 }
  0x1e   :  { %v91_v38 = vmax.f32 %v85_v36, %v226_v34 }
  0x20   :  { %v97_v41 = vmax.f32 %v91_v38, %v227_v37 }
  0x22   :  { %v103_v43 = vmax.f32 %v97_v41, %v230_v39 }
  0x24   :  { %v109_v46 = vmax.f32 %v103_v43, %v231_v42 }
  0x26   :  { %v115_v48 = vmax.f32 %v109_v46, %v234_v44 }
  0x28   :  { %v121_v51 = vmax.f32 %v115_v48, %v235_v47 }
  0x2a   :  { %v127_v53 = vmax.f32 %v121_v51, %v238_v49 }
  0x2c   :  { %v133_v56 = vmax.f32 %v127_v53, %v239_v52 }
  0x2e   :  { %v139_v58 = vmax.f32 %v133_v56, %v242_v54 }
  0x30   :  { %v145_v61 = vmax.f32 %v139_v58, %v243_v57 }
  0x32   :  { %v151_v63 = vmax.f32 %v145_v61, %v246_v59 }
  0x34   :  { %v157_v1 = vmax.f32 %v151_v63, %v247_v62 }
  0x36   :  { %v163_v2 = vmax.f32 %v157_v1, %v162_v0 }
  0x38   :  { %v164_v3 = vpack.c.bf16 %v163_v2, %v163_v2 }
  0x3a   :  { %165 = vst [vmem:[%s316_s1] sm:$0xf] %v164_v3 }

// kernel: resnet_forward.22
= control target key start
LH: loop header
LB: loop body
LE: loop exit
PB: predicated region body
PF: predicated region fallthrough
CT: control target
= control target key end

     0   :  { %vm239_vm0 = vcmask 1043456   ;;  %vm214_vm1 = vcmask 719872   ;;  %vm413_vm2 = vcmask 60416   ;;  %s886_s1 = inlined_call_operand.vmem [shape: bf16[216,8], index: 1, kind: input, shape index: {}]   ;;  %s887_s0 = inlined_call_operand.vmem [shape: bf16[128,216], index: 0, kind: input, shape index: {}]   ;;  %s888_s2 = inlined_call_operand.vmem [shape: f32[1,8], index: 2, kind: input, shape index: {}]   ;;  %s889_s3 = inlined_call_operand.vmem [shape: f32[1,8], index: 3, kind: input, shape index: {}]   ;;  %s890_s4 = inlined_call_operand.vmem [shape: bf16[128,8], index: 4, kind: output, shape index: {}]  }
   0x1   :  { %v581_v0 = vld [vmem:[%s886_s1 + $0x38] sm:$0xff]  ;;  %v60_v1 = vld [vmem:[%s886_s1 + $0x68] sm:$0xf]  ;;  %v580_v3 = vld [vmem:[%s886_s1 + $0x30] sm:$0xff] }
   0x2   :  { %v186_v2 = vunpack.c.l.b16 %v60_v1  ;;  %243 = vmatpush.bf16.msra.mxu0 %v581_v0  ;;  %587 = vmatpush.bf16.msra.mxu2 %v581_v0  ;;  %v586_v6 = vld [vmem:[%s886_s1 + $0x60] sm:$0xff]  ;;  %v579_v7 = vld [vmem:[%s886_s1 + $0x28] sm:$0xff]  ;;  %v585_v8 = vld [vmem:[%s886_s1 + $0x58] sm:$0xff] }
   0x3   :  { %v578_v9 = vld [vmem:[%s886_s1 + $0x20] sm:$0xff]  ;;  %v584_v10 = vld [vmem:[%s886_s1 + $0x50] sm:$0xff]  ;;  %v577_v11 = vld [vmem:[%s886_s1 + $0x18] sm:$0xff] }
   0x4   :  { %v200_v4 = vpack.c.b16 %v186_v2, %v186_v2  ;;  %v583_v12 = vld [vmem:[%s886_s1 + $0x48] sm:$0xff]  ;;  %v576_v13 = vld [vmem:[%s886_s1 + $0x10] sm:$0xff]  ;;  %v582_v14 = vld [vmem:[%s886_s1 + $0x40] sm:$0xff] }
   0x5   :  { %v575_v15 = vld [vmem:[%s886_s1 + $0x8] sm:$0xff]  ;;  %v558_v16 = vld [vmem:[%s887_s0 + $0x4] sm:$0xf]  ;;  %v568_v18 = vld [vmem:[%s887_s0 + $0x54] sm:$0xf] }
   0x6   :  { %v241_v5 = vsel %vm239_vm0, %v200_v4, 0  ;;  %244 = vmatpush.bf16.msra.mxu0 %v580_v3  ;;  %588 = vmatpush.bf16.msra.mxu2 %v580_v3  ;;  %v438_v17 = vld [vmem:[%s887_s0 + $0x8] sm:$0xf0]  ;;  %v478_v19 = vld [vmem:[%s887_s0 + $0x58] sm:$0xf0]  ;;  %v574_v21 = vld [vmem:[%s886_s1] sm:$0xff] }
   0x7   :  { %294 = vmatpush.bf16.msra.mxu1 %v241_v5  ;;  %595 = vmatpush.bf16.msra.mxu3 %v241_v5  ;;  %v441_v20 = vor.u32 %v558_v16, %v438_v17  ;;  %v436_v22 = vld [vmem:[%s887_s0] sm:$0xf]  ;;  %v559_v23 = vld [vmem:[%s887_s0 + $0x4] sm:$0xf0]  ;;  %v481_v25 = vor.u32 %v568_v18, %v478_v19  ;;  %v560_v29 = vld [vmem:[%s887_s0 + $0x14] sm:$0xf] }
   0x8   :  { %v468_v24 = vld [vmem:[%s887_s0 + $0x40] sm:$0xf]  ;;  %v567_v26 = vld [vmem:[%s887_s0 + $0x44] sm:$0xf0]  ;;  %v437_v27 = vor.u32 %v559_v23, %v436_v22  ;;  %v446_v30 = vld [vmem:[%s887_s0 + $0x18] sm:$0xf0] }
   0x9   :  { %v469_v28 = vor.u32 %v567_v26, %v468_v24  ;;  %v570_v31 = vld [vmem:[%s887_s0 + $0x64] sm:$0xf]  ;;  %v486_v32 = vld [vmem:[%s887_s0 + $0x68] sm:$0xf0]  ;;  %v449_v33 = vor.u32 %v560_v29, %v446_v30  ;;  %v444_v34 = vld [vmem:[%s887_s0 + $0x10] sm:$0xf] }
   0xa   :  { %245 = vmatpush.bf16.msra.mxu0 %v579_v7  ;;  %589 = vmatpush.bf16.msra.mxu2 %v579_v7  ;;  %v561_v35 = vld [vmem:[%s887_s0 + $0x14] sm:$0xf0]  ;;  %v489_v36 = vor.u32 %v570_v31, %v486_v32  ;;  %v476_v37 = vld [vmem:[%s887_s0 + $0x50] sm:$0xf]  ;;  %v562_v41 = vld [vmem:[%s887_s0 + $0x24] sm:$0xf] }
   0xb   :  { %295 = vmatpush.bf16.msra.mxu1 %v586_v6  ;;  %596 = vmatpush.bf16.msra.mxu3 %v586_v6  ;;  %v569_v38 = vld [vmem:[%s887_s0 + $0x54] sm:$0xf0]  ;;  %v445_v39 = vor.u32 %v561_v35, %v444_v34  ;;  %v454_v42 = vld [vmem:[%s887_s0 + $0x28] sm:$0xf0]  ;;  %v572_v43 = vld [vmem:[%s887_s0 + $0x74] sm:$0xf] }
   0xc   :  { %v477_v40 = vor.u32 %v569_v38, %v476_v37  ;;  %v494_v44 = vld [vmem:[%s887_s0 + $0x78] sm:$0xf0]  ;;  %v457_v45 = vor.u32 %v562_v41, %v454_v42  ;;  %v452_v46 = vld [vmem:[%s887_s0 + $0x20] sm:$0xf]  ;;  %v563_v47 = vld [vmem:[%s887_s0 + $0x24] sm:$0xf0] }
   0xd   :  { %v497_v48 = vor.u32 %v572_v43, %v494_v44  ;;  %v484_v49 = vld [vmem:[%s887_s0 + $0x60] sm:$0xf]  ;;  %v571_v50 = vld [vmem:[%s887_s0 + $0x64] sm:$0xf0]  ;;  %v453_v51 = vor.u32 %v563_v47, %v452_v46  ;;  %v564_v53 = vld [vmem:[%s887_s0 + $0x34] sm:$0xf] }
   0xe   :  { %246 = vmatpush.bf16.msra.mxu0 %v578_v9  ;;  %590 = vmatpush.bf16.msra.mxu2 %v578_v9  ;;  %v485_v52 = vor.u32 %v571_v50, %v484_v49  ;;  %v462_v54 = vld [vmem:[%s887_s0 + $0x38] sm:$0xf0]  ;;  %v460_v56 = vld [vmem:[%s887_s0 + $0x30] sm:$0xf]  ;;  %v565_v57 = vld [vmem:[%s887_s0 + $0x34] sm:$0xf0] }
   0xf   :  { %296 = vmatpush.bf16.msra.mxu1 %v585_v8  ;;  %597 = vmatpush.bf16.msra.mxu3 %v585_v8  ;;  %v465_v55 = vor.u32 %v564_v53, %v462_v54  ;;  %v492_v58 = vld [vmem:[%s887_s0 + $0x70] sm:$0xf]  ;;  %v573_v59 = vld [vmem:[%s887_s0 + $0x74] sm:$0xf0]  ;;  %v461_v60 = vor.u32 %v565_v57, %v460_v56  ;;  %v566_v62 = vld [vmem:[%s887_s0 + $0x44] sm:$0xf] }
  0x10   :  { %v493_v61 = vor.u32 %v573_v59, %v492_v58  ;;  %v470_v63 = vld [vmem:[%s887_s0 + $0x48] sm:$0xf0]  ;;  %v777_v2 = vld [vmem:[%s888_s2] ss:$0 sm:$0xff] }
  0x11   :  { %v473_v0 = vor.u32 %v566_v62, %v470_v63  ;;  %v782_v5 = vld [vmem:[%s889_s3] ss:$0 sm:$0xff] }
  0x12   :  { %247 = vmatpush.bf16.msra.mxu0 %v577_v11  ;;  %591 = vmatpush.bf16.msra.mxu2 %v577_v11 }
  0x13   :  { %297 = vmatpush.bf16.msra.mxu1 %v584_v10  ;;  %598 = vmatpush.bf16.msra.mxu3 %v584_v10 }
  0x16   :  { %248 = vmatpush.bf16.msra.mxu0 %v576_v13  ;;  %592 = vmatpush.bf16.msra.mxu2 %v576_v13 }
  0x17   :  { %298 = vmatpush.bf16.msra.mxu1 %v583_v12  ;;  %599 = vmatpush.bf16.msra.mxu3 %v583_v12 }
  0x1a   :  { %249 = vmatpush.bf16.msra.mxu0 %v575_v15  ;;  %593 = vmatpush.bf16.msra.mxu2 %v575_v15 }
  0x1b   :  { %299 = vmatpush.bf16.msra.mxu1 %v582_v14  ;;  %600 = vmatpush.bf16.msra.mxu3 %v582_v14 }
  0x1e   :  { %550 = vmatmul.msk.bf16.vlgmr.msra.gmra.mxu1 %vm214_vm1, %v441_v20  ;;  %250 = vmatpush.bf16.msra.mxu0 %v574_v21 }
  0x1f   :  { %555 = vmatmul.msk.bf16.vlgmr.msra.gmra.mxu3 %vm214_vm1, %v481_v25  ;;  %594 = vmatpush.bf16.msra.mxu2 %v574_v21 }
  0x21   :  { %251 = vmatmul.bf16.vlgmr.msra.gmra.mxu0 %v437_v27 }
  0x22   :  { %271 = vmatmul.bf16.vlgmr.msra.gmra.mxu2 %v469_v28 }
  0x2e   :  { %551 = vmatmul.msk.bf16.gmra.mxu1 %vm214_vm1, %v449_v33 }
  0x2f   :  { %556 = vmatmul.msk.bf16.gmra.mxu3 %vm214_vm1, %v489_v36 }
  0x31   :  { %256 = vmatmul.bf16.gmra.mxu0 %v445_v39 }
  0x32   :  { %276 = vmatmul.bf16.gmra.mxu2 %v477_v40 }
  0x3e   :  { %552 = vmatmul.msk.bf16.gmra.mxu1 %vm214_vm1, %v457_v45 }
  0x3f   :  { %557 = vmatmul.msk.bf16.gmra.mxu3 %vm214_vm1, %v497_v48 }
  0x41   :  { %261 = vmatmul.bf16.gmra.mxu0 %v453_v51 }
  0x42   :  { %281 = vmatmul.bf16.gmra.mxu2 %v485_v52 }
  0x4e   :  { %553 = vmatmul.msk.bf16.gmra.mxu1 %vm214_vm1, %v465_v55 }
  0x51   :  { %266 = vmatmul.bf16.gmra.mxu0 %v461_v60 }
  0x52   :  { %286 = vmatmul.bf16.gmra.mxu2 %v493_v61 }
  0x5e   :  { %554 = vmatmul.msk.bf16.gmra.mxu1 %vm214_vm1, %v473_v0 }
  0x9b   :  { %v301_v1 = vpop.f32.mrf.mxu1 }
  0x9e   :  { %v252_v3 = vpop.f32.mrf.mxu0 }
  0x9f   :  { %v302_v4 = vadd.f32 %v301_v1, %v252_v3 }
  0xa1   :  { %v345_v6 = vmul.f32 %v777_v2, %v302_v4 }
  0xa2   :  { %v326_v17 = vpop.f32.mrf.mxu3 }
  0xa3   :  { %v303_v7 = vpop.f32.mrf.mxu1  ;;  %v365_v8 = vadd.f32 %v782_v5, %v345_v6 }
  0xa5   :  { %v381_v9 = vmax.f32 %v365_v8, 0.0  ;;  %v786_v10 = vpop.f32.mrf.mxu2 }
  0xa6   :  { %v254_v11 = vpop.f32.mrf.mxu0 }
  0xa7   :  { %v397_v12 = vpack.c.bf16 %v381_v9, %v381_v9  ;;  %v304_v13 = vadd.f32 %v303_v7, %v254_v11 }
  0xa9   :  { %414 = vst.msk [vmem:[%s890_s4] sm:$0xf] %vm413_vm2, %v397_v12  ;;  %v346_v14 = vmul.f32 %v777_v2, %v304_v13 }
  0xaa   :  { %v328_v28 = vpop.f32.mrf.mxu3 }
  0xab   :  { %v306_v15 = vpop.f32.mrf.mxu1  ;;  %v366_v16 = vadd.f32 %v782_v5, %v346_v14 }
  0xad   :  { %v382_v18 = vmax.f32 %v366_v16, 0.0  ;;  %v794_v19 = vpop.f32.mrf.mxu2 }
  0xae   :  { %v257_v20 = vpop.f32.mrf.mxu0 }
  0xaf   :  { %v398_v21 = vpack.c.bf16 %v382_v18, %v382_v18  ;;  %v307_v22 = vadd.f32 %v306_v15, %v257_v20 }
  0xb1   :  { %415 = vst.msk [vmem:[%s890_s4 + $0x4] sm:$0xf] %vm413_vm2, %v398_v21  ;;  %v347_v23 = vmul.f32 %v777_v2, %v307_v22 }
  0xb2   :  { %v331_v46 = vpop.f32.mrf.mxu3 }
  0xb3   :  { %v308_v24 = vpop.f32.mrf.mxu1  ;;  %v367_v25 = vadd.f32 %v782_v5, %v347_v23 }
  0xb5   :  { %v383_v26 = vmax.f32 %v367_v25, 0.0  ;;  %v277_v27 = vpop.f32.mrf.mxu2 }
  0xb6   :  { %v327_v29 = vadd.f32 %v326_v17, %v277_v27  ;;  %v259_v30 = vpop.f32.mrf.mxu0 }
  0xb7   :  { %v399_v31 = vpack.c.bf16 %v383_v26, %v383_v26  ;;  %v309_v32 = vadd.f32 %v308_v24, %v259_v30 }
  0xb8   :  { %v355_v33 = vmul.f32 %v777_v2, %v327_v29 }
  0xb9   :  { %416 = vst.msk [vmem:[%s890_s4 + $0x8] sm:$0xf] %vm413_vm2, %v399_v31  ;;  %v348_v34 = vmul.f32 %v777_v2, %v309_v32 }
  0xba   :  { %v375_v35 = vadd.f32 %v782_v5, %v355_v33  ;;  %v333_v62 = vpop.f32.mrf.mxu3 }
  0xbb   :  { %v311_v36 = vpop.f32.mrf.mxu1  ;;  %v368_v37 = vadd.f32 %v782_v5, %v348_v34 }
  0xbc   :  { %v391_v38 = vmax.f32 %v375_v35, 0.0 }
  0xbd   :  { %v384_v39 = vmax.f32 %v368_v37, 0.0  ;;  %v279_v40 = vpop.f32.mrf.mxu2 }
  0xbe   :  { %v407_v41 = vpack.c.bf16 %v391_v38, %v391_v38  ;;  %v329_v42 = vadd.f32 %v328_v28, %v279_v40  ;;  %v262_v43 = vpop.f32.mrf.mxu0 }
  0xbf   :  { %v400_v44 = vpack.c.bf16 %v384_v39, %v384_v39  ;;  %v312_v45 = vadd.f32 %v311_v36, %v262_v43 }
  0xc0   :  { %424 = vst.msk [vmem:[%s890_s4 + $0x28] sm:$0xf] %vm413_vm2, %v407_v41  ;;  %v356_v47 = vmul.f32 %v777_v2, %v329_v42 }
  0xc1   :  { %417 = vst.msk [vmem:[%s890_s4 + $0xc] sm:$0xf] %vm413_vm2, %v400_v44  ;;  %v349_v48 = vmul.f32 %v777_v2, %v312_v45 }
  0xc2   :  { %v376_v49 = vadd.f32 %v782_v5, %v356_v47  ;;  %v336_v18 = vpop.f32.mrf.mxu3 }
  0xc3   :  { %v313_v50 = vpop.f32.mrf.mxu1  ;;  %v369_v51 = vadd.f32 %v782_v5, %v349_v48 }
  0xc4   :  { %v392_v52 = vmax.f32 %v376_v49, 0.0 }
  0xc5   :  { %v385_v53 = vmax.f32 %v369_v51, 0.0  ;;  %v282_v54 = vpop.f32.mrf.mxu2 }
  0xc6   :  { %v408_v55 = vpack.c.bf16 %v392_v52, %v392_v52  ;;  %v332_v56 = vadd.f32 %v331_v46, %v282_v54  ;;  %v264_v57 = vpop.f32.mrf.mxu0 }
  0xc7   :  { %v401_v58 = vpack.c.bf16 %v385_v53, %v385_v53  ;;  %v314_v59 = vadd.f32 %v313_v50, %v264_v57 }
  0xc8   :  { %425 = vst.msk [vmem:[%s890_s4 + $0x2c] sm:$0xf] %vm413_vm2, %v408_v55  ;;  %v357_v60 = vmul.f32 %v777_v2, %v332_v56 }
  0xc9   :  { %418 = vst.msk [vmem:[%s890_s4 + $0x10] sm:$0xf] %vm413_vm2, %v401_v58  ;;  %v350_v61 = vmul.f32 %v777_v2, %v314_v59 }
  0xca   :  { %v377_v63 = vadd.f32 %v782_v5, %v357_v60  ;;  %v338_v37 = vpop.f32.mrf.mxu3 }
  0xcb   :  { %v316_v0 = vpop.f32.mrf.mxu1  ;;  %v370_v1 = vadd.f32 %v782_v5, %v350_v61 }
  0xcc   :  { %v393_v3 = vmax.f32 %v377_v63, 0.0 }
  0xcd   :  { %v386_v4 = vmax.f32 %v370_v1, 0.0  ;;  %v284_v6 = vpop.f32.mrf.mxu2 }
  0xce   :  { %v409_v7 = vpack.c.bf16 %v393_v3, %v393_v3  ;;  %v334_v8 = vadd.f32 %v333_v62, %v284_v6  ;;  %v267_v9 = vpop.f32.mrf.mxu0 }
  0xcf   :  { %v402_v11 = vpack.c.bf16 %v386_v4, %v386_v4  ;;  %v317_v12 = vadd.f32 %v316_v0, %v267_v9 }
  0xd0   :  { %426 = vst.msk [vmem:[%s890_s4 + $0x30] sm:$0xf] %vm413_vm2, %v409_v7  ;;  %v358_v13 = vmul.f32 %v777_v2, %v334_v8 }
  0xd1   :  { %419 = vst.msk [vmem:[%s890_s4 + $0x14] sm:$0xf] %vm413_vm2, %v402_v11  ;;  %v351_v14 = vmul.f32 %v777_v2, %v317_v12 }
  0xd2   :  { %v378_v15 = vadd.f32 %v782_v5, %v358_v13 }
  0xd3   :  { %v318_v16 = vpop.f32.mrf.mxu1  ;;  %v371_v17 = vadd.f32 %v782_v5, %v351_v14 }
  0xd4   :  { %v394_v20 = vmax.f32 %v378_v15, 0.0 }
  0xd5   :  { %v387_v21 = vmax.f32 %v371_v17, 0.0  ;;  %v287_v22 = vpop.f32.mrf.mxu2 }
  0xd6   :  { %v410_v23 = vpack.c.bf16 %v394_v20, %v394_v20  ;;  %v337_v24 = vadd.f32 %v336_v18, %v287_v22  ;;  %v269_v25 = vpop.f32.mrf.mxu0 }
  0xd7   :  { %v403_v26 = vpack.c.bf16 %v387_v21, %v387_v21  ;;  %v319_v27 = vadd.f32 %v318_v16, %v269_v25 }
  0xd8   :  { %427 = vst.msk [vmem:[%s890_s4 + $0x34] sm:$0xf] %vm413_vm2, %v410_v23  ;;  %v359_v28 = vmul.f32 %v777_v2, %v337_v24 }
  0xd9   :  { %420 = vst.msk [vmem:[%s890_s4 + $0x18] sm:$0xf] %vm413_vm2, %v403_v26  ;;  %v352_v29 = vmul.f32 %v777_v2, %v319_v27 }
  0xda   :  { %v379_v30 = vadd.f32 %v782_v5, %v359_v28 }
  0xdb   :  { %v321_v31 = vpop.f32.mrf.mxu1  ;;  %v372_v32 = vadd.f32 %v782_v5, %v352_v29 }
  0xdc   :  { %v322_v33 = vadd.f32 %v321_v31, %v786_v10  ;;  %v395_v34 = vmax.f32 %v379_v30, 0.0 }
  0xdd   :  { %v388_v35 = vmax.f32 %v372_v32, 0.0  ;;  %v289_v38 = vpop.f32.mrf.mxu2 }
  0xde   :  { %v353_v36 = vmul.f32 %v777_v2, %v322_v33  ;;  %v411_v39 = vpack.c.bf16 %v395_v34, %v395_v34  ;;  %v339_v40 = vadd.f32 %v338_v37, %v289_v38 }
  0xdf   :  { %v404_v41 = vpack.c.bf16 %v388_v35, %v388_v35 }
  0xe0   :  { %v373_v42 = vadd.f32 %v782_v5, %v353_v36  ;;  %428 = vst.msk [vmem:[%s890_s4 + $0x38] sm:$0xf] %vm413_vm2, %v411_v39  ;;  %v360_v43 = vmul.f32 %v777_v2, %v339_v40 }
  0xe1   :  { %421 = vst.msk [vmem:[%s890_s4 + $0x1c] sm:$0xf] %vm413_vm2, %v404_v41 }
  0xe2   :  { %v389_v10 = vmax.f32 %v373_v42, 0.0  ;;  %v380_v44 = vadd.f32 %v782_v5, %v360_v43 }
  0xe3   :  { %v323_v45 = vpop.f32.mrf.mxu1 }
  0xe4   :  { %v405_v46 = vpack.c.bf16 %v389_v10, %v389_v10  ;;  %v324_v47 = vadd.f32 %v323_v45, %v794_v19  ;;  %v396_v48 = vmax.f32 %v380_v44, 0.0 }
  0xe6   :  { %422 = vst.msk [vmem:[%s890_s4 + $0x20] sm:$0xf] %vm413_vm2, %v405_v46  ;;  %v354_v49 = vmul.f32 %v777_v2, %v324_v47  ;;  %v412_v50 = vpack.c.bf16 %v396_v48, %v396_v48 }
  0xe8   :  { %v374_v51 = vadd.f32 %v782_v5, %v354_v49  ;;  %429 = vst.msk [vmem:[%s890_s4 + $0x3c] sm:$0xf] %vm413_vm2, %v412_v50 }
  0xea   :  { %v390_v52 = vmax.f32 %v374_v51, 0.0 }
  0xec   :  { %v406_v53 = vpack.c.bf16 %v390_v52, %v390_v52 }
  0xee   :  { %423 = vst.msk [vmem:[%s890_s4 + $0x24] sm:$0xf] %vm413_vm2, %v406_v53 }

// kernel: resnet_forward.23
= control target key start
LH: loop header
LB: loop body
LE: loop exit
PB: predicated region body
PF: predicated region fallthrough
CT: control target
= control target key end

     0   :  { %vm242_vm0 = vcmask 1043456   ;;  %vm217_vm1 = vcmask 719872   ;;  %vm464_vm2 = vcmask 60416   ;;  %s1005_s1 = inlined_call_operand.vmem [shape: bf16[216,8], index: 1, kind: input, shape index: {}]   ;;  %s1006_s0 = inlined_call_operand.vmem [shape: bf16[128,216], index: 0, kind: input, shape index: {}]   ;;  %s1007_s2 = inlined_call_operand.vmem [shape: f32[1,8], index: 2, kind: input, shape index: {}]   ;;  %s1008_s3 = inlined_call_operand.vmem [shape: f32[1,8], index: 3, kind: input, shape index: {}]   ;;  %s1009_s4 = inlined_call_operand.vmem [shape: bf16[128,8], index: 4, kind: input, shape index: {}]   ;;  %s1010_s5 = inlined_call_operand.vmem [shape: bf16[128,8], index: 5, kind: output, shape index: {}]  }
   0x1   :  { %v632_v0 = vld [vmem:[%s1005_s1 + $0x38] sm:$0xff]  ;;  %v63_v1 = vld [vmem:[%s1005_s1 + $0x68] sm:$0xf]  ;;  %v631_v3 = vld [vmem:[%s1005_s1 + $0x30] sm:$0xff] }
   0x2   :  { %v189_v2 = vunpack.c.l.b16 %v63_v1  ;;  %246 = vmatpush.bf16.msra.mxu0 %v632_v0  ;;  %677 = vmatpush.bf16.msra.mxu2 %v632_v0  ;;  %v637_v6 = vld [vmem:[%s1005_s1 + $0x60] sm:$0xff]  ;;  %v630_v7 = vld [vmem:[%s1005_s1 + $0x28] sm:$0xff]  ;;  %v636_v8 = vld [vmem:[%s1005_s1 + $0x58] sm:$0xff] }
   0x3   :  { %v629_v9 = vld [vmem:[%s1005_s1 + $0x20] sm:$0xff]  ;;  %v635_v10 = vld [vmem:[%s1005_s1 + $0x50] sm:$0xff]  ;;  %v628_v11 = vld [vmem:[%s1005_s1 + $0x18] sm:$0xff] }
   0x4   :  { %v203_v4 = vpack.c.b16 %v189_v2, %v189_v2  ;;  %v634_v12 = vld [vmem:[%s1005_s1 + $0x48] sm:$0xff]  ;;  %v627_v13 = vld [vmem:[%s1005_s1 + $0x10] sm:$0xff]  ;;  %v633_v14 = vld [vmem:[%s1005_s1 + $0x40] sm:$0xff] }
   0x5   :  { %v626_v15 = vld [vmem:[%s1005_s1 + $0x8] sm:$0xff]  ;;  %v609_v16 = vld [vmem:[%s1006_s0 + $0x4] sm:$0xf]  ;;  %v619_v18 = vld [vmem:[%s1006_s0 + $0x54] sm:$0xf] }
   0x6   :  { %v244_v5 = vsel %vm242_vm0, %v203_v4, 0  ;;  %247 = vmatpush.bf16.msra.mxu0 %v631_v3  ;;  %678 = vmatpush.bf16.msra.mxu2 %v631_v3  ;;  %v489_v17 = vld [vmem:[%s1006_s0 + $0x8] sm:$0xf0]  ;;  %v529_v19 = vld [vmem:[%s1006_s0 + $0x58] sm:$0xf0]  ;;  %v625_v21 = vld [vmem:[%s1005_s1] sm:$0xff] }
   0x7   :  { %297 = vmatpush.bf16.msra.mxu1 %v244_v5  ;;  %685 = vmatpush.bf16.msra.mxu3 %v244_v5  ;;  %v492_v20 = vor.u32 %v609_v16, %v489_v17  ;;  %v487_v22 = vld [vmem:[%s1006_s0] sm:$0xf]  ;;  %v610_v23 = vld [vmem:[%s1006_s0 + $0x4] sm:$0xf0]  ;;  %v532_v25 = vor.u32 %v619_v18, %v529_v19  ;;  %v611_v29 = vld [vmem:[%s1006_s0 + $0x14] sm:$0xf] }
   0x8   :  { %v519_v24 = vld [vmem:[%s1006_s0 + $0x40] sm:$0xf]  ;;  %v618_v26 = vld [vmem:[%s1006_s0 + $0x44] sm:$0xf0]  ;;  %v488_v27 = vor.u32 %v610_v23, %v487_v22  ;;  %v497_v30 = vld [vmem:[%s1006_s0 + $0x18] sm:$0xf0] }
   0x9   :  { %v520_v28 = vor.u32 %v618_v26, %v519_v24  ;;  %v621_v31 = vld [vmem:[%s1006_s0 + $0x64] sm:$0xf]  ;;  %v537_v32 = vld [vmem:[%s1006_s0 + $0x68] sm:$0xf0]  ;;  %v500_v33 = vor.u32 %v611_v29, %v497_v30  ;;  %v495_v34 = vld [vmem:[%s1006_s0 + $0x10] sm:$0xf] }
   0xa   :  { %248 = vmatpush.bf16.msra.mxu0 %v630_v7  ;;  %679 = vmatpush.bf16.msra.mxu2 %v630_v7  ;;  %v612_v35 = vld [vmem:[%s1006_s0 + $0x14] sm:$0xf0]  ;;  %v540_v36 = vor.u32 %v621_v31, %v537_v32  ;;  %v527_v37 = vld [vmem:[%s1006_s0 + $0x50] sm:$0xf]  ;;  %v613_v41 = vld [vmem:[%s1006_s0 + $0x24] sm:$0xf] }
   0xb   :  { %298 = vmatpush.bf16.msra.mxu1 %v637_v6  ;;  %686 = vmatpush.bf16.msra.mxu3 %v637_v6  ;;  %v620_v38 = vld [vmem:[%s1006_s0 + $0x54] sm:$0xf0]  ;;  %v496_v39 = vor.u32 %v612_v35, %v495_v34  ;;  %v505_v42 = vld [vmem:[%s1006_s0 + $0x28] sm:$0xf0]  ;;  %v623_v43 = vld [vmem:[%s1006_s0 + $0x74] sm:$0xf] }
   0xc   :  { %v528_v40 = vor.u32 %v620_v38, %v527_v37  ;;  %v545_v44 = vld [vmem:[%s1006_s0 + $0x78] sm:$0xf0]  ;;  %v508_v45 = vor.u32 %v613_v41, %v505_v42  ;;  %v503_v46 = vld [vmem:[%s1006_s0 + $0x20] sm:$0xf]  ;;  %v614_v47 = vld [vmem:[%s1006_s0 + $0x24] sm:$0xf0] }
   0xd   :  { %v548_v48 = vor.u32 %v623_v43, %v545_v44  ;;  %v535_v49 = vld [vmem:[%s1006_s0 + $0x60] sm:$0xf]  ;;  %v622_v50 = vld [vmem:[%s1006_s0 + $0x64] sm:$0xf0]  ;;  %v504_v51 = vor.u32 %v614_v47, %v503_v46  ;;  %v615_v53 = vld [vmem:[%s1006_s0 + $0x34] sm:$0xf] }
   0xe   :  { %249 = vmatpush.bf16.msra.mxu0 %v629_v9  ;;  %680 = vmatpush.bf16.msra.mxu2 %v629_v9  ;;  %v536_v52 = vor.u32 %v622_v50, %v535_v49  ;;  %v513_v54 = vld [vmem:[%s1006_s0 + $0x38] sm:$0xf0]  ;;  %v511_v56 = vld [vmem:[%s1006_s0 + $0x30] sm:$0xf]  ;;  %v616_v57 = vld [vmem:[%s1006_s0 + $0x34] sm:$0xf0] }
   0xf   :  { %299 = vmatpush.bf16.msra.mxu1 %v636_v8  ;;  %687 = vmatpush.bf16.msra.mxu3 %v636_v8  ;;  %v516_v55 = vor.u32 %v615_v53, %v513_v54  ;;  %v543_v58 = vld [vmem:[%s1006_s0 + $0x70] sm:$0xf]  ;;  %v624_v59 = vld [vmem:[%s1006_s0 + $0x74] sm:$0xf0]  ;;  %v512_v60 = vor.u32 %v616_v57, %v511_v56  ;;  %v617_v62 = vld [vmem:[%s1006_s0 + $0x44] sm:$0xf] }
  0x10   :  { %v544_v61 = vor.u32 %v624_v59, %v543_v58  ;;  %v521_v63 = vld [vmem:[%s1006_s0 + $0x48] sm:$0xf0]  ;;  %v872_v2 = vld [vmem:[%s1007_s2] ss:$0 sm:$0xff] }
  0x11   :  { %v524_v0 = vor.u32 %v617_v62, %v521_v63  ;;  %v639_v4 = vld [vmem:[%s1009_s4] sm:$0xff]   ;;  %v674_v35 = vld [vmem:[%s1009_s4 + $0x28] sm:$0xff]  }
  0x12   :  { %250 = vmatpush.bf16.msra.mxu0 %v628_v11  ;;  %681 = vmatpush.bf16.msra.mxu2 %v628_v11  ;;  %v880_v6 = vld [vmem:[%s1008_s3] ss:$0 sm:$0xff]  ;;  %v640_v8 = vunpack.c.l.bf16 %v639_v4  ;;  %v641_v18 = vunpack.c.h.bf16 %v639_v4  ;;  %v660_v42 = vunpack.c.l.bf16 %v674_v35 }
  0x13   :  { %300 = vmatpush.bf16.msra.mxu1 %v635_v10  ;;  %688 = vmatpush.bf16.msra.mxu3 %v635_v10 }
  0x16   :  { %251 = vmatpush.bf16.msra.mxu0 %v627_v13  ;;  %682 = vmatpush.bf16.msra.mxu2 %v627_v13 }
  0x17   :  { %301 = vmatpush.bf16.msra.mxu1 %v634_v12  ;;  %689 = vmatpush.bf16.msra.mxu3 %v634_v12 }
  0x1a   :  { %252 = vmatpush.bf16.msra.mxu0 %v626_v15  ;;  %683 = vmatpush.bf16.msra.mxu2 %v626_v15 }
  0x1b   :  { %302 = vmatpush.bf16.msra.mxu1 %v633_v14  ;;  %690 = vmatpush.bf16.msra.mxu3 %v633_v14 }
  0x1e   :  { %601 = vmatmul.msk.bf16.vlgmr.msra.gmra.mxu1 %vm217_vm1, %v492_v20  ;;  %253 = vmatpush.bf16.msra.mxu0 %v625_v21 }
  0x1f   :  { %606 = vmatmul.msk.bf16.vlgmr.msra.gmra.mxu3 %vm217_vm1, %v532_v25  ;;  %684 = vmatpush.bf16.msra.mxu2 %v625_v21  ;;  %v670_v25 = vld [vmem:[%s1009_s4 + $0x8] sm:$0xff]  }
  0x20   :  { %v644_v30 = vunpack.c.l.bf16 %v670_v25 }
  0x21   :  { %254 = vmatmul.bf16.vlgmr.msra.gmra.mxu0 %v488_v27 }
  0x22   :  { %274 = vmatmul.bf16.vlgmr.msra.gmra.mxu2 %v520_v28 }
  0x2e   :  { %602 = vmatmul.msk.bf16.gmra.mxu1 %vm217_vm1, %v500_v33 }
  0x2f   :  { %607 = vmatmul.msk.bf16.gmra.mxu3 %vm217_vm1, %v540_v36 }
  0x31   :  { %259 = vmatmul.bf16.gmra.mxu0 %v496_v39 }
  0x32   :  { %279 = vmatmul.bf16.gmra.mxu2 %v528_v40 }
  0x3e   :  { %603 = vmatmul.msk.bf16.gmra.mxu1 %vm217_vm1, %v508_v45  ;;  %v645_v45 = vunpack.c.h.bf16 %v670_v25 }
  0x3f   :  { %608 = vmatmul.msk.bf16.gmra.mxu3 %vm217_vm1, %v548_v48 }
  0x41   :  { %264 = vmatmul.bf16.gmra.mxu0 %v504_v51 }
  0x42   :  { %284 = vmatmul.bf16.gmra.mxu2 %v536_v52 }
  0x4e   :  { %604 = vmatmul.msk.bf16.gmra.mxu1 %vm217_vm1, %v516_v55  ;;  %v671_v55 = vld [vmem:[%s1009_s4 + $0x10] sm:$0xff]  }
  0x51   :  { %269 = vmatmul.bf16.gmra.mxu0 %v512_v60 }
  0x52   :  { %289 = vmatmul.bf16.gmra.mxu2 %v544_v61  ;;  %v661_v61 = vunpack.c.h.bf16 %v674_v35 }
  0x5e   :  { %605 = vmatmul.msk.bf16.gmra.mxu1 %vm217_vm1, %v524_v0  ;;  %v648_v0 = vunpack.c.l.bf16 %v671_v55 }
  0x9b   :  { %v304_v1 = vpop.f32.mrf.mxu1 }
  0x9e   :  { %v255_v3 = vpop.f32.mrf.mxu0 }
  0x9f   :  { %v305_v5 = vadd.f32 %v304_v1, %v255_v3 }
  0xa1   :  { %v348_v7 = vmul.f32 %v872_v2, %v305_v5 }
  0xa2   :  { %v329_v21 = vpop.f32.mrf.mxu3 }
  0xa3   :  { %v306_v9 = vpop.f32.mrf.mxu1  ;;  %v368_v10 = vadd.f32 %v880_v6, %v348_v7 }
  0xa5   :  { %v416_v11 = vadd.f32 %v640_v8, %v368_v10  ;;  %v884_v12 = vpop.f32.mrf.mxu2 }
  0xa6   :  { %v257_v13 = vpop.f32.mrf.mxu0 }
  0xa7   :  { %v432_v14 = vmax.f32 %v416_v11, 0.0  ;;  %v307_v15 = vadd.f32 %v306_v9, %v257_v13  ;;  %v675_v9 = vld [vmem:[%s1009_s4 + $0x30] sm:$0xff]  }
  0xa9   :  { %v448_v16 = vpack.c.bf16 %v432_v14, %v432_v14  ;;  %v349_v17 = vmul.f32 %v872_v2, %v307_v15 }
  0xaa   :  { %v331_v36 = vpop.f32.mrf.mxu3 }
  0xab   :  { %v309_v19 = vpop.f32.mrf.mxu1  ;;  %465 = vst.msk [vmem:[%s1010_s5] sm:$0xf] %vm464_vm2, %v448_v16  ;;  %v369_v20 = vadd.f32 %v880_v6, %v349_v17 }
  0xad   :  { %v417_v22 = vadd.f32 %v641_v18, %v369_v20  ;;  %v892_v23 = vpop.f32.mrf.mxu2  ;;  %v664_v18 = vunpack.c.l.bf16 %v675_v9 }
  0xae   :  { %v260_v24 = vpop.f32.mrf.mxu0 }
  0xaf   :  { %v433_v26 = vmax.f32 %v417_v22, 0.0  ;;  %v310_v27 = vadd.f32 %v309_v19, %v260_v24 }
  0xb1   :  { %v449_v28 = vpack.c.bf16 %v433_v26, %v433_v26  ;;  %v350_v29 = vmul.f32 %v872_v2, %v310_v27 }
  0xb2   :  { %v334_v58 = vpop.f32.mrf.mxu3 }
  0xb3   :  { %v311_v31 = vpop.f32.mrf.mxu1  ;;  %466 = vst.msk [vmem:[%s1010_s5 + $0x4] sm:$0xf] %vm464_vm2, %v449_v28  ;;  %v370_v32 = vadd.f32 %v880_v6, %v350_v29 }
  0xb5   :  { %v418_v33 = vadd.f32 %v644_v30, %v370_v32  ;;  %v280_v34 = vpop.f32.mrf.mxu2 }
  0xb6   :  { %v330_v37 = vadd.f32 %v329_v21, %v280_v34  ;;  %v262_v38 = vpop.f32.mrf.mxu0  ;;  %v649_v21 = vunpack.c.h.bf16 %v671_v55 }
  0xb7   :  { %v434_v39 = vmax.f32 %v418_v33, 0.0  ;;  %v312_v40 = vadd.f32 %v311_v31, %v262_v38  ;;  %v672_v33 = vld [vmem:[%s1009_s4 + $0x18] sm:$0xff]   ;;  %v665_v38 = vunpack.c.h.bf16 %v675_v9 }
  0xb8   :  { %v358_v41 = vmul.f32 %v872_v2, %v330_v37 }
  0xb9   :  { %v450_v43 = vpack.c.bf16 %v434_v39, %v434_v39  ;;  %v351_v44 = vmul.f32 %v872_v2, %v312_v40 }
  0xba   :  { %v378_v46 = vadd.f32 %v880_v6, %v358_v41  ;;  %v336_v22 = vpop.f32.mrf.mxu3  ;;  %v652_v41 = vunpack.c.l.bf16 %v672_v33 }
  0xbb   :  { %v314_v47 = vpop.f32.mrf.mxu1  ;;  %467 = vst.msk [vmem:[%s1010_s5 + $0x8] sm:$0xf] %vm464_vm2, %v450_v43  ;;  %v371_v48 = vadd.f32 %v880_v6, %v351_v44 }
  0xbc   :  { %v426_v49 = vadd.f32 %v660_v42, %v378_v46 }
  0xbd   :  { %v419_v50 = vadd.f32 %v645_v45, %v371_v48  ;;  %v282_v51 = vpop.f32.mrf.mxu2 }
  0xbe   :  { %v442_v52 = vmax.f32 %v426_v49, 0.0  ;;  %v332_v53 = vadd.f32 %v331_v36, %v282_v51  ;;  %v265_v54 = vpop.f32.mrf.mxu0  ;;  %v676_v49 = vld [vmem:[%s1009_s4 + $0x38] sm:$0xff]  }
  0xbf   :  { %v435_v56 = vmax.f32 %v419_v50, 0.0  ;;  %v315_v57 = vadd.f32 %v314_v47, %v265_v54 }
  0xc0   :  { %v458_v59 = vpack.c.bf16 %v442_v52, %v442_v52  ;;  %v359_v60 = vmul.f32 %v872_v2, %v332_v53 }
  0xc1   :  { %v451_v62 = vpack.c.bf16 %v435_v56, %v435_v56  ;;  %v352_v63 = vmul.f32 %v872_v2, %v315_v57  ;;  %v668_v57 = vunpack.c.l.bf16 %v676_v49 }
  0xc2   :  { %475 = vst.msk [vmem:[%s1010_s5 + $0x28] sm:$0xf] %vm464_vm2, %v458_v59  ;;  %v379_v1 = vadd.f32 %v880_v6, %v359_v60  ;;  %v339_v45 = vpop.f32.mrf.mxu3  ;;  %v653_v60 = vunpack.c.h.bf16 %v672_v33 }
  0xc3   :  { %v316_v3 = vpop.f32.mrf.mxu1  ;;  %468 = vst.msk [vmem:[%s1010_s5 + $0xc] sm:$0xf] %vm464_vm2, %v451_v62  ;;  %v372_v4 = vadd.f32 %v880_v6, %v352_v63  ;;  %v673_v63 = vld [vmem:[%s1009_s4 + $0x20] sm:$0xff]  }
  0xc4   :  { %v427_v5 = vadd.f32 %v661_v61, %v379_v1 }
  0xc5   :  { %v420_v7 = vadd.f32 %v648_v0, %v372_v4  ;;  %v285_v8 = vpop.f32.mrf.mxu2 }
  0xc6   :  { %v443_v10 = vmax.f32 %v427_v5, 0.0  ;;  %v335_v11 = vadd.f32 %v334_v58, %v285_v8  ;;  %v267_v13 = vpop.f32.mrf.mxu0 }
  0xc7   :  { %v436_v14 = vmax.f32 %v420_v7, 0.0  ;;  %v317_v15 = vadd.f32 %v316_v3, %v267_v13  ;;  %v656_v7 = vunpack.c.l.bf16 %v673_v63 }
  0xc8   :  { %v459_v16 = vpack.c.bf16 %v443_v10, %v443_v10  ;;  %v360_v17 = vmul.f32 %v872_v2, %v335_v11 }
  0xc9   :  { %v452_v19 = vpack.c.bf16 %v436_v14, %v436_v14  ;;  %v353_v20 = vmul.f32 %v872_v2, %v317_v15 }
  0xca   :  { %476 = vst.msk [vmem:[%s1010_s5 + $0x2c] sm:$0xf] %vm464_vm2, %v459_v16  ;;  %v380_v24 = vadd.f32 %v880_v6, %v360_v17  ;;  %v341_v8 = vpop.f32.mrf.mxu3  ;;  %v669_v17 = vunpack.c.h.bf16 %v676_v49 }
  0xcb   :  { %v319_v25 = vpop.f32.mrf.mxu1  ;;  %469 = vst.msk [vmem:[%s1010_s5 + $0x10] sm:$0xf] %vm464_vm2, %v452_v19  ;;  %v373_v26 = vadd.f32 %v880_v6, %v353_v20 }
  0xcc   :  { %v428_v27 = vadd.f32 %v664_v18, %v380_v24 }
  0xcd   :  { %v421_v28 = vadd.f32 %v649_v21, %v373_v26  ;;  %v287_v29 = vpop.f32.mrf.mxu2 }
  0xce   :  { %v444_v30 = vmax.f32 %v428_v27, 0.0  ;;  %v337_v31 = vadd.f32 %v336_v22, %v287_v29  ;;  %v270_v32 = vpop.f32.mrf.mxu0  ;;  %v657_v27 = vunpack.c.h.bf16 %v673_v63 }
  0xcf   :  { %v437_v34 = vmax.f32 %v421_v28, 0.0  ;;  %v320_v35 = vadd.f32 %v319_v25, %v270_v32 }
  0xd0   :  { %v460_v36 = vpack.c.bf16 %v444_v30, %v444_v30  ;;  %v361_v37 = vmul.f32 %v872_v2, %v337_v31 }
  0xd1   :  { %v453_v39 = vpack.c.bf16 %v437_v34, %v437_v34  ;;  %v354_v40 = vmul.f32 %v872_v2, %v320_v35 }
  0xd2   :  { %477 = vst.msk [vmem:[%s1010_s5 + $0x30] sm:$0xf] %vm464_vm2, %v460_v36  ;;  %v381_v42 = vadd.f32 %v880_v6, %v361_v37 }
  0xd3   :  { %v321_v43 = vpop.f32.mrf.mxu1  ;;  %470 = vst.msk [vmem:[%s1010_s5 + $0x14] sm:$0xf] %vm464_vm2, %v453_v39  ;;  %v374_v44 = vadd.f32 %v880_v6, %v354_v40 }
  0xd4   :  { %v429_v46 = vadd.f32 %v665_v38, %v381_v42 }
  0xd5   :  { %v422_v47 = vadd.f32 %v652_v41, %v374_v44  ;;  %v290_v48 = vpop.f32.mrf.mxu2 }
  0xd6   :  { %v445_v50 = vmax.f32 %v429_v46, 0.0  ;;  %v340_v51 = vadd.f32 %v339_v45, %v290_v48  ;;  %v272_v52 = vpop.f32.mrf.mxu0 }
  0xd7   :  { %v438_v53 = vmax.f32 %v422_v47, 0.0  ;;  %v322_v54 = vadd.f32 %v321_v43, %v272_v52 }
  0xd8   :  { %v461_v55 = vpack.c.bf16 %v445_v50, %v445_v50  ;;  %v362_v56 = vmul.f32 %v872_v2, %v340_v51 }
  0xd9   :  { %v454_v58 = vpack.c.bf16 %v438_v53, %v438_v53  ;;  %v355_v59 = vmul.f32 %v872_v2, %v322_v54 }
  0xda   :  { %478 = vst.msk [vmem:[%s1010_s5 + $0x34] sm:$0xf] %vm464_vm2, %v461_v55  ;;  %v382_v61 = vadd.f32 %v880_v6, %v362_v56 }
  0xdb   :  { %v324_v62 = vpop.f32.mrf.mxu1  ;;  %471 = vst.msk [vmem:[%s1010_s5 + $0x18] sm:$0xf] %vm464_vm2, %v454_v58  ;;  %v375_v0 = vadd.f32 %v880_v6, %v355_v59 }
  0xdc   :  { %v325_v1 = vadd.f32 %v324_v62, %v884_v12  ;;  %v430_v3 = vadd.f32 %v668_v57, %v382_v61 }
  0xdd   :  { %v423_v4 = vadd.f32 %v653_v60, %v375_v0  ;;  %v292_v9 = vpop.f32.mrf.mxu2 }
  0xde   :  { %v356_v5 = vmul.f32 %v872_v2, %v325_v1  ;;  %v446_v10 = vmax.f32 %v430_v3, 0.0  ;;  %v342_v11 = vadd.f32 %v341_v8, %v292_v9 }
  0xdf   :  { %v439_v13 = vmax.f32 %v423_v4, 0.0 }
  0xe0   :  { %v376_v14 = vadd.f32 %v880_v6, %v356_v5  ;;  %v462_v15 = vpack.c.bf16 %v446_v10, %v446_v10  ;;  %v363_v16 = vmul.f32 %v872_v2, %v342_v11 }
  0xe1   :  { %v455_v18 = vpack.c.bf16 %v439_v13, %v439_v13 }
  0xe2   :  { %v424_v19 = vadd.f32 %v656_v7, %v376_v14  ;;  %479 = vst.msk [vmem:[%s1010_s5 + $0x38] sm:$0xf] %vm464_vm2, %v462_v15  ;;  %v383_v12 = vadd.f32 %v880_v6, %v363_v16 }
  0xe3   :  { %v326_v20 = vpop.f32.mrf.mxu1  ;;  %472 = vst.msk [vmem:[%s1010_s5 + $0x1c] sm:$0xf] %vm464_vm2, %v455_v18 }
  0xe4   :  { %v440_v21 = vmax.f32 %v424_v19, 0.0  ;;  %v327_v22 = vadd.f32 %v326_v20, %v892_v23  ;;  %v431_v24 = vadd.f32 %v669_v17, %v383_v12 }
  0xe6   :  { %v456_v25 = vpack.c.bf16 %v440_v21, %v440_v21  ;;  %v357_v26 = vmul.f32 %v872_v2, %v327_v22  ;;  %v447_v28 = vmax.f32 %v431_v24, 0.0 }
  0xe8   :  { %473 = vst.msk [vmem:[%s1010_s5 + $0x20] sm:$0xf] %vm464_vm2, %v456_v25  ;;  %v377_v29 = vadd.f32 %v880_v6, %v357_v26  ;;  %v463_v30 = vpack.c.bf16 %v447_v28, %v447_v28 }
  0xea   :  { %v425_v31 = vadd.f32 %v657_v27, %v377_v29  ;;  %480 = vst.msk [vmem:[%s1010_s5 + $0x3c] sm:$0xf] %vm464_vm2, %v463_v30 }
  0xec   :  { %v441_v23 = vmax.f32 %v425_v31, 0.0 }
  0xee   :  { %v457_v32 = vpack.c.bf16 %v441_v23, %v441_v23 }
  0xf0   :  { %474 = vst.msk [vmem:[%s1010_s5 + $0x24] sm:$0xf] %vm464_vm2, %v457_v32 }

// kernel: resnet_forward.24
= control target key start
LH: loop header
LB: loop body
LE: loop exit
PB: predicated region body
PF: predicated region fallthrough
CT: control target
= control target key end

     0   :  { %vm141_vm0 = vcmask 1043456   ;;  %vm137_vm1 = vcmask 719872   ;;  %vm189_vm2 = vcmask 125952   ;;  %s365_s1 = inlined_call_operand.vmem [shape: bf16[216,16], index: 1, kind: input, shape index: {}]   ;;  %s366_s0 = inlined_call_operand.vmem [shape: bf16[16,216], index: 0, kind: input, shape index: {}]   ;;  %s367_s2 = inlined_call_operand.vmem [shape: f32[1,16], index: 2, kind: input, shape index: {}]   ;;  %s368_s3 = inlined_call_operand.vmem [shape: f32[1,16], index: 3, kind: input, shape index: {}]   ;;  %s369_s4 = inlined_call_operand.vmem [shape: bf16[16,16], index: 4, kind: output, shape index: {}]  }
   0x1   :  { %v266_v0 = vld [vmem:[%s365_s1 + $0x38] sm:$0xff]  ;;  %v46_v1 = vld [vmem:[%s365_s1 + $0x68] sm:$0xf]  ;;  %v265_v3 = vld [vmem:[%s365_s1 + $0x30] sm:$0xff] }
   0x2   :  { %v109_v2 = vunpack.c.l.b16 %v46_v1  ;;  %145 = vmatpush.bf16.msra.mxu0 %v266_v0  ;;  %v271_v6 = vld [vmem:[%s365_s1 + $0x60] sm:$0xff]  ;;  %v264_v7 = vld [vmem:[%s365_s1 + $0x28] sm:$0xff]  ;;  %v270_v8 = vld [vmem:[%s365_s1 + $0x58] sm:$0xff] }
   0x3   :  { %v263_v9 = vld [vmem:[%s365_s1 + $0x20] sm:$0xff]  ;;  %v269_v10 = vld [vmem:[%s365_s1 + $0x50] sm:$0xff]  ;;  %v262_v11 = vld [vmem:[%s365_s1 + $0x18] sm:$0xff] }
   0x4   :  { %v123_v4 = vpack.c.b16 %v109_v2, %v109_v2  ;;  %v268_v12 = vld [vmem:[%s365_s1 + $0x48] sm:$0xff]  ;;  %v261_v13 = vld [vmem:[%s365_s1 + $0x10] sm:$0xff]  ;;  %v267_v14 = vld [vmem:[%s365_s1 + $0x40] sm:$0xff] }
   0x5   :  { %v260_v15 = vld [vmem:[%s365_s1 + $0x8] sm:$0xff]  ;;  %v257_v16 = vld [vmem:[%s366_s0 + $0x4] sm:$0xf]  ;;  %v198_v20 = vld [vmem:[%s366_s0] sm:$0xf] }
   0x6   :  { %v143_v5 = vsel %vm141_vm0, %v123_v4, 0  ;;  %146 = vmatpush.bf16.msra.mxu0 %v265_v3  ;;  %v200_v17 = vld [vmem:[%s366_s0 + $0x8] sm:$0xf0]  ;;  %v259_v19 = vld [vmem:[%s365_s1] sm:$0xff]  ;;  %v258_v21 = vld [vmem:[%s366_s0 + $0x4] sm:$0xf0] }
   0x7   :  { %161 = vmatpush.bf16.msra.mxu1 %v143_v5  ;;  %v203_v18 = vor.u32 %v257_v16, %v200_v17  ;;  %v199_v22 = vor.u32 %v258_v21, %v198_v20  ;;  %v272_v24 = vld [vmem:[%s367_s2] ss:$0 sm:$0xff] }
   0x8   :  { %v273_v27 = vld [vmem:[%s368_s3] ss:$0 sm:$0xff] }
   0xa   :  { %147 = vmatpush.bf16.msra.mxu0 %v264_v7 }
   0xb   :  { %162 = vmatpush.bf16.msra.mxu1 %v271_v6 }
   0xe   :  { %148 = vmatpush.bf16.msra.mxu0 %v263_v9 }
   0xf   :  { %163 = vmatpush.bf16.msra.mxu1 %v270_v8 }
  0x12   :  { %149 = vmatpush.bf16.msra.mxu0 %v262_v11 }
  0x13   :  { %164 = vmatpush.bf16.msra.mxu1 %v269_v10 }
  0x16   :  { %150 = vmatpush.bf16.msra.mxu0 %v261_v13 }
  0x17   :  { %165 = vmatpush.bf16.msra.mxu1 %v268_v12 }
  0x1a   :  { %151 = vmatpush.bf16.msra.mxu0 %v260_v15 }
  0x1b   :  { %166 = vmatpush.bf16.msra.mxu1 %v267_v14 }
  0x1e   :  { %256 = vmatmul.msk.bf16.vlgmr.msra.gmra.mxu1 %vm137_vm1, %v203_v18  ;;  %152 = vmatpush.bf16.msra.mxu0 %v259_v19 }
  0x21   :  { %153 = vmatmul.bf16.vlgmr.msra.gmra.mxu0 %v199_v22 }
  0x9b   :  { %v168_v23 = vpop.f32.mrf.mxu1 }
  0x9e   :  { %v154_v25 = vpop.f32.mrf.mxu0 }
  0x9f   :  { %v169_v26 = vadd.f32 %v168_v23, %v154_v25 }
  0xa1   :  { %v177_v28 = vmul.f32 %v272_v24, %v169_v26 }
  0xa3   :  { %v183_v29 = vadd.f32 %v273_v27, %v177_v28  ;;  %v170_v31 = vpop.f32.mrf.mxu1 }
  0xa5   :  { %v185_v30 = vmax.f32 %v183_v29, 0.0 }
  0xa6   :  { %v156_v32 = vpop.f32.mrf.mxu0 }
  0xa7   :  { %v187_v33 = vpack.c.bf16 %v185_v30, %v185_v30  ;;  %v171_v34 = vadd.f32 %v170_v31, %v156_v32 }
  0xa9   :  { %190 = vst.msk [vmem:[%s369_s4] sm:$0xf] %vm189_vm2, %v187_v33  ;;  %v178_v35 = vmul.f32 %v272_v24, %v171_v34 }
  0xab   :  { %v184_v36 = vadd.f32 %v273_v27, %v178_v35 }
  0xad   :  { %v186_v37 = vmax.f32 %v184_v36, 0.0 }
  0xaf   :  { %v188_v38 = vpack.c.bf16 %v186_v37, %v186_v37 }
  0xb1   :  { %191 = vst.msk [vmem:[%s369_s4 + $0x4] sm:$0xf] %vm189_vm2, %v188_v38 }

// kernel: resnet_forward.25
= control target key start
LH: loop header
LB: loop body
LE: loop exit
PB: predicated region body
PF: predicated region fallthrough
CT: control target
= control target key end

     0   :  { %vm30_vm0 = vcmask 1043456   ;;  %vm26_vm1 = vcmask 64512   ;;  %vm62_vm2 = vcmask 125952   ;;  %s120_s1 = inlined_call_operand.vmem [shape: bf16[8,16], index: 1, kind: input, shape index: {}]   ;;  %s121_s0 = inlined_call_operand.vmem [shape: bf16[16,8], index: 0, kind: input, shape index: {}]   ;;  %s122_s2 = inlined_call_operand.vmem [shape: f32[1,16], index: 2, kind: input, shape index: {}]   ;;  %s123_s3 = inlined_call_operand.vmem [shape: f32[1,16], index: 3, kind: input, shape index: {}]   ;;  %s124_s4 = inlined_call_operand.vmem [shape: bf16[16,16], index: 4, kind: output, shape index: {}]  }
   0x1   :  { %v20_v0 = vld [vmem:[%s120_s1] sm:$0xf] }
   0x2   :  { %v32_v1 = vsel %vm30_vm0, %v20_v0, 0  ;;  %v74_v2 = vld [vmem:[%s121_s0] sm:$0xff] }
   0x3   :  { %41 = vmatpush.bf16.msra.mxu0 %v32_v1  ;;  %v75_v3 = vld [vmem:[%s122_s2] ss:$0 sm:$0xff] }
   0x4   :  { %v76_v4 = vld [vmem:[%s123_s3] ss:$0 sm:$0xff] }
   0x6   :  { %73 = vmatmul.msk.bf16.vlgmr.msra.gmra.mxu0 %vm26_vm1, %v74_v2 }
  0x83   :  { %v43_v5 = vpop.f32.mrf.mxu0 }
  0x84   :  { %v52_v6 = vmul.f32 %v75_v3, %v43_v5 }
  0x86   :  { %v58_v7 = vadd.f32 %v76_v4, %v52_v6 }
  0x88   :  { %v60_v8 = vpack.c.bf16 %v58_v7, %v58_v7 }
  0x8a   :  { %63 = vst.msk [vmem:[%s124_s4] sm:$0xf] %vm62_vm2, %v60_v8 }
  0x8b   :  { %v45_v9 = vpop.f32.mrf.mxu0 }
  0x8c   :  { %v53_v10 = vmul.f32 %v75_v3, %v45_v9 }
  0x8e   :  { %v59_v11 = vadd.f32 %v76_v4, %v53_v10 }
  0x90   :  { %v61_v12 = vpack.c.bf16 %v59_v11, %v59_v11 }
  0x92   :  { %64 = vst.msk [vmem:[%s124_s4 + $0x4] sm:$0xf] %vm62_vm2, %v61_v12 }

// kernel: resnet_forward.26
= control target key start
LH: loop header
LB: loop body
LE: loop exit
PB: predicated region body
PF: predicated region fallthrough
CT: control target
= control target key end

     0   :  { %vm260_vm0 = vcmask 392192   ;;  %vm342_vm1 = vcmask 125952   ;;  %s661_s1 = inlined_call_operand.vmem [shape: bf16[432,16], index: 1, kind: input, shape index: {}]   ;;  %s662_s0 = inlined_call_operand.vmem [shape: bf16[16,432], index: 0, kind: input, shape index: {}]   ;;  %s663_s2 = inlined_call_operand.vmem [shape: f32[1,16], index: 2, kind: input, shape index: {}]   ;;  %s664_s3 = inlined_call_operand.vmem [shape: f32[1,16], index: 3, kind: input, shape index: {}]   ;;  %s665_s4 = inlined_call_operand.vmem [shape: bf16[16,16], index: 4, kind: input, shape index: {}]   ;;  %s666_s5 = inlined_call_operand.vmem [shape: bf16[16,16], index: 5, kind: output, shape index: {}]  }
   0x1   :  { %v485_v0 = vld [vmem:[%s661_s1 + $0x38] sm:$0xff]  ;;  %v484_v3 = vld [vmem:[%s661_s1 + $0x30] sm:$0xff]  ;;  %v483_v7 = vld [vmem:[%s661_s1 + $0x28] sm:$0xff] }
   0x2   :  { %v493_v1 = vld [vmem:[%s661_s1 + $0x78] sm:$0xff]  ;;  %264 = vmatpush.bf16.msra.mxu0 %v485_v0  ;;  %v492_v4 = vld [vmem:[%s661_s1 + $0x70] sm:$0xff]  ;;  %v491_v8 = vld [vmem:[%s661_s1 + $0x68] sm:$0xff] }
   0x3   :  { %v501_v2 = vld [vmem:[%s661_s1 + $0xb8] sm:$0xff]  ;;  %278 = vmatpush.bf16.msra.mxu1 %v493_v1  ;;  %v500_v5 = vld [vmem:[%s661_s1 + $0xb0] sm:$0xff]  ;;  %v499_v9 = vld [vmem:[%s661_s1 + $0xa8] sm:$0xff] }
   0x4   :  { %292 = vmatpush.bf16.msra.mxu2 %v501_v2  ;;  %v504_v6 = vld [vmem:[%s661_s1 + $0xd0] sm:$0xff]  ;;  %v503_v10 = vld [vmem:[%s661_s1 + $0xc8] sm:$0xff]  ;;  %v482_v11 = vld [vmem:[%s661_s1 + $0x20] sm:$0xff] }
   0x5   :  { %311 = vmatpush.bf16.msra.mxu3 %v504_v6  ;;  %v490_v12 = vld [vmem:[%s661_s1 + $0x60] sm:$0xff]  ;;  %v475_v15 = vld [vmem:[%s662_s0 + $0xc] sm:$0xf]  ;;  %v361_v16 = vld [vmem:[%s662_s0 + $0x18] sm:$0xf0] }
   0x6   :  { %265 = vmatpush.bf16.msra.mxu0 %v484_v3  ;;  %v498_v13 = vld [vmem:[%s661_s1 + $0xa0] sm:$0xff]  ;;  %v481_v17 = vld [vmem:[%s661_s1 + $0x18] sm:$0xff]  ;;  %v364_v20 = vor.u32 %v475_v15, %v361_v16  ;;  %v480_v21 = vld [vmem:[%s661_s1 + $0x10] sm:$0xff] }
   0x7   :  { %279 = vmatpush.bf16.msra.mxu1 %v492_v4  ;;  %v502_v14 = vld [vmem:[%s661_s1 + $0xc0] sm:$0xff]  ;;  %v489_v18 = vld [vmem:[%s661_s1 + $0x58] sm:$0xff]  ;;  %v488_v22 = vld [vmem:[%s661_s1 + $0x50] sm:$0xff] }
   0x8   :  { %293 = vmatpush.bf16.msra.mxu2 %v500_v5  ;;  %v497_v19 = vld [vmem:[%s661_s1 + $0x98] sm:$0xff]  ;;  %v496_v23 = vld [vmem:[%s661_s1 + $0x90] sm:$0xff]  ;;  %v479_v24 = vld [vmem:[%s661_s1 + $0x8] sm:$0xff] }
   0x9   :  { %312 = vmatpush.bf16.msra.mxu3 %v503_v10  ;;  %v487_v25 = vld [vmem:[%s661_s1 + $0x48] sm:$0xff]  ;;  %v478_v27 = vld [vmem:[%s661_s1] sm:$0xff]  ;;  %v476_v30 = vld [vmem:[%s662_s0 + $0xc] sm:$0xf0] }
   0xa   :  { %266 = vmatpush.bf16.msra.mxu0 %v483_v7  ;;  %v495_v26 = vld [vmem:[%s661_s1 + $0x88] sm:$0xff]  ;;  %v486_v28 = vld [vmem:[%s661_s1 + $0x40] sm:$0xff]  ;;  %v353_v32 = vld [vmem:[%s662_s0 + $0x10] sm:$0xf0] }
   0xb   :  { %280 = vmatpush.bf16.msra.mxu1 %v491_v8  ;;  %v351_v29 = vld [vmem:[%s662_s0] sm:$0xf]  ;;  %v474_v31 = vld [vmem:[%s662_s0 + $0x4] sm:$0xf]  ;;  %v359_v34 = vld [vmem:[%s662_s0 + $0x8] sm:$0xf] }
   0xc   :  { %294 = vmatpush.bf16.msra.mxu2 %v499_v9  ;;  %v494_v33 = vld [vmem:[%s661_s1 + $0x80] sm:$0xff]  ;;  %v477_v35 = vld [vmem:[%s662_s0 + $0x14] sm:$0xf0]  ;;  %v352_v36 = vor.u32 %v476_v30, %v351_v29  ;;  %v356_v37 = vor.u32 %v474_v31, %v353_v32 }
   0xd   :  { %313 = vmatpush.bf16.msra.mxu3 %v502_v14  ;;  %v360_v38 = vor.u32 %v477_v35, %v359_v34  ;;  %v509_v45 = vld [vmem:[%s663_s2] ss:$0 sm:$0xff] }
   0xe   :  { %267 = vmatpush.bf16.msra.mxu0 %v482_v11  ;;  %v506_v46 = vld [vmem:[%s665_s4] sm:$0xff]  }
   0xf   :  { %281 = vmatpush.bf16.msra.mxu1 %v490_v12  ;;  %v510_v48 = vld [vmem:[%s664_s3] ss:$0 sm:$0xff]  ;;  %v507_v52 = vunpack.c.l.bf16 %v506_v46  ;;  %v508_v63 = vunpack.c.h.bf16 %v506_v46 }
  0x10   :  { %295 = vmatpush.bf16.msra.mxu2 %v498_v13  ;;  %473 = vmatmul.msk.bf16.vlgmr.msra.gmra.mxu3 %vm260_vm0, %v364_v20 }
  0x12   :  { %268 = vmatpush.bf16.msra.mxu0 %v481_v17 }
  0x13   :  { %282 = vmatpush.bf16.msra.mxu1 %v489_v18 }
  0x14   :  { %296 = vmatpush.bf16.msra.mxu2 %v497_v19 }
  0x16   :  { %269 = vmatpush.bf16.msra.mxu0 %v480_v21 }
  0x17   :  { %283 = vmatpush.bf16.msra.mxu1 %v488_v22 }
  0x18   :  { %297 = vmatpush.bf16.msra.mxu2 %v496_v23 }
  0x1a   :  { %270 = vmatpush.bf16.msra.mxu0 %v479_v24 }
  0x1b   :  { %284 = vmatpush.bf16.msra.mxu1 %v487_v25 }
  0x1c   :  { %298 = vmatpush.bf16.msra.mxu2 %v495_v26 }
  0x1e   :  { %271 = vmatpush.bf16.msra.mxu0 %v478_v27 }
  0x1f   :  { %285 = vmatpush.bf16.msra.mxu1 %v486_v28 }
  0x20   :  { %299 = vmatpush.bf16.msra.mxu2 %v494_v33 }
  0x21   :  { %272 = vmatmul.bf16.vlgmr.msra.gmra.mxu0 %v352_v36 }
  0x22   :  { %286 = vmatmul.bf16.vlgmr.msra.gmra.mxu1 %v356_v37 }
  0x23   :  { %300 = vmatmul.bf16.vlgmr.msra.gmra.mxu2 %v360_v38 }
  0x93   :  { %v315_v42 = vpop.f32.mrf.mxu3 }
  0x9b   :  { %v317_v58 = vpop.f32.mrf.mxu3 }
  0x9e   :  { %v273_v39 = vpop.f32.mrf.mxu0 }
  0x9f   :  { %v287_v40 = vpop.f32.mrf.mxu1 }
  0xa0   :  { %v288_v41 = vadd.f32 %v287_v40, %v273_v39 }
  0xa6   :  { %v301_v43 = vpop.f32.mrf.mxu2  ;;  %v275_v49 = vpop.f32.mrf.mxu0 }
  0xa7   :  { %v302_v44 = vadd.f32 %v301_v43, %v288_v41  ;;  %v289_v50 = vpop.f32.mrf.mxu1 }
  0xa8   :  { %v290_v54 = vadd.f32 %v289_v50, %v275_v49 }
  0xa9   :  { %v316_v47 = vadd.f32 %v315_v42, %v302_v44 }
  0xab   :  { %v324_v51 = vmul.f32 %v509_v45, %v316_v47 }
  0xad   :  { %v330_v53 = vadd.f32 %v510_v48, %v324_v51 }
  0xae   :  { %v303_v55 = vpop.f32.mrf.mxu2 }
  0xaf   :  { %v336_v56 = vadd.f32 %v507_v52, %v330_v53  ;;  %v304_v57 = vadd.f32 %v303_v55, %v290_v54 }
  0xb1   :  { %v338_v59 = vmax.f32 %v336_v56, 0.0  ;;  %v318_v60 = vadd.f32 %v317_v58, %v304_v57 }
  0xb3   :  { %v340_v61 = vpack.c.bf16 %v338_v59, %v338_v59  ;;  %v325_v62 = vmul.f32 %v509_v45, %v318_v60 }
  0xb5   :  { %343 = vst.msk [vmem:[%s666_s5] sm:$0xf] %vm342_vm1, %v340_v61  ;;  %v331_v0 = vadd.f32 %v510_v48, %v325_v62 }
  0xb7   :  { %v337_v1 = vadd.f32 %v508_v63, %v331_v0 }
  0xb9   :  { %v339_v2 = vmax.f32 %v337_v1, 0.0 }
  0xbb   :  { %v341_v3 = vpack.c.bf16 %v339_v2, %v339_v2 }
  0xbd   :  { %344 = vst.msk [vmem:[%s666_s5 + $0x4] sm:$0xf] %vm342_vm1, %v341_v3 }

// kernel: resnet_forward.34
= control target key start
LH: loop header
LB: loop body
LE: loop exit
PB: predicated region body
PF: predicated region fallthrough
CT: control target
= control target key end

     0   :  { %vm246_vm0 = vcmask 392192   ;;  %vm313_vm1 = vcmask 253952   ;;  %s618_s0 = inlined_call_operand.vmem [shape: bf16[2,1,1,1,27,32], index: 0, kind: input, shape index: {}, may-alias: {0,5}]   ;;  %s619_s1 = inlined_call_operand.vmem [shape: bf16[2,432], index: 1, kind: input, shape index: {}]   ;;  %s620_s2 = inlined_call_operand.vmem [shape: bf16[432,32], index: 2, kind: input, shape index: {}]   ;;  %s621_s3 = inlined_call_operand.vmem [shape: f32[1,32], index: 3, kind: input, shape index: {}]   ;;  %s622_s4 = inlined_call_operand.vmem [shape: f32[1,32], index: 4, kind: input, shape index: {}]   ;;  %s623_s5 = inlined_call_operand.vmem [shape: bf16[2,1,1,1,27,32], index: 5, kind: output, shape index: {}, may-alias: {0,5}]  }
   0x1   :  { %v473_v0 = vld [vmem:[%s620_s2 + $0x38] sm:$0xff]  ;;  %v472_v3 = vld [vmem:[%s620_s2 + $0x30] sm:$0xff]  ;;  %v471_v7 = vld [vmem:[%s620_s2 + $0x28] sm:$0xff] }
   0x2   :  { %v481_v1 = vld [vmem:[%s620_s2 + $0x78] sm:$0xff]  ;;  %249 = vmatpush.bf16.msra.mxu0 %v473_v0  ;;  %v480_v4 = vld [vmem:[%s620_s2 + $0x70] sm:$0xff]  ;;  %v479_v8 = vld [vmem:[%s620_s2 + $0x68] sm:$0xff] }
   0x3   :  { %v489_v2 = vld [vmem:[%s620_s2 + $0xb8] sm:$0xff]  ;;  %262 = vmatpush.bf16.msra.mxu1 %v481_v1  ;;  %v488_v5 = vld [vmem:[%s620_s2 + $0xb0] sm:$0xff]  ;;  %v487_v9 = vld [vmem:[%s620_s2 + $0xa8] sm:$0xff] }
   0x4   :  { %275 = vmatpush.bf16.msra.mxu2 %v489_v2  ;;  %v492_v6 = vld [vmem:[%s620_s2 + $0xd0] sm:$0xff]  ;;  %v491_v10 = vld [vmem:[%s620_s2 + $0xc8] sm:$0xff]  ;;  %v20_v11 = vld [vmem:[%s619_s1] sm:$0xf] }
   0x5   :  { %293 = vmatpush.bf16.msra.mxu3 %v492_v6  ;;  %76 = vst [vmem:[#allocation1] ss:$9 sm:$0xff] %v20_v11  ;;  %v470_v12 = vld [vmem:[%s620_s2 + $0x20] sm:$0xff]  ;;  %v469_v16 = vld [vmem:[%s620_s2 + $0x18] sm:$0xff]  ;;  %v468_v20 = vld [vmem:[%s620_s2 + $0x10] sm:$0xff] }
   0x6   :  { %250 = vmatpush.bf16.msra.mxu0 %v472_v3  ;;  %v478_v13 = vld [vmem:[%s620_s2 + $0x60] sm:$0xff]  ;;  %v477_v17 = vld [vmem:[%s620_s2 + $0x58] sm:$0xff]  ;;  %v476_v21 = vld [vmem:[%s620_s2 + $0x50] sm:$0xff] }
   0x7   :  { %263 = vmatpush.bf16.msra.mxu1 %v480_v4  ;;  %v486_v14 = vld [vmem:[%s620_s2 + $0xa0] sm:$0xff]  ;;  %v485_v18 = vld [vmem:[%s620_s2 + $0x98] sm:$0xff]  ;;  %v484_v22 = vld [vmem:[%s620_s2 + $0x90] sm:$0xff] }
   0x8   :  { %276 = vmatpush.bf16.msra.mxu2 %v488_v5  ;;  %v490_v15 = vld [vmem:[%s620_s2 + $0xc0] sm:$0xff]  ;;  %v467_v23 = vld [vmem:[%s620_s2 + $0x8] sm:$0xff] }
   0x9   :  { %294 = vmatpush.bf16.msra.mxu3 %v491_v10  ;;  %v475_v24 = vld [vmem:[%s620_s2 + $0x48] sm:$0xff]  ;;  %v466_v26 = vld [vmem:[%s620_s2] sm:$0xff] }
   0xa   :  { %251 = vmatpush.bf16.msra.mxu0 %v471_v7  ;;  %v483_v25 = vld [vmem:[%s620_s2 + $0x88] sm:$0xff]  ;;  %v474_v27 = vld [vmem:[%s620_s2 + $0x40] sm:$0xff] }
   0xb   :  { %264 = vmatpush.bf16.msra.mxu1 %v479_v8  ;;  %v482_v28 = vld [vmem:[%s620_s2 + $0x80] sm:$0xff] }
   0xc   :  { %277 = vmatpush.bf16.msra.mxu2 %v487_v9  ;;  %v80_v19 = vld [vmem:[#allocation1 + $0x1b] sm:$0xff]  ;;  %v78_v30 = vld [vmem:[#allocation1 + $0x9] sm:$0xff]  ;;  %v79_v31 = vld [vmem:[#allocation1 + $0x12] sm:$0xff] }
   0xd   :  { %295 = vmatpush.bf16.msra.mxu3 %v490_v15  ;;  %v77_v29 = vld [vmem:[#allocation1] sm:$0xff] }
   0xe   :  { %252 = vmatpush.bf16.msra.mxu0 %v470_v12  ;;  %v493_v39 = vld [vmem:[%s621_s3] ss:$0 sm:$0xff] }
   0xf   :  { %265 = vmatpush.bf16.msra.mxu1 %v478_v13  ;;  %v494_v43 = vld [vmem:[%s622_s4] ss:$0 sm:$0xff] }
  0x10   :  { %278 = vmatpush.bf16.msra.mxu2 %v486_v14  ;;  %464 = vmatmul.msk.bf16.vlgmr.msra.gmra.mxu3 %vm246_vm0, %v80_v19 }
  0x12   :  { %253 = vmatpush.bf16.msra.mxu0 %v469_v16 }
  0x13   :  { %266 = vmatpush.bf16.msra.mxu1 %v477_v17 }
  0x14   :  { %279 = vmatpush.bf16.msra.mxu2 %v485_v18 }
  0x16   :  { %254 = vmatpush.bf16.msra.mxu0 %v468_v20 }
  0x17   :  { %267 = vmatpush.bf16.msra.mxu1 %v476_v21 }
  0x18   :  { %280 = vmatpush.bf16.msra.mxu2 %v484_v22 }
  0x1a   :  { %255 = vmatpush.bf16.msra.mxu0 %v467_v23 }
  0x1b   :  { %268 = vmatpush.bf16.msra.mxu1 %v475_v24 }
  0x1c   :  { %281 = vmatpush.bf16.msra.mxu2 %v483_v25 }
  0x1e   :  { %256 = vmatpush.bf16.msra.mxu0 %v466_v26 }
  0x1f   :  { %269 = vmatpush.bf16.msra.mxu1 %v474_v27 }
  0x20   :  { %282 = vmatpush.bf16.msra.mxu2 %v482_v28 }
  0x21   :  { %257 = vmatmul.bf16.vlgmr.msra.gmra.mxu0 %v77_v29 }
  0x22   :  { %270 = vmatmul.bf16.vlgmr.msra.gmra.mxu1 %v78_v30 }
  0x23   :  { %283 = vmatmul.bf16.vlgmr.msra.gmra.mxu2 %v79_v31 }
  0x93   :  { %v297_v32 = vpop.f32.mrf.mxu3 }
  0x9b   :  { %v299_v35 = vpop.f32.mrf.mxu3 }
  0x9e   :  { %v258_v33 = vpop.f32.mrf.mxu0 }
  0x9f   :  { %v271_v34 = vpop.f32.mrf.mxu1 }
  0xa0   :  { %v272_v36 = vadd.f32 %v271_v34, %v258_v33 }
  0xa6   :  { %v284_v37 = vpop.f32.mrf.mxu2  ;;  %v260_v40 = vpop.f32.mrf.mxu0 }
  0xa7   :  { %v285_v38 = vadd.f32 %v284_v37, %v272_v36  ;;  %v273_v41 = vpop.f32.mrf.mxu1 }
  0xa9   :  { %v298_v42 = vadd.f32 %v297_v32, %v285_v38 }
  0xab   :  { %v305_v44 = vmul.f32 %v493_v39, %v298_v42 }
  0xad   :  { %v310_v45 = vadd.f32 %v494_v43, %v305_v44 }
  0xae   :  { %v286_v46 = vpop.f32.mrf.mxu2 }
  0xaf   :  { %v311_v47 = vmax.f32 %v310_v45, 0.0 }
  0xb1   :  { %v312_v48 = vpack.c.bf16 %v311_v47, %v311_v47 }
  0xb3   :  { %314 = vst.msk [vmem:[#allocation2] sm:$0x1] %vm313_vm1, %v312_v48 }
  0xba   :  { %v333_v49 = vld [vmem:[#allocation2] sm:$0x1] }
  0xbb   :  { %465 = vst [vmem:[%s623_s5 + $0xd] sm:$0x1] %v333_v49 }

// kernel: resnet_forward.27
= control target key start
LH: loop header
LB: loop body
LE: loop exit
PB: predicated region body
PF: predicated region fallthrough
CT: control target
= control target key end

     0   :  { %vm27_vm0 = vcmask 130048   ;;  %vm55_vm1 = vcmask 253952   ;;  %s109_s1 = inlined_call_operand.vmem [shape: bf16[16,32], index: 1, kind: input, shape index: {}]   ;;  %s110_s0 = inlined_call_operand.vmem [shape: bf16[2,16], index: 0, kind: input, shape index: {}]   ;;  %s111_s2 = inlined_call_operand.vmem [shape: f32[1,32], index: 2, kind: input, shape index: {}]   ;;  %s112_s3 = inlined_call_operand.vmem [shape: f32[1,32], index: 3, kind: input, shape index: {}]   ;;  %s113_s4 = inlined_call_operand.vmem [shape: bf16[2,32], index: 4, kind: output, shape index: {}]  }
   0x1   :  { %v66_v0 = vld [vmem:[%s109_s1] sm:$0xff] }
   0x2   :  { %38 = vmatpush.bf16.msra.mxu0 %v66_v0  ;;  %v18_v1 = vld [vmem:[%s110_s0] sm:$0x1] }
   0x3   :  { %v67_v2 = vld [vmem:[%s111_s2] ss:$0 sm:$0xff] }
   0x4   :  { %v68_v3 = vld [vmem:[%s112_s3] ss:$0 sm:$0xff] }
   0x5   :  { %65 = vmatmul.msk.bf16.vlgmr.msra.gmra.mxu0 %vm27_vm0, %v18_v1 }
  0x82   :  { %v40_v4 = vpop.f32.mrf.mxu0 }
  0x83   :  { %v48_v5 = vmul.f32 %v67_v2, %v40_v4 }
  0x85   :  { %v53_v6 = vadd.f32 %v68_v3, %v48_v5 }
  0x87   :  { %v54_v7 = vpack.c.bf16 %v53_v6, %v53_v6 }
  0x89   :  { %56 = vst.msk [vmem:[%s113_s4] sm:$0x1] %vm55_vm1, %v54_v7 }
  0x8a   :  { %v42_v8 = vpop.f32.mrf.mxu0 }

// kernel: resnet_forward.28
= control target key start
LH: loop header
LB: loop body
LE: loop exit
PB: predicated region body
PF: predicated region fallthrough
CT: control target
= control target key end

     0   :  { %vm469_vm0 = vcmask 785408   ;;  %vm578_vm1 = vcmask 253952   ;;  %s1064_s1 = inlined_call_operand.vmem [shape: bf16[864,32], index: 1, kind: input, shape index: {}]   ;;  %s1065_s0 = inlined_call_operand.vmem [shape: bf16[2,864], index: 0, kind: input, shape index: {}]   ;;  %s1066_s2 = inlined_call_operand.vmem [shape: f32[1,32], index: 2, kind: input, shape index: {}]   ;;  %s1067_s3 = inlined_call_operand.vmem [shape: f32[1,32], index: 3, kind: input, shape index: {}]   ;;  %s1068_s4 = inlined_call_operand.vmem [shape: bf16[2,32], index: 4, kind: input, shape index: {}]   ;;  %s1069_s5 = inlined_call_operand.vmem [shape: bf16[2,32], index: 5, kind: output, shape index: {}]  }
   0x1   :  { %v808_v0 = vld [vmem:[%s1064_s1 + $0x38] sm:$0xff]  ;;  %v807_v3 = vld [vmem:[%s1064_s1 + $0x30] sm:$0xff]  ;;  %v806_v8 = vld [vmem:[%s1064_s1 + $0x28] sm:$0xff] }
   0x2   :  { %v816_v1 = vld [vmem:[%s1064_s1 + $0x78] sm:$0xff]  ;;  %472 = vmatpush.bf16.msra.mxu0 %v808_v0  ;;  %v815_v4 = vld [vmem:[%s1064_s1 + $0x70] sm:$0xff]  ;;  %v814_v9 = vld [vmem:[%s1064_s1 + $0x68] sm:$0xff] }
   0x3   :  { %v824_v2 = vld [vmem:[%s1064_s1 + $0xb8] sm:$0xff]  ;;  %485 = vmatpush.bf16.msra.mxu1 %v816_v1  ;;  %v823_v5 = vld [vmem:[%s1064_s1 + $0xb0] sm:$0xff]  ;;  %v822_v10 = vld [vmem:[%s1064_s1 + $0xa8] sm:$0xff] }
   0x4   :  { %498 = vmatpush.bf16.msra.mxu2 %v824_v2  ;;  %v832_v6 = vld [vmem:[%s1064_s1 + $0xf8] sm:$0xff]  ;;  %v831_v7 = vld [vmem:[%s1064_s1 + $0xf0] sm:$0xff]  ;;  %v830_v11 = vld [vmem:[%s1064_s1 + $0xe8] sm:$0xff] }
   0x5   :  { %511 = vmatpush.bf16.msra.mxu3 %v832_v6  ;;  %v805_v12 = vld [vmem:[%s1064_s1 + $0x20] sm:$0xff]  ;;  %v804_v17 = vld [vmem:[%s1064_s1 + $0x18] sm:$0xff]  ;;  %v803_v21 = vld [vmem:[%s1064_s1 + $0x10] sm:$0xff] }
   0x6   :  { %473 = vmatpush.bf16.msra.mxu0 %v807_v3  ;;  %v813_v13 = vld [vmem:[%s1064_s1 + $0x60] sm:$0xff]  ;;  %v812_v18 = vld [vmem:[%s1064_s1 + $0x58] sm:$0xff]  ;;  %v811_v22 = vld [vmem:[%s1064_s1 + $0x50] sm:$0xff] }
   0x7   :  { %486 = vmatpush.bf16.msra.mxu1 %v815_v4  ;;  %v821_v14 = vld [vmem:[%s1064_s1 + $0xa0] sm:$0xff]  ;;  %v820_v19 = vld [vmem:[%s1064_s1 + $0x98] sm:$0xff]  ;;  %v819_v23 = vld [vmem:[%s1064_s1 + $0x90] sm:$0xff] }
   0x8   :  { %499 = vmatpush.bf16.msra.mxu2 %v823_v5  ;;  %v21_v15 = vld [vmem:[%s1065_s0] sm:$0x7f]  ;;  %v828_v20 = vld [vmem:[%s1064_s1 + $0xd8] sm:$0xff]  ;;  %v827_v24 = vld [vmem:[%s1064_s1 + $0xd0] sm:$0xff] }
   0x9   :  { %512 = vmatpush.bf16.msra.mxu3 %v831_v7  ;;  %v829_v16 = vld [vmem:[%s1064_s1 + $0xe0] sm:$0xff]  ;;  %131 = vst [vmem:[#allocation1] ss:$9 sm:$0xff] %v21_v15  ;;  %v802_v25 = vld [vmem:[%s1064_s1 + $0x8] sm:$0xff]  ;;  %v840_v32 = vld [vmem:[%s1064_s1 + $0x138] sm:$0xff] }
   0xa   :  { %474 = vmatpush.bf16.msra.mxu0 %v806_v8  ;;  %v810_v26 = vld [vmem:[%s1064_s1 + $0x48] sm:$0xff]  ;;  %v801_v29 = vld [vmem:[%s1064_s1] sm:$0xff]  ;;  %v848_v33 = vld [vmem:[%s1064_s1 + $0x178] sm:$0xff] }
   0xb   :  { %487 = vmatpush.bf16.msra.mxu1 %v814_v9  ;;  %v818_v27 = vld [vmem:[%s1064_s1 + $0x88] sm:$0xff]  ;;  %v809_v30 = vld [vmem:[%s1064_s1 + $0x40] sm:$0xff]  ;;  %v839_v38 = vld [vmem:[%s1064_s1 + $0x130] sm:$0xff] }
   0xc   :  { %500 = vmatpush.bf16.msra.mxu2 %v822_v10  ;;  %v826_v28 = vld [vmem:[%s1064_s1 + $0xc8] sm:$0xff]  ;;  %v817_v31 = vld [vmem:[%s1064_s1 + $0x80] sm:$0xff]  ;;  %v847_v40 = vld [vmem:[%s1064_s1 + $0x170] sm:$0xff] }
   0xd   :  { %513 = vmatpush.bf16.msra.mxu3 %v830_v11  ;;  %v854_v34 = vld [vmem:[%s1064_s1 + $0x1a8] sm:$0xff]  ;;  %v825_v37 = vld [vmem:[%s1064_s1 + $0xc0] sm:$0xff]  ;;  %v852_v45 = vld [vmem:[%s1064_s1 + $0x198] sm:$0xff] }
   0xe   :  { %475 = vmatpush.bf16.msra.mxu0 %v805_v12  ;;  %v853_v41 = vld [vmem:[%s1064_s1 + $0x1a0] sm:$0xff]  ;;  %v838_v43 = vld [vmem:[%s1064_s1 + $0x128] sm:$0xff]  ;;  %v851_v48 = vld [vmem:[%s1064_s1 + $0x190] sm:$0xff] }
   0xf   :  { %488 = vmatpush.bf16.msra.mxu1 %v813_v13  ;;  %v846_v44 = vld [vmem:[%s1064_s1 + $0x168] sm:$0xff]  ;;  %v837_v46 = vld [vmem:[%s1064_s1 + $0x120] sm:$0xff]  ;;  %v836_v49 = vld [vmem:[%s1064_s1 + $0x118] sm:$0xff] }
  0x10   :  { %501 = vmatpush.bf16.msra.mxu2 %v821_v14  ;;  %v132_v35 = vld [vmem:[#allocation1] sm:$0xff]  ;;  %v133_v36 = vld [vmem:[#allocation1 + $0x9] sm:$0xff]  ;;  %v134_v39 = vld [vmem:[#allocation1 + $0x12] sm:$0xff] }
  0x11   :  { %514 = vmatpush.bf16.msra.mxu3 %v829_v16  ;;  %v135_v42 = vld [vmem:[#allocation1 + $0x1b] sm:$0xff]  ;;  %v850_v51 = vld [vmem:[%s1064_s1 + $0x188] sm:$0xff]  ;;  %v835_v52 = vld [vmem:[%s1064_s1 + $0x110] sm:$0xff] }
  0x12   :  { %476 = vmatpush.bf16.msra.mxu0 %v804_v17  ;;  %v845_v47 = vld [vmem:[%s1064_s1 + $0x160] sm:$0xff]  ;;  %v844_v50 = vld [vmem:[%s1064_s1 + $0x158] sm:$0xff]  ;;  %v843_v53 = vld [vmem:[%s1064_s1 + $0x150] sm:$0xff] }
  0x13   :  { %489 = vmatpush.bf16.msra.mxu1 %v812_v18  ;;  %v849_v54 = vld [vmem:[%s1064_s1 + $0x180] sm:$0xff]  ;;  %v834_v55 = vld [vmem:[%s1064_s1 + $0x108] sm:$0xff]  ;;  %v138_v56 = vld [vmem:[#allocation1 + $0x36] sm:$0xff] }
  0x14   :  { %502 = vmatpush.bf16.msra.mxu2 %v820_v19  ;;  %v842_v57 = vld [vmem:[%s1064_s1 + $0x148] sm:$0xff]  ;;  %v833_v58 = vld [vmem:[%s1064_s1 + $0x100] sm:$0xff] }
  0x15   :  { %515 = vmatpush.bf16.msra.mxu3 %v828_v20  ;;  %v841_v59 = vld [vmem:[%s1064_s1 + $0x140] sm:$0xff]  ;;  %v137_v61 = vld [vmem:[#allocation1 + $0x2d] sm:$0xff] }
  0x16   :  { %477 = vmatpush.bf16.msra.mxu0 %v803_v21  ;;  %v136_v60 = vld [vmem:[#allocation1 + $0x24] sm:$0xff]  ;;  %v855_v14 = vld [vmem:[%s1066_s2] ss:$0 sm:$0xff] }
  0x17   :  { %490 = vmatpush.bf16.msra.mxu1 %v811_v22  ;;  %v573_v15 = vld [vmem:[%s1068_s4] sm:$0x1] }
  0x18   :  { %503 = vmatpush.bf16.msra.mxu2 %v819_v23  ;;  %v856_v17 = vld [vmem:[%s1067_s3] ss:$0 sm:$0xff]  ;;  %v574_v19 = vunpack.c.l.bf16 %v573_v15 }
  0x19   :  { %516 = vmatpush.bf16.msra.mxu3 %v827_v24 }
  0x1a   :  { %478 = vmatpush.bf16.msra.mxu0 %v802_v25 }
  0x1b   :  { %491 = vmatpush.bf16.msra.mxu1 %v810_v26 }
  0x1c   :  { %504 = vmatpush.bf16.msra.mxu2 %v818_v27 }
  0x1d   :  { %517 = vmatpush.bf16.msra.mxu3 %v826_v28 }
  0x1e   :  { %479 = vmatpush.bf16.msra.mxu0 %v801_v29 }
  0x1f   :  { %492 = vmatpush.bf16.msra.mxu1 %v809_v30 }
  0x20   :  { %505 = vmatpush.bf16.msra.mxu2 %v817_v31 }
  0x21   :  { %480 = vmatmul.bf16.vlgmr.msra.gmra.mxu0 %v132_v35  ;;  %518 = vmatpush.bf16.msra.mxu3 %v825_v37 }
  0x22   :  { %524 = vmatpush.bf16.msrb.mxu0 %v840_v32  ;;  %493 = vmatmul.bf16.vlgmr.msra.gmra.mxu1 %v133_v36 }
  0x23   :  { %537 = vmatpush.bf16.msrb.mxu1 %v848_v33  ;;  %506 = vmatmul.bf16.vlgmr.msra.gmra.mxu2 %v134_v39 }
  0x24   :  { %552 = vmatpush.bf16.msrb.mxu2 %v854_v34  ;;  %519 = vmatmul.bf16.vlgmr.msra.gmra.mxu3 %v135_v42 }
  0x26   :  { %525 = vmatpush.bf16.msrb.mxu0 %v839_v38 }
  0x27   :  { %538 = vmatpush.bf16.msrb.mxu1 %v847_v40 }
  0x28   :  { %553 = vmatpush.bf16.msrb.mxu2 %v853_v41 }
  0x2a   :  { %526 = vmatpush.bf16.msrb.mxu0 %v838_v43 }
  0x2b   :  { %539 = vmatpush.bf16.msrb.mxu1 %v846_v44 }
  0x2c   :  { %554 = vmatpush.bf16.msrb.mxu2 %v852_v45 }
  0x2e   :  { %527 = vmatpush.bf16.msrb.mxu0 %v837_v46 }
  0x2f   :  { %540 = vmatpush.bf16.msrb.mxu1 %v845_v47 }
  0x30   :  { %555 = vmatpush.bf16.msrb.mxu2 %v851_v48 }
  0x32   :  { %528 = vmatpush.bf16.msrb.mxu0 %v836_v49 }
  0x33   :  { %541 = vmatpush.bf16.msrb.mxu1 %v844_v50 }
  0x34   :  { %556 = vmatpush.bf16.msrb.mxu2 %v850_v51 }
  0x36   :  { %529 = vmatpush.bf16.msrb.mxu0 %v835_v52 }
  0x37   :  { %542 = vmatpush.bf16.msrb.mxu1 %v843_v53 }
  0x38   :  { %557 = vmatpush.bf16.msrb.mxu2 %v849_v54 }
  0x3a   :  { %530 = vmatpush.bf16.msrb.mxu0 %v834_v55 }
  0x3b   :  { %800 = vmatmul.msk.bf16.vlgmr.msrb.gmra.mxu2 %vm469_vm0, %v138_v56  ;;  %543 = vmatpush.bf16.msrb.mxu1 %v842_v57 }
  0x3e   :  { %531 = vmatpush.bf16.msrb.mxu0 %v833_v58 }
  0x3f   :  { %544 = vmatpush.bf16.msrb.mxu1 %v841_v59 }
  0x41   :  { %532 = vmatmul.bf16.vlgmr.msrb.gmra.mxu0 %v136_v60 }
  0x42   :  { %545 = vmatmul.bf16.vlgmr.msrb.gmra.mxu1 %v137_v61 }
  0x9e   :  { %v481_v62 = vpop.f32.mrf.mxu0 }
  0x9f   :  { %v494_v63 = vpop.f32.mrf.mxu1 }
  0xa0   :  { %v495_v6 = vadd.f32 %v494_v63, %v481_v62 }
  0xa6   :  { %v507_v0 = vpop.f32.mrf.mxu2  ;;  %v483_v1 = vpop.f32.mrf.mxu0 }
  0xa7   :  { %v496_v2 = vpop.f32.mrf.mxu1  ;;  %v520_v3 = vpop.f32.mrf.mxu3  ;;  %v508_v7 = vadd.f32 %v507_v0, %v495_v6 }
  0xa9   :  { %v521_v8 = vadd.f32 %v520_v3, %v508_v7 }
  0xae   :  { %v509_v4 = vpop.f32.mrf.mxu2 }
  0xaf   :  { %v522_v5 = vpop.f32.mrf.mxu3 }
  0xbe   :  { %v559_v9 = vpop.f32.mrf.mxu2  ;;  %v533_v10 = vpop.f32.mrf.mxu0 }
  0xbf   :  { %v534_v11 = vadd.f32 %v533_v10, %v521_v8  ;;  %v546_v12 = vpop.f32.mrf.mxu1 }
  0xc1   :  { %v547_v13 = vadd.f32 %v546_v12, %v534_v11 }
  0xc3   :  { %v560_v16 = vadd.f32 %v559_v9, %v547_v13 }
  0xc5   :  { %v567_v18 = vmul.f32 %v855_v14, %v560_v16 }
  0xc6   :  { %v561_v20 = vpop.f32.mrf.mxu2  ;;  %v535_v21 = vpop.f32.mrf.mxu0 }
  0xc7   :  { %v572_v22 = vadd.f32 %v856_v17, %v567_v18  ;;  %v548_v23 = vpop.f32.mrf.mxu1 }
  0xc9   :  { %v575_v24 = vadd.f32 %v574_v19, %v572_v22 }
  0xcb   :  { %v576_v25 = vmax.f32 %v575_v24, 0.0 }
  0xcd   :  { %v577_v26 = vpack.c.bf16 %v576_v25, %v576_v25 }
  0xcf   :  { %579 = vst.msk [vmem:[%s1069_s5] sm:$0x1] %vm578_vm1, %v577_v26 }

// kernel: resnet_forward.35
= control target key start
LH: loop header
LB: loop body
LE: loop exit
PB: predicated region body
PF: predicated region fallthrough
CT: control target
= control target key end

     0   :  { %vm468_vm0 = vcmask 785408   ;;  %vm574_vm1 = vcmask 516096   ;;  %s1095_s0 = inlined_call_operand.vmem [shape: bf16[2,1,1,1,27,64], index: 0, kind: input, shape index: {}, may-alias: {0,5}]   ;;  %s1096_s1 = inlined_call_operand.vmem [shape: bf16[2,864], index: 1, kind: input, shape index: {}]   ;;  %s1097_s2 = inlined_call_operand.vmem [shape: bf16[864,64], index: 2, kind: input, shape index: {}]   ;;  %s1098_s3 = inlined_call_operand.vmem [shape: f32[1,64], index: 3, kind: input, shape index: {}]   ;;  %s1099_s4 = inlined_call_operand.vmem [shape: f32[1,64], index: 4, kind: input, shape index: {}]   ;;  %s1100_s5 = inlined_call_operand.vmem [shape: bf16[2,1,1,1,27,64], index: 5, kind: output, shape index: {}, may-alias: {0,5}]  }
   0x1   :  { %v842_v0 = vld [vmem:[%s1097_s2 + $0x38] sm:$0xff]  ;;  %v841_v3 = vld [vmem:[%s1097_s2 + $0x30] sm:$0xff]  ;;  %v840_v8 = vld [vmem:[%s1097_s2 + $0x28] sm:$0xff] }
   0x2   :  { %v850_v1 = vld [vmem:[%s1097_s2 + $0x78] sm:$0xff]  ;;  %471 = vmatpush.bf16.msra.mxu0 %v842_v0  ;;  %v849_v4 = vld [vmem:[%s1097_s2 + $0x70] sm:$0xff]  ;;  %v848_v9 = vld [vmem:[%s1097_s2 + $0x68] sm:$0xff] }
   0x3   :  { %v858_v2 = vld [vmem:[%s1097_s2 + $0xb8] sm:$0xff]  ;;  %484 = vmatpush.bf16.msra.mxu1 %v850_v1  ;;  %v857_v5 = vld [vmem:[%s1097_s2 + $0xb0] sm:$0xff]  ;;  %v856_v10 = vld [vmem:[%s1097_s2 + $0xa8] sm:$0xff] }
   0x4   :  { %497 = vmatpush.bf16.msra.mxu2 %v858_v2  ;;  %v866_v6 = vld [vmem:[%s1097_s2 + $0xf8] sm:$0xff]  ;;  %v865_v7 = vld [vmem:[%s1097_s2 + $0xf0] sm:$0xff]  ;;  %v864_v11 = vld [vmem:[%s1097_s2 + $0xe8] sm:$0xff] }
   0x5   :  { %510 = vmatpush.bf16.msra.mxu3 %v866_v6  ;;  %v839_v12 = vld [vmem:[%s1097_s2 + $0x20] sm:$0xff]  ;;  %v838_v17 = vld [vmem:[%s1097_s2 + $0x18] sm:$0xff]  ;;  %v837_v21 = vld [vmem:[%s1097_s2 + $0x10] sm:$0xff] }
   0x6   :  { %472 = vmatpush.bf16.msra.mxu0 %v841_v3  ;;  %v847_v13 = vld [vmem:[%s1097_s2 + $0x60] sm:$0xff]  ;;  %v846_v18 = vld [vmem:[%s1097_s2 + $0x58] sm:$0xff]  ;;  %v845_v22 = vld [vmem:[%s1097_s2 + $0x50] sm:$0xff] }
   0x7   :  { %485 = vmatpush.bf16.msra.mxu1 %v849_v4  ;;  %v855_v14 = vld [vmem:[%s1097_s2 + $0xa0] sm:$0xff]  ;;  %v854_v19 = vld [vmem:[%s1097_s2 + $0x98] sm:$0xff]  ;;  %v853_v23 = vld [vmem:[%s1097_s2 + $0x90] sm:$0xff] }
   0x8   :  { %498 = vmatpush.bf16.msra.mxu2 %v857_v5  ;;  %v20_v15 = vld [vmem:[%s1096_s1] sm:$0x7f]  ;;  %v862_v20 = vld [vmem:[%s1097_s2 + $0xd8] sm:$0xff]  ;;  %v861_v24 = vld [vmem:[%s1097_s2 + $0xd0] sm:$0xff] }
   0x9   :  { %511 = vmatpush.bf16.msra.mxu3 %v865_v7  ;;  %v863_v16 = vld [vmem:[%s1097_s2 + $0xe0] sm:$0xff]  ;;  %130 = vst [vmem:[#allocation1] ss:$9 sm:$0xff] %v20_v15  ;;  %v836_v25 = vld [vmem:[%s1097_s2 + $0x8] sm:$0xff]  ;;  %v874_v32 = vld [vmem:[%s1097_s2 + $0x138] sm:$0xff] }
   0xa   :  { %473 = vmatpush.bf16.msra.mxu0 %v840_v8  ;;  %v844_v26 = vld [vmem:[%s1097_s2 + $0x48] sm:$0xff]  ;;  %v835_v29 = vld [vmem:[%s1097_s2] sm:$0xff]  ;;  %v882_v33 = vld [vmem:[%s1097_s2 + $0x178] sm:$0xff] }
   0xb   :  { %486 = vmatpush.bf16.msra.mxu1 %v848_v9  ;;  %v852_v27 = vld [vmem:[%s1097_s2 + $0x88] sm:$0xff]  ;;  %v843_v30 = vld [vmem:[%s1097_s2 + $0x40] sm:$0xff]  ;;  %v873_v38 = vld [vmem:[%s1097_s2 + $0x130] sm:$0xff] }
   0xc   :  { %499 = vmatpush.bf16.msra.mxu2 %v856_v10  ;;  %v860_v28 = vld [vmem:[%s1097_s2 + $0xc8] sm:$0xff]  ;;  %v851_v31 = vld [vmem:[%s1097_s2 + $0x80] sm:$0xff]  ;;  %v881_v40 = vld [vmem:[%s1097_s2 + $0x170] sm:$0xff] }
   0xd   :  { %512 = vmatpush.bf16.msra.mxu3 %v864_v11  ;;  %v888_v34 = vld [vmem:[%s1097_s2 + $0x1a8] sm:$0xff]  ;;  %v859_v37 = vld [vmem:[%s1097_s2 + $0xc0] sm:$0xff]  ;;  %v886_v45 = vld [vmem:[%s1097_s2 + $0x198] sm:$0xff] }
   0xe   :  { %474 = vmatpush.bf16.msra.mxu0 %v839_v12  ;;  %v887_v41 = vld [vmem:[%s1097_s2 + $0x1a0] sm:$0xff]  ;;  %v872_v43 = vld [vmem:[%s1097_s2 + $0x128] sm:$0xff]  ;;  %v885_v48 = vld [vmem:[%s1097_s2 + $0x190] sm:$0xff] }
   0xf   :  { %487 = vmatpush.bf16.msra.mxu1 %v847_v13  ;;  %v880_v44 = vld [vmem:[%s1097_s2 + $0x168] sm:$0xff]  ;;  %v871_v46 = vld [vmem:[%s1097_s2 + $0x120] sm:$0xff]  ;;  %v870_v49 = vld [vmem:[%s1097_s2 + $0x118] sm:$0xff] }
  0x10   :  { %500 = vmatpush.bf16.msra.mxu2 %v855_v14  ;;  %v131_v35 = vld [vmem:[#allocation1] sm:$0xff]  ;;  %v132_v36 = vld [vmem:[#allocation1 + $0x9] sm:$0xff]  ;;  %v133_v39 = vld [vmem:[#allocation1 + $0x12] sm:$0xff] }
  0x11   :  { %513 = vmatpush.bf16.msra.mxu3 %v863_v16  ;;  %v134_v42 = vld [vmem:[#allocation1 + $0x1b] sm:$0xff]  ;;  %v884_v51 = vld [vmem:[%s1097_s2 + $0x188] sm:$0xff]  ;;  %v869_v52 = vld [vmem:[%s1097_s2 + $0x110] sm:$0xff] }
  0x12   :  { %475 = vmatpush.bf16.msra.mxu0 %v838_v17  ;;  %v879_v47 = vld [vmem:[%s1097_s2 + $0x160] sm:$0xff]  ;;  %v878_v50 = vld [vmem:[%s1097_s2 + $0x158] sm:$0xff]  ;;  %v877_v53 = vld [vmem:[%s1097_s2 + $0x150] sm:$0xff] }
  0x13   :  { %488 = vmatpush.bf16.msra.mxu1 %v846_v18  ;;  %v883_v54 = vld [vmem:[%s1097_s2 + $0x180] sm:$0xff]  ;;  %v868_v55 = vld [vmem:[%s1097_s2 + $0x108] sm:$0xff]  ;;  %v137_v56 = vld [vmem:[#allocation1 + $0x36] sm:$0xff] }
  0x14   :  { %501 = vmatpush.bf16.msra.mxu2 %v854_v19  ;;  %v876_v57 = vld [vmem:[%s1097_s2 + $0x148] sm:$0xff]  ;;  %v867_v58 = vld [vmem:[%s1097_s2 + $0x100] sm:$0xff] }
  0x15   :  { %514 = vmatpush.bf16.msra.mxu3 %v862_v20  ;;  %v875_v59 = vld [vmem:[%s1097_s2 + $0x140] sm:$0xff]  ;;  %v136_v61 = vld [vmem:[#allocation1 + $0x2d] sm:$0xff] }
  0x16   :  { %476 = vmatpush.bf16.msra.mxu0 %v837_v21  ;;  %v135_v60 = vld [vmem:[#allocation1 + $0x24] sm:$0xff]  ;;  %v889_v14 = vld [vmem:[%s1098_s3] ss:$0 sm:$0xff] }
  0x17   :  { %489 = vmatpush.bf16.msra.mxu1 %v845_v22  ;;  %v890_v16 = vld [vmem:[%s1099_s4] ss:$0 sm:$0xff] }
  0x18   :  { %502 = vmatpush.bf16.msra.mxu2 %v853_v23 }
  0x19   :  { %515 = vmatpush.bf16.msra.mxu3 %v861_v24 }
  0x1a   :  { %477 = vmatpush.bf16.msra.mxu0 %v836_v25 }
  0x1b   :  { %490 = vmatpush.bf16.msra.mxu1 %v844_v26 }
  0x1c   :  { %503 = vmatpush.bf16.msra.mxu2 %v852_v27 }
  0x1d   :  { %516 = vmatpush.bf16.msra.mxu3 %v860_v28 }
  0x1e   :  { %478 = vmatpush.bf16.msra.mxu0 %v835_v29 }
  0x1f   :  { %491 = vmatpush.bf16.msra.mxu1 %v843_v30 }
  0x20   :  { %504 = vmatpush.bf16.msra.mxu2 %v851_v31 }
  0x21   :  { %479 = vmatmul.bf16.vlgmr.msra.gmra.mxu0 %v131_v35  ;;  %517 = vmatpush.bf16.msra.mxu3 %v859_v37 }
  0x22   :  { %523 = vmatpush.bf16.msrb.mxu0 %v874_v32  ;;  %492 = vmatmul.bf16.vlgmr.msra.gmra.mxu1 %v132_v36 }
  0x23   :  { %536 = vmatpush.bf16.msrb.mxu1 %v882_v33  ;;  %505 = vmatmul.bf16.vlgmr.msra.gmra.mxu2 %v133_v39 }
  0x24   :  { %551 = vmatpush.bf16.msrb.mxu2 %v888_v34  ;;  %518 = vmatmul.bf16.vlgmr.msra.gmra.mxu3 %v134_v42 }
  0x26   :  { %524 = vmatpush.bf16.msrb.mxu0 %v873_v38 }
  0x27   :  { %537 = vmatpush.bf16.msrb.mxu1 %v881_v40 }
  0x28   :  { %552 = vmatpush.bf16.msrb.mxu2 %v887_v41 }
  0x2a   :  { %525 = vmatpush.bf16.msrb.mxu0 %v872_v43 }
  0x2b   :  { %538 = vmatpush.bf16.msrb.mxu1 %v880_v44 }
  0x2c   :  { %553 = vmatpush.bf16.msrb.mxu2 %v886_v45 }
  0x2e   :  { %526 = vmatpush.bf16.msrb.mxu0 %v871_v46 }
  0x2f   :  { %539 = vmatpush.bf16.msrb.mxu1 %v879_v47 }
  0x30   :  { %554 = vmatpush.bf16.msrb.mxu2 %v885_v48 }
  0x32   :  { %527 = vmatpush.bf16.msrb.mxu0 %v870_v49 }
  0x33   :  { %540 = vmatpush.bf16.msrb.mxu1 %v878_v50 }
  0x34   :  { %555 = vmatpush.bf16.msrb.mxu2 %v884_v51 }
  0x36   :  { %528 = vmatpush.bf16.msrb.mxu0 %v869_v52 }
  0x37   :  { %541 = vmatpush.bf16.msrb.mxu1 %v877_v53 }
  0x38   :  { %556 = vmatpush.bf16.msrb.mxu2 %v883_v54 }
  0x3a   :  { %529 = vmatpush.bf16.msrb.mxu0 %v868_v55 }
  0x3b   :  { %833 = vmatmul.msk.bf16.vlgmr.msrb.gmra.mxu2 %vm468_vm0, %v137_v56  ;;  %542 = vmatpush.bf16.msrb.mxu1 %v876_v57 }
  0x3e   :  { %530 = vmatpush.bf16.msrb.mxu0 %v867_v58 }
  0x3f   :  { %543 = vmatpush.bf16.msrb.mxu1 %v875_v59 }
  0x41   :  { %531 = vmatmul.bf16.vlgmr.msrb.gmra.mxu0 %v135_v60 }
  0x42   :  { %544 = vmatmul.bf16.vlgmr.msrb.gmra.mxu1 %v136_v61 }
  0x9e   :  { %v480_v62 = vpop.f32.mrf.mxu0 }
  0x9f   :  { %v493_v63 = vpop.f32.mrf.mxu1 }
  0xa0   :  { %v494_v6 = vadd.f32 %v493_v63, %v480_v62 }
  0xa6   :  { %v506_v0 = vpop.f32.mrf.mxu2  ;;  %v482_v1 = vpop.f32.mrf.mxu0 }
  0xa7   :  { %v495_v2 = vpop.f32.mrf.mxu1  ;;  %v519_v3 = vpop.f32.mrf.mxu3  ;;  %v507_v7 = vadd.f32 %v506_v0, %v494_v6 }
  0xa9   :  { %v520_v8 = vadd.f32 %v519_v3, %v507_v7 }
  0xae   :  { %v508_v4 = vpop.f32.mrf.mxu2 }
  0xaf   :  { %v521_v5 = vpop.f32.mrf.mxu3 }
  0xbe   :  { %v558_v9 = vpop.f32.mrf.mxu2  ;;  %v532_v10 = vpop.f32.mrf.mxu0 }
  0xbf   :  { %v533_v11 = vadd.f32 %v532_v10, %v520_v8  ;;  %v545_v12 = vpop.f32.mrf.mxu1 }
  0xc1   :  { %v546_v13 = vadd.f32 %v545_v12, %v533_v11 }
  0xc3   :  { %v559_v15 = vadd.f32 %v558_v9, %v546_v13 }
  0xc5   :  { %v566_v17 = vmul.f32 %v889_v14, %v559_v15 }
  0xc6   :  { %v560_v18 = vpop.f32.mrf.mxu2  ;;  %v534_v19 = vpop.f32.mrf.mxu0 }
  0xc7   :  { %v571_v20 = vadd.f32 %v890_v16, %v566_v17  ;;  %v547_v21 = vpop.f32.mrf.mxu1 }
  0xc9   :  { %v572_v22 = vmax.f32 %v571_v20, 0.0 }
  0xcb   :  { %v573_v23 = vpack.c.bf16 %v572_v22, %v572_v22 }
  0xcd   :  { %575 = vst.msk [vmem:[#allocation2] sm:$0x1] %vm574_vm1, %v573_v23 }
  0xd4   :  { %v594_v24 = vld [vmem:[#allocation2] sm:$0x1] }
  0xd5   :  { %834 = vst [vmem:[%s1100_s5 + $0xd] sm:$0x1] %v594_v24 }

// kernel: resnet_forward.29
= control target key start
LH: loop header
LB: loop body
LE: loop exit
PB: predicated region body
PF: predicated region fallthrough
CT: control target
= control target key end

     0   :  { %vm35_vm0 = vcmask 261120   ;;  %vm63_vm1 = vcmask 516096   ;;  %s125_s1 = inlined_call_operand.vmem [shape: bf16[32,64], index: 1, kind: input, shape index: {}]   ;;  %s126_s2 = inlined_call_operand.vmem [shape: f32[1,64], index: 2, kind: input, shape index: {}]   ;;  %s127_s3 = inlined_call_operand.vmem [shape: f32[1,64], index: 3, kind: input, shape index: {}]   ;;  %s128_s0 = inlined_call_operand.vmem [shape: bf16[2,32], index: 0, kind: input, shape index: {}]   ;;  %s129_s4 = inlined_call_operand.vmem [shape: bf16[2,64], index: 4, kind: output, shape index: {}]  }
   0x1   :  { %v79_v0 = vld [vmem:[%s125_s1 + $0x8] sm:$0xff]  ;;  %v78_v1 = vld [vmem:[%s125_s1] sm:$0xff] }
   0x2   :  { %45 = vmatpush.bf16.msra.mxu0 %v79_v0  ;;  %v18_v2 = vld [vmem:[%s128_s0] sm:$0x1] }
   0x3   :  { %v80_v3 = vld [vmem:[%s126_s2] ss:$0 sm:$0xff] }
   0x4   :  { %v81_v4 = vld [vmem:[%s127_s3] ss:$0 sm:$0xff] }
   0x6   :  { %46 = vmatpush.bf16.msra.mxu0 %v78_v1 }
   0x9   :  { %77 = vmatmul.msk.bf16.vlgmr.msra.gmra.mxu0 %vm35_vm0, %v18_v2 }
  0x86   :  { %v48_v5 = vpop.f32.mrf.mxu0 }
  0x87   :  { %v56_v6 = vmul.f32 %v80_v3, %v48_v5 }
  0x89   :  { %v61_v7 = vadd.f32 %v81_v4, %v56_v6 }
  0x8b   :  { %v62_v8 = vpack.c.bf16 %v61_v7, %v61_v7 }
  0x8d   :  { %64 = vst.msk [vmem:[%s129_s4] sm:$0x1] %vm63_vm1, %v62_v8 }
  0x8e   :  { %v50_v9 = vpop.f32.mrf.mxu0 }

// kernel: resnet_forward.31
= control target key start
LH: loop header
LB: loop body
LE: loop exit
PB: predicated region body
PF: predicated region fallthrough
CT: control target
= control target key end

     0   :  { %s175_s6 = smov 0   ;;  %s195_s0 = inlined_call_operand.vmem [shape: bf16[2,1,64], index: 0, kind: input, shape index: {}]   ;;  %s196_s1 = inlined_call_operand.vmem [shape: f32[2,1,64], index: 1, kind: output, shape index: {}]  }
   0x1 LB: > { %s156_s7 = sadd.s32 4294967295, %s177_s6   ;;  %p160_p0 = scmp.ge.s32.totalorder %s177_s6, 1  ;;  %s177_s6 = sphi %s175_s6, %s11_s6  }
   0x2   : > { %p85_p1 = scmp.lt.s32.totalorder %s177_s6, 3 }
   0x4   : > { %p86_p2 = pnand %p160_p0, %p85_p1 }
   0x5   : > { %p101_p3 = scmp.lt.s32.totalorder (!%p86_p2), %s156_s7, 1 }
   0x6   : > { %89 = sbr.rel (%p86_p2) target bundleno = 17 (0x11), region = 24 }
   0xb   : > { %s198_s7 = smov (!%p101_p3, %s156_s7), 1  ;;  %vm110_vm0 = vcmask 516096  }
   0xc   : > { %s103_s10 = scalar_lea.vmem %s195_s0, %s198_s7  ;;  %s106_s13 = scalar_lea.vmem %s196_s1, %s198_s7 }
   0xd   : > { %v107_v0 = vld [vmem:[%s103_s10] sm:$0x1] }
   0xe   : > { %v108_v1 = vunpack.c.l.bf16 %v107_v0 }
  0x10   : > { %111 = vst.msk [vmem:[%s106_s13] sm:$0x1] %vm110_vm0, %v108_v1 }
  0x11 PF: > { %s11_s6 = sadd.s32 1, %s177_s6  }
  0x12   : > { %p8_p4 = scmp.ge.s32.totalorder %s11_s6, 4  }
  0x14   :  { %10 = sbr.rel (!%p8_p4) target bundleno = 1 (0x1), region = 54 }

// kernel: resnet_forward.30
= control target key start
LH: loop header
LB: loop body
LE: loop exit
PB: predicated region body
PF: predicated region fallthrough
CT: control target
= control target key end

     0   :  { %vm918_vm0 = vcmask 523264   ;;  %vm1118_vm1 = vcmask 516096   ;;  %s2051_s1 = inlined_call_operand.vmem [shape: bf16[1728,64], index: 1, kind: input, shape index: {}]   ;;  %s2052_s0 = inlined_call_operand.vmem [shape: bf16[2,1728], index: 0, kind: input, shape index: {}]   ;;  %s2053_s2 = inlined_call_operand.vmem [shape: f32[1,64], index: 2, kind: input, shape index: {}]   ;;  %s2054_s3 = inlined_call_operand.vmem [shape: f32[1,64], index: 3, kind: input, shape index: {}]   ;;  %s2055_s4 = inlined_call_operand.vmem [shape: bf16[2,64], index: 4, kind: input, shape index: {}]   ;;  %s2056_s5 = inlined_call_operand.vmem [shape: bf16[2,64], index: 5, kind: output, shape index: {}]  }
   0x1   :  { %v1564_v0 = vld [vmem:[%s2051_s1 + $0x38] sm:$0xff]  ;;  %v1563_v4 = vld [vmem:[%s2051_s1 + $0x30] sm:$0xff]  ;;  %v1562_v8 = vld [vmem:[%s2051_s1 + $0x28] sm:$0xff] }
   0x2   :  { %v1580_v1 = vld [vmem:[%s2051_s1 + $0xb8] sm:$0xff]  ;;  %921 = vmatpush.bf16.msra.mxu0 %v1564_v0  ;;  %v1579_v5 = vld [vmem:[%s2051_s1 + $0xb0] sm:$0xff]  ;;  %v1578_v9 = vld [vmem:[%s2051_s1 + $0xa8] sm:$0xff] }
   0x3   :  { %v1572_v2 = vld [vmem:[%s2051_s1 + $0x78] sm:$0xff]  ;;  %947 = vmatpush.bf16.msra.mxu2 %v1580_v1  ;;  %v1571_v6 = vld [vmem:[%s2051_s1 + $0x70] sm:$0xff]  ;;  %v1570_v10 = vld [vmem:[%s2051_s1 + $0x68] sm:$0xff] }
   0x4   :  { %v1588_v3 = vld [vmem:[%s2051_s1 + $0xf8] sm:$0xff]  ;;  %934 = vmatpush.bf16.msra.mxu1 %v1572_v2  ;;  %v1587_v7 = vld [vmem:[%s2051_s1 + $0xf0] sm:$0xff]  ;;  %v1586_v11 = vld [vmem:[%s2051_s1 + $0xe8] sm:$0xff] }
   0x5   :  { %960 = vmatpush.bf16.msra.mxu3 %v1588_v3  ;;  %v1561_v12 = vld [vmem:[%s2051_s1 + $0x20] sm:$0xff]  ;;  %v1560_v16 = vld [vmem:[%s2051_s1 + $0x18] sm:$0xff]  ;;  %v1559_v21 = vld [vmem:[%s2051_s1 + $0x10] sm:$0xff] }
   0x6   :  { %922 = vmatpush.bf16.msra.mxu0 %v1563_v4  ;;  %v1577_v13 = vld [vmem:[%s2051_s1 + $0xa0] sm:$0xff]  ;;  %v1576_v17 = vld [vmem:[%s2051_s1 + $0x98] sm:$0xff]  ;;  %v1575_v22 = vld [vmem:[%s2051_s1 + $0x90] sm:$0xff] }
   0x7   :  { %948 = vmatpush.bf16.msra.mxu2 %v1579_v5  ;;  %v1569_v14 = vld [vmem:[%s2051_s1 + $0x60] sm:$0xff]  ;;  %v1568_v18 = vld [vmem:[%s2051_s1 + $0x58] sm:$0xff]  ;;  %v1567_v23 = vld [vmem:[%s2051_s1 + $0x50] sm:$0xff] }
   0x8   :  { %935 = vmatpush.bf16.msra.mxu1 %v1571_v6  ;;  %v1585_v15 = vld [vmem:[%s2051_s1 + $0xe0] sm:$0xff]  ;;  %v1584_v19 = vld [vmem:[%s2051_s1 + $0xd8] sm:$0xff]  ;;  %v1583_v24 = vld [vmem:[%s2051_s1 + $0xd0] sm:$0xff] }
   0x9   :  { %961 = vmatpush.bf16.msra.mxu3 %v1587_v7  ;;  %v21_v20 = vld [vmem:[%s2052_s0] sm:$0xff]  ;;  %v1558_v25 = vld [vmem:[%s2051_s1 + $0x8] sm:$0xff]  ;;  %v1596_v31 = vld [vmem:[%s2051_s1 + $0x138] sm:$0xff] }
   0xa   :  { %923 = vmatpush.bf16.msra.mxu0 %v1562_v8  ;;  %240 = vst [vmem:[#allocation1] ss:$9 sm:$0xff] %v21_v20  ;;  %v1574_v26 = vld [vmem:[%s2051_s1 + $0x88] sm:$0xff]  ;;  %v1557_v29 = vld [vmem:[%s2051_s1] sm:$0xff]  ;;  %v1612_v32 = vld [vmem:[%s2051_s1 + $0x1b8] sm:$0xff] }
   0xb   :  { %949 = vmatpush.bf16.msra.mxu2 %v1578_v9  ;;  %v1566_v27 = vld [vmem:[%s2051_s1 + $0x48] sm:$0xff]  ;;  %v1573_v30 = vld [vmem:[%s2051_s1 + $0x80] sm:$0xff]  ;;  %v1604_v35 = vld [vmem:[%s2051_s1 + $0x178] sm:$0xff] }
   0xc   :  { %936 = vmatpush.bf16.msra.mxu1 %v1570_v10  ;;  %v1582_v28 = vld [vmem:[%s2051_s1 + $0xc8] sm:$0xff]  ;;  %v1565_v33 = vld [vmem:[%s2051_s1 + $0x40] sm:$0xff]  ;;  %v1620_v36 = vld [vmem:[%s2051_s1 + $0x1f8] sm:$0xff] }
   0xd   :  { %962 = vmatpush.bf16.msra.mxu3 %v1586_v11  ;;  %v1581_v34 = vld [vmem:[%s2051_s1 + $0xc0] sm:$0xff]  ;;  %v1595_v37 = vld [vmem:[%s2051_s1 + $0x130] sm:$0xff]  ;;  %v22_v43 = vld [vmem:[%s2052_s0 + $0x8] sm:$0x3f] }
   0xe   :  { %924 = vmatpush.bf16.msra.mxu0 %v1561_v12  ;;  %v1611_v38 = vld [vmem:[%s2051_s1 + $0x1b0] sm:$0xff]  ;;  %v1594_v50 = vld [vmem:[%s2051_s1 + $0x128] sm:$0xff]  ;;  %v1593_v54 = vld [vmem:[%s2051_s1 + $0x120] sm:$0xff] }
   0xf   :  { %950 = vmatpush.bf16.msra.mxu2 %v1577_v13  ;;  %v1603_v41 = vld [vmem:[%s2051_s1 + $0x170] sm:$0xff]  ;;  %v1610_v51 = vld [vmem:[%s2051_s1 + $0x1a8] sm:$0xff]  ;;  %v1609_v55 = vld [vmem:[%s2051_s1 + $0x1a0] sm:$0xff] }
  0x10   :  { %937 = vmatpush.bf16.msra.mxu1 %v1569_v14  ;;  %v1619_v42 = vld [vmem:[%s2051_s1 + $0x1f0] sm:$0xff]  ;;  %v1602_v52 = vld [vmem:[%s2051_s1 + $0x168] sm:$0xff]  ;;  %v1601_v56 = vld [vmem:[%s2051_s1 + $0x160] sm:$0xff] }
  0x11   :  { %963 = vmatpush.bf16.msra.mxu3 %v1585_v15  ;;  %v243_v39 = vld [vmem:[#allocation1 + $0x12] sm:$0xff]  ;;  %v241_v40 = vld [vmem:[#allocation1] sm:$0xff]  ;;  %v242_v45 = vld [vmem:[#allocation1 + $0x9] sm:$0xff] }
  0x12   :  { %925 = vmatpush.bf16.msra.mxu0 %v1560_v16  ;;  %v244_v44 = vld [vmem:[#allocation1 + $0x1b] sm:$0xff]  ;;  %v1825_v47 = vld [vmem:[#allocation1 + $0x24] sm:$0xff]  ;;  %v1829_v49 = vld [vmem:[#allocation1 + $0x2d] sm:$0xff] }
  0x13   :  { %951 = vmatpush.bf16.msra.mxu2 %v1576_v17  ;;  %v1823_v46 = vld [vmem:[#allocation1 + $0x36] sm:$0xff]  ;;  %v1827_v48 = vld [vmem:[#allocation1 + $0x3f] sm:$0xff]  ;;  %v1618_v53 = vld [vmem:[%s2051_s1 + $0x1e8] sm:$0xff] }
  0x14   :  { %938 = vmatpush.bf16.msra.mxu1 %v1568_v18  ;;  %250 = vst [vmem:[#allocation1] ss:$9 sm:$0xff] %v22_v43  ;;  %v1617_v57 = vld [vmem:[%s2051_s1 + $0x1e0] sm:$0xff]  ;;  %v1592_v58 = vld [vmem:[%s2051_s1 + $0x118] sm:$0xff]  ;;  %v1591_v62 = vld [vmem:[%s2051_s1 + $0x110] sm:$0xff] }
  0x15   :  { %964 = vmatpush.bf16.msra.mxu3 %v1584_v19  ;;  %v1608_v59 = vld [vmem:[%s2051_s1 + $0x198] sm:$0xff]  ;;  %v1607_v63 = vld [vmem:[%s2051_s1 + $0x190] sm:$0xff]  ;;  %v1590_v2 = vld [vmem:[%s2051_s1 + $0x108] sm:$0xff] }
  0x16   :  { %926 = vmatpush.bf16.msra.mxu0 %v1559_v21  ;;  %v1600_v60 = vld [vmem:[%s2051_s1 + $0x158] sm:$0xff]  ;;  %v1599_v0 = vld [vmem:[%s2051_s1 + $0x150] sm:$0xff]  ;;  %v1606_v3 = vld [vmem:[%s2051_s1 + $0x188] sm:$0xff] }
  0x17   :  { %952 = vmatpush.bf16.msra.mxu2 %v1575_v22  ;;  %v1616_v61 = vld [vmem:[%s2051_s1 + $0x1d8] sm:$0xff]  ;;  %v1615_v1 = vld [vmem:[%s2051_s1 + $0x1d0] sm:$0xff]  ;;  %v1598_v4 = vld [vmem:[%s2051_s1 + $0x148] sm:$0xff] }
  0x18   :  { %939 = vmatpush.bf16.msra.mxu1 %v1567_v23  ;;  %v1614_v5 = vld [vmem:[%s2051_s1 + $0x1c8] sm:$0xff]  ;;  %v1589_v6 = vld [vmem:[%s2051_s1 + $0x100] sm:$0xff]  ;;  %v1628_v8 = vld [vmem:[%s2051_s1 + $0x238] sm:$0xff] }
  0x19   :  { %965 = vmatpush.bf16.msra.mxu3 %v1583_v24  ;;  %v1605_v7 = vld [vmem:[%s2051_s1 + $0x180] sm:$0xff]  ;;  %v1644_v9 = vld [vmem:[%s2051_s1 + $0x2b8] sm:$0xff]  ;;  %v1627_v14 = vld [vmem:[%s2051_s1 + $0x230] sm:$0xff] }
  0x1a   :  { %927 = vmatpush.bf16.msra.mxu0 %v1558_v25  ;;  %v1597_v10 = vld [vmem:[%s2051_s1 + $0x140] sm:$0xff]  ;;  %v1636_v12 = vld [vmem:[%s2051_s1 + $0x278] sm:$0xff]  ;;  %v1643_v15 = vld [vmem:[%s2051_s1 + $0x2b0] sm:$0xff] }
  0x1b   :  { %953 = vmatpush.bf16.msra.mxu2 %v1574_v26  ;;  %v1613_v11 = vld [vmem:[%s2051_s1 + $0x1c0] sm:$0xff]  ;;  %v1652_v13 = vld [vmem:[%s2051_s1 + $0x2f8] sm:$0xff]  ;;  %v1635_v16 = vld [vmem:[%s2051_s1 + $0x270] sm:$0xff] }
  0x1c   :  { %940 = vmatpush.bf16.msra.mxu1 %v1566_v27  ;;  %v1651_v17 = vld [vmem:[%s2051_s1 + $0x2f0] sm:$0xff]  ;;  %v1626_v18 = vld [vmem:[%s2051_s1 + $0x228] sm:$0xff]  ;;  %v1625_v22 = vld [vmem:[%s2051_s1 + $0x220] sm:$0xff] }
  0x1d   :  { %966 = vmatpush.bf16.msra.mxu3 %v1582_v28  ;;  %v1642_v19 = vld [vmem:[%s2051_s1 + $0x2a8] sm:$0xff]  ;;  %v1641_v23 = vld [vmem:[%s2051_s1 + $0x2a0] sm:$0xff]  ;;  %v1624_v26 = vld [vmem:[%s2051_s1 + $0x218] sm:$0xff] }
  0x1e   :  { %928 = vmatpush.bf16.msra.mxu0 %v1557_v29  ;;  %v1634_v20 = vld [vmem:[%s2051_s1 + $0x268] sm:$0xff]  ;;  %v1633_v24 = vld [vmem:[%s2051_s1 + $0x260] sm:$0xff]  ;;  %v1640_v27 = vld [vmem:[%s2051_s1 + $0x298] sm:$0xff] }
  0x1f   :  { %954 = vmatpush.bf16.msra.mxu2 %v1573_v30  ;;  %v1650_v21 = vld [vmem:[%s2051_s1 + $0x2e8] sm:$0xff]  ;;  %v1649_v25 = vld [vmem:[%s2051_s1 + $0x2e0] sm:$0xff]  ;;  %v1632_v28 = vld [vmem:[%s2051_s1 + $0x258] sm:$0xff] }
  0x20   :  { %941 = vmatpush.bf16.msra.mxu1 %v1565_v33  ;;  %v1648_v29 = vld [vmem:[%s2051_s1 + $0x2d8] sm:$0xff]  ;;  %v1623_v30 = vld [vmem:[%s2051_s1 + $0x210] sm:$0xff]  ;;  %v251_v43 = vld [vmem:[#allocation1] sm:$0xff] }
  0x21   :  { %967 = vmatpush.bf16.msra.mxu3 %v1581_v34  ;;  %929 = vmatmul.bf16.vlgmr.msra.gmra.mxu0 %v241_v40  ;;  %v1647_v33 = vld [vmem:[%s2051_s1 + $0x2d0] sm:$0xff]  ;;  %v1622_v34 = vld [vmem:[%s2051_s1 + $0x208] sm:$0xff]  ;;  %v1660_v40 = vld [vmem:[%s2051_s1 + $0x338] sm:$0xff] }
  0x22   :  { %973 = vmatpush.bf16.msrb.mxu0 %v1596_v31  ;;  %955 = vmatmul.bf16.vlgmr.msra.gmra.mxu2 %v243_v39  ;;  %v1639_v31 = vld [vmem:[%s2051_s1 + $0x290] sm:$0xff]  ;;  %v1637_v39 = vld [vmem:[%s2051_s1 + $0x280] sm:$0xff] }
  0x23   :  { %999 = vmatpush.bf16.msrb.mxu2 %v1612_v32  ;;  %942 = vmatmul.bf16.vlgmr.msra.gmra.mxu1 %v242_v45  ;;  %v1631_v32 = vld [vmem:[%s2051_s1 + $0x250] sm:$0xff]  ;;  %v1664_v45 = vld [vmem:[%s2051_s1 + $0x358] sm:$0xff] }
  0x24   :  { %986 = vmatpush.bf16.msrb.mxu1 %v1604_v35  ;;  %968 = vmatmul.bf16.vlgmr.msra.gmra.mxu3 %v244_v44  ;;  %v1638_v35 = vld [vmem:[%s2051_s1 + $0x288] sm:$0xff]  ;;  %v253_v44 = vld [vmem:[#allocation1 + $0x12] sm:$0xff] }
  0x25   :  { %1012 = vmatpush.bf16.msrb.mxu3 %v1620_v36  ;;  %v1630_v36 = vld [vmem:[%s2051_s1 + $0x248] sm:$0xff] }
  0x26   :  { %974 = vmatpush.bf16.msrb.mxu0 %v1595_v37  ;;  %v1646_v37 = vld [vmem:[%s2051_s1 + $0x2c8] sm:$0xff] }
  0x27   :  { %1000 = vmatpush.bf16.msrb.mxu2 %v1611_v38  ;;  %v1621_v38 = vld [vmem:[%s2051_s1 + $0x200] sm:$0xff] }
  0x28   :  { %987 = vmatpush.bf16.msrb.mxu1 %v1603_v41  ;;  %v1629_v41 = vld [vmem:[%s2051_s1 + $0x240] sm:$0xff] }
  0x29   :  { %1013 = vmatpush.bf16.msrb.mxu3 %v1619_v42  ;;  %v1645_v42 = vld [vmem:[%s2051_s1 + $0x2c0] sm:$0xff] }
  0x2a   :  { %975 = vmatpush.bf16.msrb.mxu0 %v1594_v50  ;;  %v1658_v50 = vld [vmem:[%s2051_s1 + $0x328] sm:$0xff] }
  0x2b   :  { %1001 = vmatpush.bf16.msrb.mxu2 %v1610_v51  ;;  %v1662_v51 = vld [vmem:[%s2051_s1 + $0x348] sm:$0xff] }
  0x2c   :  { %988 = vmatpush.bf16.msrb.mxu1 %v1602_v52  ;;  %v1657_v52 = vld [vmem:[%s2051_s1 + $0x320] sm:$0xff] }
  0x2d   :  { %1014 = vmatpush.bf16.msrb.mxu3 %v1618_v53  ;;  %v1661_v53 = vld [vmem:[%s2051_s1 + $0x340] sm:$0xff] }
  0x2e   :  { %976 = vmatpush.bf16.msrb.mxu0 %v1593_v54  ;;  %v1656_v54 = vld [vmem:[%s2051_s1 + $0x318] sm:$0xff] }
  0x2f   :  { %1002 = vmatpush.bf16.msrb.mxu2 %v1609_v55  ;;  %v1655_v55 = vld [vmem:[%s2051_s1 + $0x310] sm:$0xff] }
  0x30   :  { %989 = vmatpush.bf16.msrb.mxu1 %v1601_v56  ;;  %v256_v56 = vld [vmem:[#allocation1 + $0x2d] sm:$0xff] }
  0x31   :  { %1015 = vmatpush.bf16.msrb.mxu3 %v1617_v57  ;;  %v1654_v57 = vld [vmem:[%s2051_s1 + $0x308] sm:$0xff] }
  0x32   :  { %977 = vmatpush.bf16.msrb.mxu0 %v1592_v58  ;;  %v1653_v58 = vld [vmem:[%s2051_s1 + $0x300] sm:$0xff] }
  0x33   :  { %1003 = vmatpush.bf16.msrb.mxu2 %v1608_v59  ;;  %v255_v59 = vld [vmem:[#allocation1 + $0x24] sm:$0xff] }
  0x34   :  { %990 = vmatpush.bf16.msrb.mxu1 %v1600_v60 }
  0x35   :  { %1016 = vmatpush.bf16.msrb.mxu3 %v1616_v61 }
  0x36   :  { %978 = vmatpush.bf16.msrb.mxu0 %v1591_v62 }
  0x37   :  { %1004 = vmatpush.bf16.msrb.mxu2 %v1607_v63 }
  0x38   :  { %991 = vmatpush.bf16.msrb.mxu1 %v1599_v0 }
  0x39   :  { %1017 = vmatpush.bf16.msrb.mxu3 %v1615_v1 }
  0x3a   :  { %979 = vmatpush.bf16.msrb.mxu0 %v1590_v2 }
  0x3b   :  { %1005 = vmatpush.bf16.msrb.mxu2 %v1606_v3 }
  0x3c   :  { %992 = vmatpush.bf16.msrb.mxu1 %v1598_v4 }
  0x3d   :  { %1018 = vmatpush.bf16.msrb.mxu3 %v1614_v5 }
  0x3e   :  { %980 = vmatpush.bf16.msrb.mxu0 %v1589_v6 }
  0x3f   :  { %1006 = vmatpush.bf16.msrb.mxu2 %v1605_v7 }
  0x40   :  { %993 = vmatpush.bf16.msrb.mxu1 %v1597_v10 }
  0x41   :  { %1019 = vmatpush.bf16.msrb.mxu3 %v1613_v11  ;;  %981 = vmatmul.bf16.vlgmr.msrb.gmra.mxu0 %v1825_v47  ;;  %v254_v47 = vld [vmem:[#allocation1 + $0x1b] sm:$0xff] }
  0x42   :  { %1025 = vmatpush.bf16.msra.mxu0 %v1628_v8  ;;  %1007 = vmatmul.bf16.vlgmr.msrb.gmra.mxu2 %v1823_v46  ;;  %v252_v46 = vld [vmem:[#allocation1 + $0x9] sm:$0xff] }
  0x43   :  { %1051 = vmatpush.bf16.msra.mxu2 %v1644_v9  ;;  %994 = vmatmul.bf16.vlgmr.msrb.gmra.mxu1 %v1829_v49  ;;  %v1663_v49 = vld [vmem:[%s2051_s1 + $0x350] sm:$0xff] }
  0x44   :  { %1038 = vmatpush.bf16.msra.mxu1 %v1636_v12  ;;  %1020 = vmatmul.bf16.vlgmr.msrb.gmra.mxu3 %v1827_v48  ;;  %v1659_v48 = vld [vmem:[%s2051_s1 + $0x330] sm:$0xff] }
  0x45   :  { %1064 = vmatpush.bf16.msra.mxu3 %v1652_v13 }
  0x46   :  { %1026 = vmatpush.bf16.msra.mxu0 %v1627_v14 }
  0x47   :  { %1052 = vmatpush.bf16.msra.mxu2 %v1643_v15 }
  0x48   :  { %1039 = vmatpush.bf16.msra.mxu1 %v1635_v16 }
  0x49   :  { %1065 = vmatpush.bf16.msra.mxu3 %v1651_v17 }
  0x4a   :  { %1027 = vmatpush.bf16.msra.mxu0 %v1626_v18 }
  0x4b   :  { %1053 = vmatpush.bf16.msra.mxu2 %v1642_v19 }
  0x4c   :  { %1040 = vmatpush.bf16.msra.mxu1 %v1634_v20 }
  0x4d   :  { %1066 = vmatpush.bf16.msra.mxu3 %v1650_v21 }
  0x4e   :  { %1028 = vmatpush.bf16.msra.mxu0 %v1625_v22 }
  0x4f   :  { %1054 = vmatpush.bf16.msra.mxu2 %v1641_v23 }
  0x50   :  { %1041 = vmatpush.bf16.msra.mxu1 %v1633_v24 }
  0x51   :  { %1067 = vmatpush.bf16.msra.mxu3 %v1649_v25 }
  0x52   :  { %1029 = vmatpush.bf16.msra.mxu0 %v1624_v26 }
  0x53   :  { %1055 = vmatpush.bf16.msra.mxu2 %v1640_v27 }
  0x54   :  { %1042 = vmatpush.bf16.msra.mxu1 %v1632_v28 }
  0x55   :  { %1068 = vmatpush.bf16.msra.mxu3 %v1648_v29 }
  0x56   :  { %1030 = vmatpush.bf16.msra.mxu0 %v1623_v30 }
  0x57   :  { %1056 = vmatpush.bf16.msra.mxu2 %v1639_v31 }
  0x58   :  { %1043 = vmatpush.bf16.msra.mxu1 %v1631_v32 }
  0x59   :  { %1069 = vmatpush.bf16.msra.mxu3 %v1647_v33 }
  0x5a   :  { %1031 = vmatpush.bf16.msra.mxu0 %v1622_v34 }
  0x5b   :  { %1057 = vmatpush.bf16.msra.mxu2 %v1638_v35  ;;  %v1665_v35 = vld [vmem:[%s2053_s2] ss:$0 sm:$0xff] }
  0x5c   :  { %1044 = vmatpush.bf16.msra.mxu1 %v1630_v36  ;;  %v1113_v36 = vld [vmem:[%s2055_s4] sm:$0x1] }
  0x5d   :  { %1070 = vmatpush.bf16.msra.mxu3 %v1646_v37 }
  0x5e   :  { %1032 = vmatpush.bf16.msra.mxu0 %v1621_v38  ;;  %v1666_v38 = vld [vmem:[%s2054_s3] ss:$0 sm:$0xff] }
  0x5f   :  { %1058 = vmatpush.bf16.msra.mxu2 %v1637_v39 }
  0x60   :  { %1045 = vmatpush.bf16.msra.mxu1 %v1629_v41 }
  0x61   :  { %1071 = vmatpush.bf16.msra.mxu3 %v1645_v42  ;;  %1033 = vmatmul.bf16.vlgmr.msra.gmra.mxu0 %v251_v43 }
  0x62   :  { %1077 = vmatpush.bf16.msrb.mxu0 %v1660_v40  ;;  %1059 = vmatmul.bf16.vlgmr.msra.gmra.mxu2 %v253_v44  ;;  %v1114_v40 = vunpack.c.l.bf16 %v1113_v36 }
  0x63   :  { %1046 = vmatmul.bf16.vlgmr.msra.gmra.mxu1 %v252_v46 }
  0x64   :  { %1094 = vmatpush.bf16.msrb.mxu1 %v1664_v45  ;;  %1072 = vmatmul.bf16.vlgmr.msra.gmra.mxu3 %v254_v47 }
  0x66   :  { %1078 = vmatpush.bf16.msrb.mxu0 %v1659_v48 }
  0x68   :  { %1095 = vmatpush.bf16.msrb.mxu1 %v1663_v49 }
  0x6a   :  { %1079 = vmatpush.bf16.msrb.mxu0 %v1658_v50 }
  0x6c   :  { %1096 = vmatpush.bf16.msrb.mxu1 %v1662_v51 }
  0x6e   :  { %1080 = vmatpush.bf16.msrb.mxu0 %v1657_v52 }
  0x70   :  { %1097 = vmatpush.bf16.msrb.mxu1 %v1661_v53 }
  0x72   :  { %1081 = vmatpush.bf16.msrb.mxu0 %v1656_v54 }
  0x73   :  { %1556 = vmatmul.msk.bf16.vlgmr.msrb.gmra.mxu1 %vm918_vm0, %v256_v56 }
  0x76   :  { %1082 = vmatpush.bf16.msrb.mxu0 %v1655_v55 }
  0x7a   :  { %1083 = vmatpush.bf16.msrb.mxu0 %v1654_v57 }
  0x7e   :  { %1084 = vmatpush.bf16.msrb.mxu0 %v1653_v58 }
  0x81   :  { %1085 = vmatmul.bf16.vlgmr.msrb.gmra.mxu0 %v255_v59 }
  0x9e   :  { %v930_v60 = vpop.f32.mrf.mxu0 }
  0xa0   :  { %v943_v61 = vpop.f32.mrf.mxu1 }
  0xa1   :  { %v944_v12 = vadd.f32 %v943_v61, %v930_v60 }
  0xa5   :  { %v956_v62 = vpop.f32.mrf.mxu2 }
  0xa6   :  { %v932_v0 = vpop.f32.mrf.mxu0  ;;  %v957_v13 = vadd.f32 %v956_v62, %v944_v12 }
  0xa7   :  { %v969_v63 = vpop.f32.mrf.mxu3 }
  0xa8   :  { %v945_v1 = vpop.f32.mrf.mxu1  ;;  %v970_v15 = vadd.f32 %v969_v63, %v957_v13 }
  0xad   :  { %v958_v2 = vpop.f32.mrf.mxu2 }
  0xaf   :  { %v971_v3 = vpop.f32.mrf.mxu3 }
  0xbe   :  { %v982_v4 = vpop.f32.mrf.mxu0 }
  0xbf   :  { %v983_v17 = vadd.f32 %v982_v4, %v970_v15 }
  0xc0   :  { %v995_v5 = vpop.f32.mrf.mxu1 }
  0xc1   :  { %v996_v21 = vadd.f32 %v995_v5, %v983_v17 }
  0xc5   :  { %v1008_v6 = vpop.f32.mrf.mxu2 }
  0xc6   :  { %v984_v8 = vpop.f32.mrf.mxu0  ;;  %v1009_v23 = vadd.f32 %v1008_v6, %v996_v21 }
  0xc7   :  { %v1021_v7 = vpop.f32.mrf.mxu3 }
  0xc8   :  { %v997_v9 = vpop.f32.mrf.mxu1  ;;  %v1022_v26 = vadd.f32 %v1021_v7, %v1009_v23 }
  0xcd   :  { %v1010_v10 = vpop.f32.mrf.mxu2 }
  0xcf   :  { %v1023_v11 = vpop.f32.mrf.mxu3 }
  0xde   :  { %v1034_v14 = vpop.f32.mrf.mxu0 }
  0xdf   :  { %v1035_v28 = vadd.f32 %v1034_v14, %v1022_v26 }
  0xe0   :  { %v1047_v16 = vpop.f32.mrf.mxu1 }
  0xe1   :  { %v1048_v29 = vadd.f32 %v1047_v16, %v1035_v28 }
  0xe5   :  { %v1060_v18 = vpop.f32.mrf.mxu2 }
  0xe6   :  { %v1036_v20 = vpop.f32.mrf.mxu0  ;;  %v1061_v30 = vadd.f32 %v1060_v18, %v1048_v29 }
  0xe7   :  { %v1073_v19 = vpop.f32.mrf.mxu3 }
  0xe8   :  { %v1049_v22 = vpop.f32.mrf.mxu1  ;;  %v1074_v32 = vadd.f32 %v1073_v19, %v1061_v30 }
  0xed   :  { %v1062_v24 = vpop.f32.mrf.mxu2 }
  0xef   :  { %v1075_v25 = vpop.f32.mrf.mxu3 }
  0xf0   :  { %v1099_v27 = vpop.f32.mrf.mxu1 }
  0xf8   :  { %v1101_v31 = vpop.f32.mrf.mxu1 }
  0xfe   :  { %v1086_v33 = vpop.f32.mrf.mxu0 }
  0xff   :  { %v1087_v34 = vadd.f32 %v1086_v33, %v1074_v32 }
 0x101   :  { %v1100_v37 = vadd.f32 %v1099_v27, %v1087_v34 }
 0x103   :  { %v1107_v39 = vmul.f32 %v1665_v35, %v1100_v37 }
 0x105   :  { %v1112_v41 = vadd.f32 %v1666_v38, %v1107_v39 }
 0x106   :  { %v1088_v42 = vpop.f32.mrf.mxu0 }
 0x107   :  { %v1115_v43 = vadd.f32 %v1114_v40, %v1112_v41 }
 0x109   :  { %v1116_v44 = vmax.f32 %v1115_v43, 0.0 }
 0x10b   :  { %v1117_v45 = vpack.c.bf16 %v1116_v44, %v1116_v44 }
 0x10d   :  { %1119 = vst.msk [vmem:[%s2056_s5] sm:$0x1] %vm1118_vm1, %v1117_v45 }

// kernel: resnet_forward.32
= control target key start
LH: loop header
LB: loop body
LE: loop exit
PB: predicated region body
PF: predicated region fallthrough
CT: control target
= control target key end

     0   :  { %vm51_vm0 = vcmask 523264   ;;  %vm78_vm1 = vcmask 123904   ;;  %s156_s1 = inlined_call_operand.vmem [shape: bf16[64,16], index: 1, kind: input, shape index: {}]   ;;  %s157_s2 = inlined_call_operand.vmem [shape: f32[1,16], index: 2, kind: input, shape index: {}]   ;;  %s158_s3 = inlined_call_operand.vmem [shape: f32[1,16], index: 3, kind: input, shape index: {}]   ;;  %s159_s0 = inlined_call_operand.vmem [shape: bf16[2,64], index: 0, kind: input, shape index: {}]   ;;  %s160_s4 = inlined_call_operand.vmem [shape: f32[2,16], index: 4, kind: output, shape index: {}]  }
   0x1   :  { %v104_v0 = vld [vmem:[%s156_s1 + $0x18] sm:$0xff]  ;;  %v103_v1 = vld [vmem:[%s156_s1 + $0x10] sm:$0xff]  ;;  %v102_v2 = vld [vmem:[%s156_s1 + $0x8] sm:$0xff] }
   0x2   :  { %59 = vmatpush.bf16.msra.mxu0 %v104_v0  ;;  %v101_v3 = vld [vmem:[%s156_s1] sm:$0xff] }
   0x3   :  { %v18_v4 = vld [vmem:[%s159_s0] sm:$0x1] }
   0x4   :  { %v105_v5 = vld [vmem:[%s157_s2] ss:$0 sm:$0xff] }
   0x5   :  { %v106_v6 = vld [vmem:[%s158_s3] ss:$0 sm:$0xff] }
   0x6   :  { %60 = vmatpush.bf16.msra.mxu0 %v103_v1 }
   0xa   :  { %61 = vmatpush.bf16.msra.mxu0 %v102_v2 }
   0xe   :  { %62 = vmatpush.bf16.msra.mxu0 %v101_v3 }
  0x11   :  { %100 = vmatmul.msk.bf16.vlgmr.msra.gmra.mxu0 %vm51_vm0, %v18_v4 }
  0x8e   :  { %v64_v7 = vpop.f32.mrf.mxu0 }
  0x8f   :  { %v72_v8 = vmul.f32 %v105_v5, %v64_v7 }
  0x91   :  { %v77_v9 = vadd.f32 %v106_v6, %v72_v8 }
  0x93   :  { %79 = vst.msk [vmem:[%s160_s4] sm:$0x3] %vm78_vm1, %v77_v9 }
  0x96   :  { %v66_v10 = vpop.f32.mrf.mxu0 }

// kernel: resnet_forward.33
= control target key start
LH: loop header
LB: loop body
LE: loop exit
PB: predicated region body
PF: predicated region fallthrough
CT: control target
= control target key end

     0   :  { %s149_s0 = inlined_call_operand.vmem [shape: bf16[2,16], index: 0, kind: input, shape index: {}]   ;;  %s150_s1 = inlined_call_operand.vmem [shape: bf16[16,2], index: 1, kind: input, shape index: {}]   ;;  %s151_s2 = inlined_call_operand.vmem [shape: f32[1,2], index: 2, kind: input, shape index: {}]   ;;  %s152_s3 = inlined_call_operand.vmem [shape: f32[1,2], index: 3, kind: input, shape index: {}]   ;;  %s153_s4 = inlined_call_operand.hbm [shape: f32[2,2], index: 4, kind: output, shape index: {}]  }
   0x1   :  { %v78_v0 = vld [vmem:[%s150_s1] sm:$0xff] }
   0x2   :  { %9 = vsyncpa [#allocation3], 0  ;;  %39 = vmatpush.bf16.msra.mxu0 %v78_v0  ;;  %v19_v1 = vld [vmem:[%s149_s0] sm:$0x1]  ;;  %vm28_vm0 = vcmask 130048   ;;  %s108_s23 = smov [#allocation2]  }
   0x3   :  { %v80_v2 = vld [vmem:[%s151_s2] ss:$0 sm:$0xff]  ;;  %s62_s24 = sshll.u32 %s108_s23, 4  ;;  %s64_s26 = sshll.u32 %s153_s4, 4  ;;  %vm55_vm1 = vcmask 9216   ;;  %s63_s24 = int_to_ptr.vmem [resolvable:$true] %s62_s24  ;;  %s65_s26 = int_to_ptr.hbm [resolvable:$true] %s64_s26 }
   0x4   :  { %v81_v3 = vld [vmem:[%s152_s3] ss:$0 sm:$0xff] }
   0x5   :  { %77 = vmatmul.msk.bf16.vlgmr.msra.gmra.mxu0 %vm28_vm0, %v19_v1 }
  0x82   :  { %v41_v4 = vpop.f32.mrf.mxu0 }
  0x83   :  { %v49_v5 = vmul.f32 %v80_v2, %v41_v4 }
  0x85   :  { %v54_v6 = vadd.f32 %v81_v3, %v49_v5 }
  0x87   :  { %56 = vst.msk [vmem:[#allocation2] sm:$0x3] %vm55_vm1, %v54_v6 }
  0x88   :  { %67 = dma.vmem_to_hbm [thread:$0]  %s63_s24, 32, %s65_s26, [#allocation3]  }
  0x8a   :  { %v43_v7 = vpop.f32.mrf.mxu0 }
  0x8b   :  { %106 = dma.done.wait [#allocation3], 32  }
  0x8c   :  { %107 = vsyncadd [#allocation3], 4294967264 }
  0x8d   :  { %72 = vsyncpa [#allocation3], 1 }

</bundles_post_ra>
